<compile_context>
chip_gen: v7x
topology: tpu7x:2x2x1
jax: 0.10.0
libtpu: 0.0.40
codegen_flags: <defaults>
</compile_context>

<pallas_src>
import functools

import jax
import jax.numpy as jnp
from jax.experimental import pallas as pl
from jax.experimental.pallas import tpu as pltpu

EPS = 1e-5  # PyTorch InstanceNorm2d default eps (affine=False by default)


# --------------------------- in-kernel helpers -------------------------------

def _reflect_pad1(img):
    """ReflectionPad2d(1) of an (H, W, C) tile, done with static slices."""
    H, W = img.shape[0], img.shape[1]
    p = jnp.concatenate([img[1:2], img, img[H - 2:H - 1]], axis=0)
    p = jnp.concatenate([p[:, 1:2], p, p[:, W - 2:W - 1]], axis=1)
    return p


def _conv3x3(xp, w_ref):
    """xp: (H+2, W+2, C) padded tile; w_ref: (3, 3, Cin, Cout) VMEM ref.

    Nine accumulated MXU matmuls (one per tap, K = Cin), f32 accumulator.
    Returns (H, W, Cout) f32.
    """
    Hp, Wp, C = xp.shape
    H, W = Hp - 2, Wp - 2
    cout = w_ref.shape[-1]
    acc = None
    for dh in range(3):
        for dw in range(3):
            tap = xp[dh:dh + H, dw:dw + W, :].reshape(H * W, C)
            part = jnp.dot(tap, w_ref[dh, dw],
                           preferred_element_type=jnp.float32)
            acc = part if acc is None else acc + part
    return acc.reshape(H, W, cout)


def _instance_norm(y):
    """Per-channel normalization over the spatial dims of an (H, W, C) tile."""
    inv_hw = 1.0 / (y.shape[0] * y.shape[1])
    s = jnp.sum(y, axis=(0, 1), keepdims=True)            # (1, 1, C)
    ss = jnp.sum(y * y, axis=(0, 1), keepdims=True)        # (1, 1, C)
    mean = s * inv_hw
    var = ss * inv_hw - mean * mean
    return (y - mean) * jax.lax.rsqrt(var + EPS)


# --------------------------- Pallas kernel -----------------------------------

def _resblock_kernel(x_ref, w1_ref, w2_ref, out_ref, *, H, W, C):
    del C
    x = x_ref[0]                                           # (H, W, C) f32

    # Stage 1: reflect-pad -> conv3x3 -> instance-norm -> ReLU
    # (conv bias is cancelled exactly by the mean subtraction).
    y = _conv3x3(_reflect_pad1(x), w1_ref)
    y = jnp.maximum(_instance_norm(y), 0.0)

    # Stage 2: reflect-pad -> conv3x3 -> instance-norm, fused residual add.
    y = _instance_norm(_conv3x3(_reflect_pad1(y), w2_ref))
    out_ref[0] = (x + y).astype(out_ref.dtype)


# ------------------------------ JAX wrapper ----------------------------------

def residual_block(x, w1, b1, w2, b2):
    """x: (N, C, H, W) f32; w*: (C, C, 3, 3); b*: (C,). Returns (N, C, H, W)."""
    N, C, H, W = x.shape
    del b1, b2  # per-channel bias is cancelled exactly by InstanceNorm2d

    # NCHW -> NHWC (channels on the lane axis).  Padding is done in-kernel.
    xh = jnp.transpose(x, (0, 2, 3, 1))

    # (Cout, Cin, 3, 3) -> (3, 3, Cin, Cout): tap-major, Cin contracted, Cout
    # on lanes, matching the in-kernel per-tap matmuls.
    w1t = jnp.transpose(w1, (2, 3, 1, 0))
    w2t = jnp.transpose(w2, (2, 3, 1, 0))

    kernel = functools.partial(_resblock_kernel, H=H, W=W, C=C)
    out = pl.pallas_call(
        kernel,
        out_shape=jax.ShapeDtypeStruct((N, H, W, C), jnp.float32),
        grid=(N,),
        in_specs=[
            pl.BlockSpec((1, H, W, C), lambda n: (n, 0, 0, 0)),
            pl.BlockSpec((3, 3, C, C), lambda n: (0, 0, 0, 0)),
            pl.BlockSpec((3, 3, C, C), lambda n: (0, 0, 0, 0)),
        ],
        out_specs=pl.BlockSpec((1, H, W, C), lambda n: (n, 0, 0, 0)),
        compiler_params=pltpu.CompilerParams(
            dimension_semantics=("parallel",)),
    )(xh, w1t, w2t)

    # NHWC -> NCHW
    return jnp.transpose(out, (0, 3, 1, 2))


# -------------------------- pure-JAX reference -------------------------------

def _ref_residual_block(x, w1, b1, w2, b2):
    def conv_in(h, w, b):
        hp = jnp.pad(h, ((0, 0), (0, 0), (1, 1), (1, 1)), mode="reflect")
        y = jax.lax.conv_general_dilated(
            hp, w, (1, 1), "VALID",
            dimension_numbers=("NCHW", "OIHW", "NCHW")) + b.reshape(1, -1, 1, 1)
        mean = y.mean(axis=(2, 3), keepdims=True)
        var = ((y - mean) ** 2).mean(axis=(2, 3), keepdims=True)
        return (y - mean) * jax.lax.rsqrt(var + EPS)

    h = jnp.maximum(conv_in(x, w1, b1), 0.0)
    return x + conv_in(h, w2, b2)


# --------------------------------- main ---------------------------------------

if __name__ == "__main__":
    N, C, H, W = 2, 4, 16, 16
    key = jax.random.PRNGKey(0)
    kx, kw1, kb1, kw2, kb2 = jax.random.split(key, 5)

    x = jax.random.normal(kx, (N, C, H, W), jnp.float32)
    # Deterministic synthetic parameters (Conv2d(C, C, 3) shapes).
    w1 = 0.1 * jax.random.normal(kw1, (C, C, 3, 3), jnp.float32)
    b1 = 0.1 * jax.random.normal(kb1, (C,), jnp.float32)
    w2 = 0.1 * jax.random.normal(kw2, (C, C, 3, 3), jnp.float32)
    b2 = 0.1 * jax.random.normal(kb2, (C,), jnp.float32)

    out = jax.jit(residual_block)(x, w1, b1, w2, b2)
    out = jax.block_until_ready(out)

    ref = _ref_residual_block(x, w1, b1, w2, b2)
    assert out.shape == (N, C, H, W)
    assert jnp.allclose(out, ref, atol=1e-4, rtol=1e-4), (
        float(jnp.max(jnp.abs(out - ref))))

    print("KERNEL_OK")
</pallas_src>

<mosaic_0001>
module attributes {stable_mosaic.version = 11 : i64} {
  func.func @_resblock_kernel(%arg0: i32, %arg1: memref<1x16x16x4xf32, #tpu.memory_space<vmem>>, %arg2: memref<3x3x4x4xf32, #tpu.memory_space<vmem>>, %arg3: memref<3x3x4x4xf32, #tpu.memory_space<vmem>>, %arg4: memref<1x16x16x4xf32, #tpu.memory_space<vmem>>) attributes {dimension_semantics = [#tpu.dimension_semantics<parallel>], iteration_bounds = array<i64: 2>, scalar_prefetch = 0 : i64, scratch_operands = 0 : i64, tpu.core_type = #tpu.core_type<tc>, window_params = [{transform_indices = @transform_0, window_bounds = array<i64: 1, 16, 16, 4>}, {pipeline_mode = #tpu.pipeline_mode<synchronous>, transform_indices = @transform_1, window_bounds = array<i64: 3, 3, 4, 4>}, {pipeline_mode = #tpu.pipeline_mode<synchronous>, transform_indices = @transform_2, window_bounds = array<i64: 3, 3, 4, 4>}, {transform_indices = @transform_3, window_bounds = array<i64: 1, 16, 16, 4>}]} {
    %c0 = arith.constant 0 : index
    %c0_0 = arith.constant 0 : index
    %c0_1 = arith.constant 0 : index
    %c0_2 = arith.constant 0 : index
    %0 = vector.load %arg1[%c0, %c0_0, %c0_1, %c0_2] : memref<1x16x16x4xf32, #tpu.memory_space<vmem>>, vector<1x16x16x4xf32>
    %1 = vector.shape_cast %0 : vector<1x16x16x4xf32> to vector<16x16x4xf32>
    %2 = vector.extract_strided_slice %1 {offsets = [1, 0, 0], sizes = [1, 16, 4], strides = [1, 1, 1]} : vector<16x16x4xf32> to vector<1x16x4xf32>
    %3 = vector.extract_strided_slice %1 {offsets = [14, 0, 0], sizes = [1, 16, 4], strides = [1, 1, 1]} : vector<16x16x4xf32> to vector<1x16x4xf32>
    %4 = tpu.concatenate %2, %1, %3 in 0 : vector<1x16x4xf32>, vector<16x16x4xf32>, vector<1x16x4xf32> -> vector<18x16x4xf32>
    %5 = vector.extract_strided_slice %4 {offsets = [0, 1, 0], sizes = [18, 1, 4], strides = [1, 1, 1]} : vector<18x16x4xf32> to vector<18x1x4xf32>
    %6 = vector.extract_strided_slice %4 {offsets = [0, 14, 0], sizes = [18, 1, 4], strides = [1, 1, 1]} : vector<18x16x4xf32> to vector<18x1x4xf32>
    %7 = tpu.concatenate %5, %4, %6 in 1 : vector<18x1x4xf32>, vector<18x16x4xf32>, vector<18x1x4xf32> -> vector<18x18x4xf32>
    %8 = vector.extract_strided_slice %7 {offsets = [0, 0, 0], sizes = [16, 16, 4], strides = [1, 1, 1]} : vector<18x18x4xf32> to vector<16x16x4xf32>
    %9 = vector.shape_cast %8 : vector<16x16x4xf32> to vector<256x4xf32>
    %c0_3 = arith.constant 0 : index
    %c0_4 = arith.constant 0 : index
    %c0_5 = arith.constant 0 : index
    %c0_6 = arith.constant 0 : index
    %10 = vector.load %arg2[%c0_3, %c0_4, %c0_5, %c0_6] : memref<3x3x4x4xf32, #tpu.memory_space<vmem>>, vector<1x1x4x4xf32>
    %11 = vector.shape_cast %10 : vector<1x1x4x4xf32> to vector<4x4xf32>
    %cst = arith.constant dense<0.000000e+00> : vector<256x4xf32>
    %12 = tpu.matmul %9, %11, %cst {dimension_numbers = #tpu.dot_dimension_numbers<[1], [0], [0], [1], [0, 0, 1, 1], [], []>} : vector<256x4xf32>, vector<4x4xf32>, vector<256x4xf32> -> vector<256x4xf32>
    %13 = vector.extract_strided_slice %7 {offsets = [0, 1, 0], sizes = [16, 16, 4], strides = [1, 1, 1]} : vector<18x18x4xf32> to vector<16x16x4xf32>
    %14 = vector.shape_cast %13 : vector<16x16x4xf32> to vector<256x4xf32>
    %c0_7 = arith.constant 0 : index
    %c1 = arith.constant 1 : index
    %c0_8 = arith.constant 0 : index
    %c0_9 = arith.constant 0 : index
    %15 = vector.load %arg2[%c0_7, %c1, %c0_8, %c0_9] : memref<3x3x4x4xf32, #tpu.memory_space<vmem>>, vector<1x1x4x4xf32>
    %16 = vector.shape_cast %15 : vector<1x1x4x4xf32> to vector<4x4xf32>
    %cst_10 = arith.constant dense<0.000000e+00> : vector<256x4xf32>
    %17 = tpu.matmul %14, %16, %cst_10 {dimension_numbers = #tpu.dot_dimension_numbers<[1], [0], [0], [1], [0, 0, 1, 1], [], []>} : vector<256x4xf32>, vector<4x4xf32>, vector<256x4xf32> -> vector<256x4xf32>
    %18 = arith.addf %12, %17 : vector<256x4xf32>
    %19 = vector.extract_strided_slice %7 {offsets = [0, 2, 0], sizes = [16, 16, 4], strides = [1, 1, 1]} : vector<18x18x4xf32> to vector<16x16x4xf32>
    %20 = vector.shape_cast %19 : vector<16x16x4xf32> to vector<256x4xf32>
    %c0_11 = arith.constant 0 : index
    %c2 = arith.constant 2 : index
    %c0_12 = arith.constant 0 : index
    %c0_13 = arith.constant 0 : index
    %21 = vector.load %arg2[%c0_11, %c2, %c0_12, %c0_13] : memref<3x3x4x4xf32, #tpu.memory_space<vmem>>, vector<1x1x4x4xf32>
    %22 = vector.shape_cast %21 : vector<1x1x4x4xf32> to vector<4x4xf32>
    %cst_14 = arith.constant dense<0.000000e+00> : vector<256x4xf32>
    %23 = tpu.matmul %20, %22, %cst_14 {dimension_numbers = #tpu.dot_dimension_numbers<[1], [0], [0], [1], [0, 0, 1, 1], [], []>} : vector<256x4xf32>, vector<4x4xf32>, vector<256x4xf32> -> vector<256x4xf32>
    %24 = arith.addf %18, %23 : vector<256x4xf32>
    %25 = vector.extract_strided_slice %7 {offsets = [1, 0, 0], sizes = [16, 16, 4], strides = [1, 1, 1]} : vector<18x18x4xf32> to vector<16x16x4xf32>
    %26 = vector.shape_cast %25 : vector<16x16x4xf32> to vector<256x4xf32>
    %c1_15 = arith.constant 1 : index
    %c0_16 = arith.constant 0 : index
    %c0_17 = arith.constant 0 : index
    %c0_18 = arith.constant 0 : index
    %27 = vector.load %arg2[%c1_15, %c0_16, %c0_17, %c0_18] : memref<3x3x4x4xf32, #tpu.memory_space<vmem>>, vector<1x1x4x4xf32>
    %28 = vector.shape_cast %27 : vector<1x1x4x4xf32> to vector<4x4xf32>
    %cst_19 = arith.constant dense<0.000000e+00> : vector<256x4xf32>
    %29 = tpu.matmul %26, %28, %cst_19 {dimension_numbers = #tpu.dot_dimension_numbers<[1], [0], [0], [1], [0, 0, 1, 1], [], []>} : vector<256x4xf32>, vector<4x4xf32>, vector<256x4xf32> -> vector<256x4xf32>
    %30 = arith.addf %24, %29 : vector<256x4xf32>
    %31 = vector.extract_strided_slice %7 {offsets = [1, 1, 0], sizes = [16, 16, 4], strides = [1, 1, 1]} : vector<18x18x4xf32> to vector<16x16x4xf32>
    %32 = vector.shape_cast %31 : vector<16x16x4xf32> to vector<256x4xf32>
    %c1_20 = arith.constant 1 : index
    %c1_21 = arith.constant 1 : index
    %c0_22 = arith.constant 0 : index
    %c0_23 = arith.constant 0 : index
    %33 = vector.load %arg2[%c1_20, %c1_21, %c0_22, %c0_23] : memref<3x3x4x4xf32, #tpu.memory_space<vmem>>, vector<1x1x4x4xf32>
    %34 = vector.shape_cast %33 : vector<1x1x4x4xf32> to vector<4x4xf32>
    %cst_24 = arith.constant dense<0.000000e+00> : vector<256x4xf32>
    %35 = tpu.matmul %32, %34, %cst_24 {dimension_numbers = #tpu.dot_dimension_numbers<[1], [0], [0], [1], [0, 0, 1, 1], [], []>} : vector<256x4xf32>, vector<4x4xf32>, vector<256x4xf32> -> vector<256x4xf32>
    %36 = arith.addf %30, %35 : vector<256x4xf32>
    %37 = vector.extract_strided_slice %7 {offsets = [1, 2, 0], sizes = [16, 16, 4], strides = [1, 1, 1]} : vector<18x18x4xf32> to vector<16x16x4xf32>
    %38 = vector.shape_cast %37 : vector<16x16x4xf32> to vector<256x4xf32>
    %c1_25 = arith.constant 1 : index
    %c2_26 = arith.constant 2 : index
    %c0_27 = arith.constant 0 : index
    %c0_28 = arith.constant 0 : index
    %39 = vector.load %arg2[%c1_25, %c2_26, %c0_27, %c0_28] : memref<3x3x4x4xf32, #tpu.memory_space<vmem>>, vector<1x1x4x4xf32>
    %40 = vector.shape_cast %39 : vector<1x1x4x4xf32> to vector<4x4xf32>
    %cst_29 = arith.constant dense<0.000000e+00> : vector<256x4xf32>
    %41 = tpu.matmul %38, %40, %cst_29 {dimension_numbers = #tpu.dot_dimension_numbers<[1], [0], [0], [1], [0, 0, 1, 1], [], []>} : vector<256x4xf32>, vector<4x4xf32>, vector<256x4xf32> -> vector<256x4xf32>
    %42 = arith.addf %36, %41 : vector<256x4xf32>
    %43 = vector.extract_strided_slice %7 {offsets = [2, 0, 0], sizes = [16, 16, 4], strides = [1, 1, 1]} : vector<18x18x4xf32> to vector<16x16x4xf32>
    %44 = vector.shape_cast %43 : vector<16x16x4xf32> to vector<256x4xf32>
    %c2_30 = arith.constant 2 : index
    %c0_31 = arith.constant 0 : index
    %c0_32 = arith.constant 0 : index
    %c0_33 = arith.constant 0 : index
    %45 = vector.load %arg2[%c2_30, %c0_31, %c0_32, %c0_33] : memref<3x3x4x4xf32, #tpu.memory_space<vmem>>, vector<1x1x4x4xf32>
    %46 = vector.shape_cast %45 : vector<1x1x4x4xf32> to vector<4x4xf32>
    %cst_34 = arith.constant dense<0.000000e+00> : vector<256x4xf32>
    %47 = tpu.matmul %44, %46, %cst_34 {dimension_numbers = #tpu.dot_dimension_numbers<[1], [0], [0], [1], [0, 0, 1, 1], [], []>} : vector<256x4xf32>, vector<4x4xf32>, vector<256x4xf32> -> vector<256x4xf32>
    %48 = arith.addf %42, %47 : vector<256x4xf32>
    %49 = vector.extract_strided_slice %7 {offsets = [2, 1, 0], sizes = [16, 16, 4], strides = [1, 1, 1]} : vector<18x18x4xf32> to vector<16x16x4xf32>
    %50 = vector.shape_cast %49 : vector<16x16x4xf32> to vector<256x4xf32>
    %c2_35 = arith.constant 2 : index
    %c1_36 = arith.constant 1 : index
    %c0_37 = arith.constant 0 : index
    %c0_38 = arith.constant 0 : index
    %51 = vector.load %arg2[%c2_35, %c1_36, %c0_37, %c0_38] : memref<3x3x4x4xf32, #tpu.memory_space<vmem>>, vector<1x1x4x4xf32>
    %52 = vector.shape_cast %51 : vector<1x1x4x4xf32> to vector<4x4xf32>
    %cst_39 = arith.constant dense<0.000000e+00> : vector<256x4xf32>
    %53 = tpu.matmul %50, %52, %cst_39 {dimension_numbers = #tpu.dot_dimension_numbers<[1], [0], [0], [1], [0, 0, 1, 1], [], []>} : vector<256x4xf32>, vector<4x4xf32>, vector<256x4xf32> -> vector<256x4xf32>
    %54 = arith.addf %48, %53 : vector<256x4xf32>
    %55 = vector.extract_strided_slice %7 {offsets = [2, 2, 0], sizes = [16, 16, 4], strides = [1, 1, 1]} : vector<18x18x4xf32> to vector<16x16x4xf32>
    %56 = vector.shape_cast %55 : vector<16x16x4xf32> to vector<256x4xf32>
    %c2_40 = arith.constant 2 : index
    %c2_41 = arith.constant 2 : index
    %c0_42 = arith.constant 0 : index
    %c0_43 = arith.constant 0 : index
    %57 = vector.load %arg2[%c2_40, %c2_41, %c0_42, %c0_43] : memref<3x3x4x4xf32, #tpu.memory_space<vmem>>, vector<1x1x4x4xf32>
    %58 = vector.shape_cast %57 : vector<1x1x4x4xf32> to vector<4x4xf32>
    %cst_44 = arith.constant dense<0.000000e+00> : vector<256x4xf32>
    %59 = tpu.matmul %56, %58, %cst_44 {dimension_numbers = #tpu.dot_dimension_numbers<[1], [0], [0], [1], [0, 0, 1, 1], [], []>} : vector<256x4xf32>, vector<4x4xf32>, vector<256x4xf32> -> vector<256x4xf32>
    %60 = arith.addf %54, %59 : vector<256x4xf32>
    %61 = vector.shape_cast %60 : vector<256x4xf32> to vector<16x16x4xf32>
    %cst_45 = arith.constant dense<0.000000e+00> : vector<4xf32>
    %62 = vector.multi_reduction <add>, %61, %cst_45 [0, 1] : vector<16x16x4xf32> to vector<4xf32>
    %63 = vector.shape_cast %62 : vector<4xf32> to vector<1x1x4xf32>
    %64 = arith.mulf %61, %61 : vector<16x16x4xf32>
    %cst_46 = arith.constant dense<0.000000e+00> : vector<4xf32>
    %65 = vector.multi_reduction <add>, %64, %cst_46 [0, 1] : vector<16x16x4xf32> to vector<4xf32>
    %66 = vector.shape_cast %65 : vector<4xf32> to vector<1x1x4xf32>
    %cst_47 = arith.constant 3.906250e-03 : f32
    %67 = vector.broadcast %cst_47 : f32 to vector<1x1x4xf32>
    %68 = arith.mulf %63, %67 : vector<1x1x4xf32>
    %cst_48 = arith.constant 3.906250e-03 : f32
    %69 = vector.broadcast %cst_48 : f32 to vector<1x1x4xf32>
    %70 = arith.mulf %66, %69 : vector<1x1x4xf32>
    %71 = arith.mulf %68, %68 : vector<1x1x4xf32>
    %72 = arith.subf %70, %71 : vector<1x1x4xf32>
    %73 = vector.broadcast %68 : vector<1x1x4xf32> to vector<16x16x4xf32>
    %74 = arith.subf %61, %73 : vector<16x16x4xf32>
    %cst_49 = arith.constant 9.99999974E-6 : f32
    %75 = vector.broadcast %cst_49 : f32 to vector<1x1x4xf32>
    %76 = arith.addf %72, %75 : vector<1x1x4xf32>
    %77 = math.rsqrt %76 : vector<1x1x4xf32>
    %78 = vector.broadcast %77 : vector<1x1x4xf32> to vector<16x16x4xf32>
    %79 = arith.mulf %74, %78 : vector<16x16x4xf32>
    %cst_50 = arith.constant 0.000000e+00 : f32
    %80 = vector.broadcast %cst_50 : f32 to vector<16x16x4xf32>
    %81 = arith.maximumf %79, %80 : vector<16x16x4xf32>
    %82 = vector.extract_strided_slice %81 {offsets = [1, 0, 0], sizes = [1, 16, 4], strides = [1, 1, 1]} : vector<16x16x4xf32> to vector<1x16x4xf32>
    %83 = vector.extract_strided_slice %81 {offsets = [14, 0, 0], sizes = [1, 16, 4], strides = [1, 1, 1]} : vector<16x16x4xf32> to vector<1x16x4xf32>
    %84 = tpu.concatenate %82, %81, %83 in 0 : vector<1x16x4xf32>, vector<16x16x4xf32>, vector<1x16x4xf32> -> vector<18x16x4xf32>
    %85 = vector.extract_strided_slice %84 {offsets = [0, 1, 0], sizes = [18, 1, 4], strides = [1, 1, 1]} : vector<18x16x4xf32> to vector<18x1x4xf32>
    %86 = vector.extract_strided_slice %84 {offsets = [0, 14, 0], sizes = [18, 1, 4], strides = [1, 1, 1]} : vector<18x16x4xf32> to vector<18x1x4xf32>
    %87 = tpu.concatenate %85, %84, %86 in 1 : vector<18x1x4xf32>, vector<18x16x4xf32>, vector<18x1x4xf32> -> vector<18x18x4xf32>
    %88 = vector.extract_strided_slice %87 {offsets = [0, 0, 0], sizes = [16, 16, 4], strides = [1, 1, 1]} : vector<18x18x4xf32> to vector<16x16x4xf32>
    %89 = vector.shape_cast %88 : vector<16x16x4xf32> to vector<256x4xf32>
    %c0_51 = arith.constant 0 : index
    %c0_52 = arith.constant 0 : index
    %c0_53 = arith.constant 0 : index
    %c0_54 = arith.constant 0 : index
    %90 = vector.load %arg3[%c0_51, %c0_52, %c0_53, %c0_54] : memref<3x3x4x4xf32, #tpu.memory_space<vmem>>, vector<1x1x4x4xf32>
    %91 = vector.shape_cast %90 : vector<1x1x4x4xf32> to vector<4x4xf32>
    %cst_55 = arith.constant dense<0.000000e+00> : vector<256x4xf32>
    %92 = tpu.matmul %89, %91, %cst_55 {dimension_numbers = #tpu.dot_dimension_numbers<[1], [0], [0], [1], [0, 0, 1, 1], [], []>} : vector<256x4xf32>, vector<4x4xf32>, vector<256x4xf32> -> vector<256x4xf32>
    %93 = vector.extract_strided_slice %87 {offsets = [0, 1, 0], sizes = [16, 16, 4], strides = [1, 1, 1]} : vector<18x18x4xf32> to vector<16x16x4xf32>
    %94 = vector.shape_cast %93 : vector<16x16x4xf32> to vector<256x4xf32>
    %c0_56 = arith.constant 0 : index
    %c1_57 = arith.constant 1 : index
    %c0_58 = arith.constant 0 : index
    %c0_59 = arith.constant 0 : index
    %95 = vector.load %arg3[%c0_56, %c1_57, %c0_58, %c0_59] : memref<3x3x4x4xf32, #tpu.memory_space<vmem>>, vector<1x1x4x4xf32>
    %96 = vector.shape_cast %95 : vector<1x1x4x4xf32> to vector<4x4xf32>
    %cst_60 = arith.constant dense<0.000000e+00> : vector<256x4xf32>
    %97 = tpu.matmul %94, %96, %cst_60 {dimension_numbers = #tpu.dot_dimension_numbers<[1], [0], [0], [1], [0, 0, 1, 1], [], []>} : vector<256x4xf32>, vector<4x4xf32>, vector<256x4xf32> -> vector<256x4xf32>
    %98 = arith.addf %92, %97 : vector<256x4xf32>
    %99 = vector.extract_strided_slice %87 {offsets = [0, 2, 0], sizes = [16, 16, 4], strides = [1, 1, 1]} : vector<18x18x4xf32> to vector<16x16x4xf32>
    %100 = vector.shape_cast %99 : vector<16x16x4xf32> to vector<256x4xf32>
    %c0_61 = arith.constant 0 : index
    %c2_62 = arith.constant 2 : index
    %c0_63 = arith.constant 0 : index
    %c0_64 = arith.constant 0 : index
    %101 = vector.load %arg3[%c0_61, %c2_62, %c0_63, %c0_64] : memref<3x3x4x4xf32, #tpu.memory_space<vmem>>, vector<1x1x4x4xf32>
    %102 = vector.shape_cast %101 : vector<1x1x4x4xf32> to vector<4x4xf32>
    %cst_65 = arith.constant dense<0.000000e+00> : vector<256x4xf32>
    %103 = tpu.matmul %100, %102, %cst_65 {dimension_numbers = #tpu.dot_dimension_numbers<[1], [0], [0], [1], [0, 0, 1, 1], [], []>} : vector<256x4xf32>, vector<4x4xf32>, vector<256x4xf32> -> vector<256x4xf32>
    %104 = arith.addf %98, %103 : vector<256x4xf32>
    %105 = vector.extract_strided_slice %87 {offsets = [1, 0, 0], sizes = [16, 16, 4], strides = [1, 1, 1]} : vector<18x18x4xf32> to vector<16x16x4xf32>
    %106 = vector.shape_cast %105 : vector<16x16x4xf32> to vector<256x4xf32>
    %c1_66 = arith.constant 1 : index
    %c0_67 = arith.constant 0 : index
    %c0_68 = arith.constant 0 : index
    %c0_69 = arith.constant 0 : index
    %107 = vector.load %arg3[%c1_66, %c0_67, %c0_68, %c0_69] : memref<3x3x4x4xf32, #tpu.memory_space<vmem>>, vector<1x1x4x4xf32>
    %108 = vector.shape_cast %107 : vector<1x1x4x4xf32> to vector<4x4xf32>
    %cst_70 = arith.constant dense<0.000000e+00> : vector<256x4xf32>
    %109 = tpu.matmul %106, %108, %cst_70 {dimension_numbers = #tpu.dot_dimension_numbers<[1], [0], [0], [1], [0, 0, 1, 1], [], []>} : vector<256x4xf32>, vector<4x4xf32>, vector<256x4xf32> -> vector<256x4xf32>
    %110 = arith.addf %104, %109 : vector<256x4xf32>
    %111 = vector.extract_strided_slice %87 {offsets = [1, 1, 0], sizes = [16, 16, 4], strides = [1, 1, 1]} : vector<18x18x4xf32> to vector<16x16x4xf32>
    %112 = vector.shape_cast %111 : vector<16x16x4xf32> to vector<256x4xf32>
    %c1_71 = arith.constant 1 : index
    %c1_72 = arith.constant 1 : index
    %c0_73 = arith.constant 0 : index
    %c0_74 = arith.constant 0 : index
    %113 = vector.load %arg3[%c1_71, %c1_72, %c0_73, %c0_74] : memref<3x3x4x4xf32, #tpu.memory_space<vmem>>, vector<1x1x4x4xf32>
    %114 = vector.shape_cast %113 : vector<1x1x4x4xf32> to vector<4x4xf32>
    %cst_75 = arith.constant dense<0.000000e+00> : vector<256x4xf32>
    %115 = tpu.matmul %112, %114, %cst_75 {dimension_numbers = #tpu.dot_dimension_numbers<[1], [0], [0], [1], [0, 0, 1, 1], [], []>} : vector<256x4xf32>, vector<4x4xf32>, vector<256x4xf32> -> vector<256x4xf32>
    %116 = arith.addf %110, %115 : vector<256x4xf32>
    %117 = vector.extract_strided_slice %87 {offsets = [1, 2, 0], sizes = [16, 16, 4], strides = [1, 1, 1]} : vector<18x18x4xf32> to vector<16x16x4xf32>
    %118 = vector.shape_cast %117 : vector<16x16x4xf32> to vector<256x4xf32>
    %c1_76 = arith.constant 1 : index
    %c2_77 = arith.constant 2 : index
    %c0_78 = arith.constant 0 : index
    %c0_79 = arith.constant 0 : index
    %119 = vector.load %arg3[%c1_76, %c2_77, %c0_78, %c0_79] : memref<3x3x4x4xf32, #tpu.memory_space<vmem>>, vector<1x1x4x4xf32>
    %120 = vector.shape_cast %119 : vector<1x1x4x4xf32> to vector<4x4xf32>
    %cst_80 = arith.constant dense<0.000000e+00> : vector<256x4xf32>
    %121 = tpu.matmul %118, %120, %cst_80 {dimension_numbers = #tpu.dot_dimension_numbers<[1], [0], [0], [1], [0, 0, 1, 1], [], []>} : vector<256x4xf32>, vector<4x4xf32>, vector<256x4xf32> -> vector<256x4xf32>
    %122 = arith.addf %116, %121 : vector<256x4xf32>
    %123 = vector.extract_strided_slice %87 {offsets = [2, 0, 0], sizes = [16, 16, 4], strides = [1, 1, 1]} : vector<18x18x4xf32> to vector<16x16x4xf32>
    %124 = vector.shape_cast %123 : vector<16x16x4xf32> to vector<256x4xf32>
    %c2_81 = arith.constant 2 : index
    %c0_82 = arith.constant 0 : index
    %c0_83 = arith.constant 0 : index
    %c0_84 = arith.constant 0 : index
    %125 = vector.load %arg3[%c2_81, %c0_82, %c0_83, %c0_84] : memref<3x3x4x4xf32, #tpu.memory_space<vmem>>, vector<1x1x4x4xf32>
    %126 = vector.shape_cast %125 : vector<1x1x4x4xf32> to vector<4x4xf32>
    %cst_85 = arith.constant dense<0.000000e+00> : vector<256x4xf32>
    %127 = tpu.matmul %124, %126, %cst_85 {dimension_numbers = #tpu.dot_dimension_numbers<[1], [0], [0], [1], [0, 0, 1, 1], [], []>} : vector<256x4xf32>, vector<4x4xf32>, vector<256x4xf32> -> vector<256x4xf32>
    %128 = arith.addf %122, %127 : vector<256x4xf32>
    %129 = vector.extract_strided_slice %87 {offsets = [2, 1, 0], sizes = [16, 16, 4], strides = [1, 1, 1]} : vector<18x18x4xf32> to vector<16x16x4xf32>
    %130 = vector.shape_cast %129 : vector<16x16x4xf32> to vector<256x4xf32>
    %c2_86 = arith.constant 2 : index
    %c1_87 = arith.constant 1 : index
    %c0_88 = arith.constant 0 : index
    %c0_89 = arith.constant 0 : index
    %131 = vector.load %arg3[%c2_86, %c1_87, %c0_88, %c0_89] : memref<3x3x4x4xf32, #tpu.memory_space<vmem>>, vector<1x1x4x4xf32>
    %132 = vector.shape_cast %131 : vector<1x1x4x4xf32> to vector<4x4xf32>
    %cst_90 = arith.constant dense<0.000000e+00> : vector<256x4xf32>
    %133 = tpu.matmul %130, %132, %cst_90 {dimension_numbers = #tpu.dot_dimension_numbers<[1], [0], [0], [1], [0, 0, 1, 1], [], []>} : vector<256x4xf32>, vector<4x4xf32>, vector<256x4xf32> -> vector<256x4xf32>
    %134 = arith.addf %128, %133 : vector<256x4xf32>
    %135 = vector.extract_strided_slice %87 {offsets = [2, 2, 0], sizes = [16, 16, 4], strides = [1, 1, 1]} : vector<18x18x4xf32> to vector<16x16x4xf32>
    %136 = vector.shape_cast %135 : vector<16x16x4xf32> to vector<256x4xf32>
    %c2_91 = arith.constant 2 : index
    %c2_92 = arith.constant 2 : index
    %c0_93 = arith.constant 0 : index
    %c0_94 = arith.constant 0 : index
    %137 = vector.load %arg3[%c2_91, %c2_92, %c0_93, %c0_94] : memref<3x3x4x4xf32, #tpu.memory_space<vmem>>, vector<1x1x4x4xf32>
    %138 = vector.shape_cast %137 : vector<1x1x4x4xf32> to vector<4x4xf32>
    %cst_95 = arith.constant dense<0.000000e+00> : vector<256x4xf32>
    %139 = tpu.matmul %136, %138, %cst_95 {dimension_numbers = #tpu.dot_dimension_numbers<[1], [0], [0], [1], [0, 0, 1, 1], [], []>} : vector<256x4xf32>, vector<4x4xf32>, vector<256x4xf32> -> vector<256x4xf32>
    %140 = arith.addf %134, %139 : vector<256x4xf32>
    %141 = vector.shape_cast %140 : vector<256x4xf32> to vector<16x16x4xf32>
    %cst_96 = arith.constant dense<0.000000e+00> : vector<4xf32>
    %142 = vector.multi_reduction <add>, %141, %cst_96 [0, 1] : vector<16x16x4xf32> to vector<4xf32>
    %143 = vector.shape_cast %142 : vector<4xf32> to vector<1x1x4xf32>
    %144 = arith.mulf %141, %141 : vector<16x16x4xf32>
    %cst_97 = arith.constant dense<0.000000e+00> : vector<4xf32>
    %145 = vector.multi_reduction <add>, %144, %cst_97 [0, 1] : vector<16x16x4xf32> to vector<4xf32>
    %146 = vector.shape_cast %145 : vector<4xf32> to vector<1x1x4xf32>
    %cst_98 = arith.constant 3.906250e-03 : f32
    %147 = vector.broadcast %cst_98 : f32 to vector<1x1x4xf32>
    %148 = arith.mulf %143, %147 : vector<1x1x4xf32>
    %cst_99 = arith.constant 3.906250e-03 : f32
    %149 = vector.broadcast %cst_99 : f32 to vector<1x1x4xf32>
    %150 = arith.mulf %146, %149 : vector<1x1x4xf32>
    %151 = arith.mulf %148, %148 : vector<1x1x4xf32>
    %152 = arith.subf %150, %151 : vector<1x1x4xf32>
    %153 = vector.broadcast %148 : vector<1x1x4xf32> to vector<16x16x4xf32>
    %154 = arith.subf %141, %153 : vector<16x16x4xf32>
    %cst_100 = arith.constant 9.99999974E-6 : f32
    %155 = vector.broadcast %cst_100 : f32 to vector<1x1x4xf32>
    %156 = arith.addf %152, %155 : vector<1x1x4xf32>
    %157 = math.rsqrt %156 : vector<1x1x4xf32>
    %158 = vector.broadcast %157 : vector<1x1x4xf32> to vector<16x16x4xf32>
    %159 = arith.mulf %154, %158 : vector<16x16x4xf32>
    %160 = arith.addf %1, %159 : vector<16x16x4xf32>
    %c0_101 = arith.constant 0 : index
    %c0_102 = arith.constant 0 : index
    %c0_103 = arith.constant 0 : index
    %c0_104 = arith.constant 0 : index
    %161 = vector.load %arg4[%c0_101, %c0_102, %c0_103, %c0_104] : memref<1x16x16x4xf32, #tpu.memory_space<vmem>>, vector<1x16x16x4xf32>
    %162 = vector.shape_cast %161 : vector<1x16x16x4xf32> to vector<16x16x4xf32>
    %163 = vector.shape_cast %160 : vector<16x16x4xf32> to vector<1x16x16x4xf32>
    tpu.vector_store %arg4[%c0_101, %c0_102, %c0_103, %c0_104], %163 {strides = array<i32>} : memref<1x16x16x4xf32, #tpu.memory_space<vmem>>, vector<1x16x16x4xf32>,
    return
  }
  func.func @transform_0(%arg0: i32) -> (i32, i32, i32, i32) {
    %c0_i32 = arith.constant 0 : i32
    %c0_i32_0 = arith.constant 0 : i32
    %c0_i32_1 = arith.constant 0 : i32
    %c0_i32_2 = arith.constant 0 : i32
    return %arg0, %c0_i32, %c0_i32_0, %c0_i32_1 : i32, i32, i32, i32
  }
  func.func @transform_1(%arg0: i32) -> (i32, i32, i32, i32) {
    %c0_i32 = arith.constant 0 : i32
    %c0_i32_0 = arith.constant 0 : i32
    %c0_i32_1 = arith.constant 0 : i32
    %c0_i32_2 = arith.constant 0 : i32
    %c0_i32_3 = arith.constant 0 : i32
    return %c0_i32, %c0_i32_0, %c0_i32_1, %c0_i32_2 : i32, i32, i32, i32
  }
  func.func @transform_2(%arg0: i32) -> (i32, i32, i32, i32) {
    %c0_i32 = arith.constant 0 : i32
    %c0_i32_0 = arith.constant 0 : i32
    %c0_i32_1 = arith.constant 0 : i32
    %c0_i32_2 = arith.constant 0 : i32
    %c0_i32_3 = arith.constant 0 : i32
    return %c0_i32, %c0_i32_0, %c0_i32_1, %c0_i32_2 : i32, i32, i32, i32
  }
  func.func @transform_3(%arg0: i32) -> (i32, i32, i32, i32) {
    %c0_i32 = arith.constant 0 : i32
    %c0_i32_0 = arith.constant 0 : i32
    %c0_i32_1 = arith.constant 0 : i32
    %c0_i32_2 = arith.constant 0 : i32
    return %arg0, %c0_i32, %c0_i32_0, %c0_i32_1 : i32, i32, i32, i32
  }
}

</mosaic_0001>

<bundles_post_ra>
// kernel: residual_block.1
= control target key start
LH: loop header
LB: loop body
LE: loop exit
PB: predicated region body
PF: predicated region fallthrough
CT: control target
= control target key end

     0   :  { %s9310_s12 = smov 0   ;;  %s12532_s0 = inlined_call_operand.vmem [shape: f32[2,16,16,4], index: 0, kind: input, shape index: {}]   ;;  %s12533_s1 = inlined_call_operand.vmem [shape: f32[3,3,4,4], index: 1, kind: input, shape index: {}]   ;;  %s12534_s2 = inlined_call_operand.vmem [shape: f32[3,3,4,4], index: 2, kind: input, shape index: {}]   ;;  %s12535_s3 = inlined_call_operand.vmem [shape: f32[2,16,16,4], index: 3, kind: output, shape index: {}]  }
   0x1 LB: > { %s6609_s13 = sadd.s32 4294967295, %s9288_s12   ;;  %p6613_p0 = scmp.ge.s32.totalorder %s9288_s12, 1  ;;  %s9288_s12 = sphi %s9310_s12, %s13_s12  }
   0x2   : > { %p137_p1 = scmp.lt.s32.totalorder %s9288_s12, 3 }
   0x4   : > { %p138_p2 = pnand %p6613_p0, %p137_p1 }
   0x6   : > { %141 = sbr.rel (%p138_p2) target bundleno = 1733 (0x6c5), region = 32 }
   0xd   : > { %v6618_v0 = vld [vmem:[%s12533_s1 + $0x4] sm:$0xf]  ;;  %vm582_vm0 = vcmask 1043456   ;;  %p161_p3 = scmp.lt.s32.totalorder %s6609_s13, 1  ;;  %v412_v1 = vld [vmem:[%s12533_s1] sm:$0xf] }
   0xe   : > { %7826 = vmatprep.subr.msk.mxu0 %vm582_vm0, %v6618_v0  ;;  %vm267_vm1 = vcmask 1040384   ;;  %vm443_vm2 = vcmask 1046528   ;;  %vm521_vm3 = vcmask 31744   ;;  %v9383_v37 = vld [vmem:[%s12533_s1 + $0x8] sm:$0xf]  ;;  %vm1099_vm4 = vcmask 1045504  }
   0xf   : > { %7827 = vmatpush3.msk.msra.mxu0 %vm582_vm0, %v6618_v0  ;;  %s13045_s13 = smov (!%p161_p3, %s6609_s13), 1 }
  0x10   : > { %7876 = vmatprep.subr.msk.mxu0 %vm582_vm0, %v412_v1  ;;  %s7230_s18 = sshll.u32 %s13045_s13, 8 }
  0x11   : > { %s9335_s21 = scalar_lea.vmem %s12532_s0, %s7230_s18  ;;  %s12411_s6 = scalar_lea.vmem %s12535_s3, %s7230_s18 }
  0x12   : > { %v173_v2 = vld [vmem:[%s9335_s21 + $0x10] sm:$0xff]  ;;  %v174_v3 = vld [vmem:[%s9335_s21 + $0x18] sm:$0xff]  ;;  %v171_v4 = vld [vmem:[%s9335_s21] sm:$0xff] }
  0x13   : > { %v219_v5 = vrot.slane %v173_v2, 1  ;;  %v268_v6 = vrot.slane %v173_v2, 7  ;;  %v269_v7 = vrot.slane %v174_v3, 7  ;;  %v348_v8 = vrot.slane %v174_v3, 5  ;;  %v172_v9 = vld [vmem:[%s9335_s21 + $0x8] sm:$0xff]  ;;  %v175_v10 = vld [vmem:[%s9335_s21 + $0x20] sm:$0xff] }
  0x14   : > { %v220_v11 = vrot.slane %v171_v4, 1  ;;  %v271_v12 = vrot.slane %v171_v4, 7  ;;  %v272_v13 = vrot.slane %v172_v9, 7  ;;  %v349_v14 = vrot.slane %v172_v9, 5  ;;  %v176_v22 = vld [vmem:[%s9335_s21 + $0x28] sm:$0xff]  ;;  %v177_v27 = vld [vmem:[%s9335_s21 + $0x30] sm:$0xff] }
  0x15   : > { %v9343_v15 = vsel %vm267_vm1, %v268_v6, %v269_v7  ;;  %v9346_v16 = vsel %vm267_vm1, %v219_v5, %v268_v6  ;;  %v9349_v17 = vsel %vm267_vm1, %v269_v7, %v348_v8  ;;  %v221_v18 = vrot.slane %v175_v10, 1  ;;  %v178_v32 = vld [vmem:[%s9335_s21 + $0x38] sm:$0xff]  ;;  %v179_v41 = vld [vmem:[%s9335_s21 + $0x40] sm:$0xff]  ;;  %v180_v50 = vld [vmem:[%s9335_s21 + $0x48] sm:$0xff] }
  0x16   : > { %v444_v19 = vrot.slane %v9346_v16, 1  ;;  %v445_v20 = vrot.slane %v9343_v15, 1  ;;  %v447_v21 = vrot.slane %v9349_v17, 1  ;;  %v9356_v23 = vsel %vm267_vm1, %v271_v12, %v272_v13  ;;  %v181_v54 = vld [vmem:[%s9335_s21 + $0x50] sm:$0xff]  ;;  %v182_v57 = vld [vmem:[%s9335_s21 + $0x58] sm:$0xff]  ;;  %v183_v4 = vld [vmem:[%s9335_s21 + $0x60] sm:$0xff] }
  0x17   : > { %v9359_v24 = vsel %vm267_vm1, %v220_v11, %v271_v12  ;;  %v9362_v25 = vsel %vm267_vm1, %v272_v13, %v349_v14  ;;  %v274_v26 = vrot.slane %v175_v10, 7  ;;  %v450_v31 = vrot.slane %v9356_v23, 1  ;;  %v184_v7 = vld [vmem:[%s9335_s21 + $0x68] sm:$0xff] }
  0x18   : > { %v9366_v28 = vsel %vm443_vm2, %v444_v19, %v445_v20  ;;  %v9369_v29 = vsel %vm443_vm2, %v445_v20, %v447_v21  ;;  %v449_v30 = vrot.slane %v9359_v24, 1  ;;  %v452_v33 = vrot.slane %v9362_v25, 1 }
  0x19   : > { %12737 = vst [vmem:[#allocation2_spill] sm:$0xff] %v9366_v28  ;;  %12738 = vst [vmem:[#allocation3_spill] sm:$0xff] %v9369_v29  ;;  %7828 = vmatprep.mubr.msk.f32.mxu0 %vm521_vm3, %v9366_v28  ;;  %v275_v34 = vrot.slane %v176_v22, 7  ;;  %v9378_v35 = vsel %vm267_vm1, %v221_v18, %v274_v26  ;;  %v350_v36 = vrot.slane %v176_v22, 5  ;;  %v222_v39 = vrot.slane %v177_v27, 1 }
  0x1a   : > { %7829 = vmatmul.mubr.msk.f32.vlgmr.msra.gmra.mrb[0].mxu0 %vm521_vm3, %v9369_v29  ;;  %v9388_v38 = vsel %vm443_vm2, %v449_v30, %v450_v31  ;;  %v277_v40 = vrot.slane %v177_v27, 7  ;;  %v9395_v42 = vsel %vm443_vm2, %v450_v31, %v452_v33  ;;  %v278_v45 = vrot.slane %v178_v32, 7  ;;  %v186_v27 = vld [vmem:[%s9335_s21 + $0x78] sm:$0xff] }
  0x1b   : > { %7877 = vmatpush3.msk.msra.mxu0 %vm582_vm0, %v412_v1  ;;  %7831 = vmatprep.mubr.msk.f32.mxu0 %vm521_vm3, %v9388_v38  ;;  %v9398_v43 = vsel %vm267_vm1, %v274_v26, %v275_v34  ;;  %v9401_v44 = vsel %vm267_vm1, %v275_v34, %v350_v36  ;;  %v454_v46 = vrot.slane %v9378_v35, 1  ;;  %v351_v49 = vrot.slane %v178_v32, 5  ;;  %v185_v26 = vld [vmem:[%s9335_s21 + $0x70] sm:$0xff] }
  0x1c   : > { %v455_v47 = vrot.slane %v9398_v43, 1  ;;  %v9406_v48 = vsel %vm267_vm1, %v222_v39, %v277_v40  ;;  %7926 = vmatprep.subr.msk.mxu0 %vm582_vm0, %v9383_v37  ;;  %v9412_v51 = vsel %vm267_vm1, %v277_v40, %v278_v45  ;;  %v223_v52 = vrot.slane %v179_v41, 1  ;;  %v187_v39 = vld [vmem:[%s9335_s21 + $0x80] sm:$0xff]  ;;  %v188_v40 = vld [vmem:[%s9335_s21 + $0x88] sm:$0xff] }
  0x1d   : > { %v280_v53 = vrot.slane %v179_v41, 7  ;;  %v457_v55 = vrot.slane %v9401_v44, 1  ;;  %v459_v56 = vrot.slane %v9406_v48, 1  ;;  %v460_v58 = vrot.slane %v9412_v51, 1 }
  0x1e   : > { %7832 = vmatmul.mubr.msk.f32.gmra.mrb[2].mxu0 %vm521_vm3, %v9395_v42  ;;  %v9424_v59 = vsel %vm267_vm1, %v278_v45, %v351_v49  ;;  %v281_v60 = vrot.slane %v180_v50, 7  ;;  %v352_v61 = vrot.slane %v180_v50, 5  ;;  %v9427_v62 = vsel %vm443_vm2, %v454_v46, %v455_v47 }
  0x1f   : > { %7834 = vmatprep.mubr.msk.f32.mxu0 %vm521_vm3, %v9366_v28  ;;  %12739 = vst [vmem:[#allocation4_spill] sm:$0xff] %v9427_v62  ;;  %v9430_v63 = vsel %vm267_vm1, %v223_v52, %v280_v53  ;;  %v224_v0 = vrot.slane %v181_v54, 1  ;;  %v283_v1 = vrot.slane %v181_v54, 7  ;;  %v284_v3 = vrot.slane %v182_v57, 7 }
  0x20   : > { %v9433_v2 = vsel %vm267_vm1, %v280_v53, %v281_v60  ;;  %v9439_v5 = vsel %vm443_vm2, %v455_v47, %v457_v55  ;;  %v462_v6 = vrot.slane %v9424_v59, 1  ;;  %v9446_v8 = vsel %vm443_vm2, %v459_v56, %v460_v58 }
  0x21   : > { %12740 = vst [vmem:[#allocation5_spill] sm:$0xff] %v9439_v5  ;;  %12741 = vst [vmem:[#allocation6_spill] sm:$0xff] %v9446_v8  ;;  %v464_v9 = vrot.slane %v9430_v63, 1  ;;  %v465_v10 = vrot.slane %v9433_v2, 1  ;;  %v9451_v11 = vsel %vm267_vm1, %v281_v60, %v352_v61  ;;  %v9454_v12 = vsel %vm267_vm1, %v224_v0, %v283_v1  ;;  %v190_v0 = vld [vmem:[%s9335_s21 + $0x98] sm:$0xff] }
  0x22   : > { %7835 = vmatmul.mubr.msk.f32.gmra.mrb[4].mxu0 %vm521_vm3, %v9369_v29  ;;  %v353_v13 = vrot.slane %v182_v57, 5  ;;  %v225_v14 = vrot.slane %v183_v4, 1  ;;  %v286_v18 = vrot.slane %v183_v4, 7  ;;  %v9457_v19 = vsel %vm267_vm1, %v283_v1, %v284_v3  ;;  %v189_v57 = vld [vmem:[%s9335_s21 + $0x90] sm:$0xff] }
  0x23   : > { %7837 = vmatprep.mubr.msk.f32.mxu0 %vm521_vm3, %v9427_v62  ;;  %v287_v20 = vrot.slane %v184_v7, 7  ;;  %v467_v21 = vrot.slane %v9451_v11, 1  ;;  %v354_v22 = vrot.slane %v184_v7, 5  ;;  %v9467_v30 = vsel %vm443_vm2, %v460_v58, %v462_v6 }
  0x24   : > { %12742 = vst [vmem:[#allocation7_spill] sm:$0xff] %v9467_v30  ;;  %v469_v31 = vrot.slane %v9454_v12, 1  ;;  %v9471_v32 = vsel %vm443_vm2, %v464_v9, %v465_v10  ;;  %v470_v33 = vrot.slane %v9457_v19, 1  ;;  %v9475_v34 = vsel %vm267_vm1, %v284_v3, %v353_v13 }
  0x25   : > { %12743 = vst [vmem:[#allocation8_spill] sm:$0xff] %v9471_v32  ;;  %v9478_v36 = vsel %vm267_vm1, %v225_v14, %v286_v18  ;;  %v9483_v41 = vsel %vm267_vm1, %v286_v18, %v287_v20  ;;  %v226_v45 = vrot.slane %v185_v26, 1  ;;  %v289_v46 = vrot.slane %v185_v26, 7 }
  0x26   : > { %7838 = vmatmul.mubr.msk.f32.gmra.mrb[6].mxu0 %vm521_vm3, %v9439_v5  ;;  %v290_v47 = vrot.slane %v186_v27, 7  ;;  %v9488_v49 = vsel %vm443_vm2, %v465_v10, %v467_v21  ;;  %v9491_v50 = vsel %vm267_vm1, %v287_v20, %v354_v22  ;;  %v355_v52 = vrot.slane %v186_v27, 5  ;;  %v191_v27 = vld [vmem:[%s9335_s21 + $0xa0] sm:$0xff]  ;;  %v200_v5 = vld [vmem:[%s9335_s21 + $0xe8] sm:$0xff] }
  0x27   : > { %7840 = vmatprep.mubr.msk.f32.mxu0 %vm521_vm3, %v9446_v8  ;;  %12744 = vst [vmem:[#allocation9_spill] sm:$0xff] %v9488_v49  ;;  %v472_v53 = vrot.slane %v9475_v34, 1  ;;  %v227_v54 = vrot.slane %v187_v39, 1  ;;  %v292_v55 = vrot.slane %v187_v39, 7  ;;  %v293_v56 = vrot.slane %v188_v40, 7  ;;  %v192_v39 = vld [vmem:[%s9335_s21 + $0xa8] sm:$0xff] }
  0x28   : > { %v9498_v58 = vsel %vm443_vm2, %v469_v31, %v470_v33  ;;  %v474_v60 = vrot.slane %v9478_v36, 1  ;;  %v475_v61 = vrot.slane %v9483_v41, 1  ;;  %v477_v1 = vrot.slane %v9491_v50, 1 }
  0x29   : > { %12745 = vst [vmem:[#allocation10_spill] sm:$0xff] %v9498_v58  ;;  %v9505_v3 = vsel %vm267_vm1, %v289_v46, %v290_v47  ;;  %v9508_v4 = vsel %vm267_vm1, %v226_v45, %v289_v46  ;;  %v9513_v6 = vsel %vm267_vm1, %v290_v47, %v355_v52  ;;  %v356_v7 = vrot.slane %v188_v40, 5 }
  0x2a   : > { %7841 = vmatmul.mubr.msk.f32.gmra.mrb[8].mxu0 %vm521_vm3, %v9467_v30  ;;  %v228_v9 = vrot.slane %v189_v57, 1  ;;  %v295_v10 = vrot.slane %v189_v57, 7  ;;  %v9518_v13 = vsel %vm443_vm2, %v470_v33, %v472_v53  ;;  %v9521_v14 = vsel %vm267_vm1, %v292_v55, %v293_v56 }
  0x2b   : > { %7843 = vmatprep.mubr.msk.f32.mxu0 %vm521_vm3, %v9471_v32  ;;  %12746 = vst [vmem:[#allocation11_spill] sm:$0xff] %v9518_v13  ;;  %v9524_v18 = vsel %vm267_vm1, %v227_v54, %v292_v55  ;;  %v296_v20 = vrot.slane %v190_v0, 7  ;;  %v9527_v21 = vsel %vm443_vm2, %v474_v60, %v475_v61  ;;  %v479_v22 = vrot.slane %v9508_v4, 1  ;;  %v197_v32 = vld [vmem:[%s9335_s21 + $0xd0] sm:$0xff] }
  0x2c   : > { %12747 = vst [vmem:[#allocation12_spill] sm:$0xff] %v9527_v21  ;;  %v480_v26 = vrot.slane %v9505_v3, 1  ;;  %v9533_v31 = vsel %vm443_vm2, %v475_v61, %v477_v1  ;;  %v482_v33 = vrot.slane %v9513_v6, 1  ;;  %v484_v40 = vrot.slane %v9524_v18, 1  ;;  %v193_v61 = vld [vmem:[%s9335_s21 + $0xb0] sm:$0xff] }
  0x2d   : > { %12748 = vst [vmem:[#allocation13_spill] sm:$0xff] %v9533_v31  ;;  %v485_v45 = vrot.slane %v9521_v14, 1  ;;  %v9542_v46 = vsel %vm267_vm1, %v293_v56, %v356_v7  ;;  %v9545_v47 = vsel %vm267_vm1, %v228_v9, %v295_v10  ;;  %v9550_v52 = vsel %vm267_vm1, %v295_v10, %v296_v20  ;;  %v194_v56 = vld [vmem:[%s9335_s21 + $0xb8] sm:$0xff] }
  0x2e   : > { %7844 = vmatmul.mubr.msk.f32.gmra.mrb[10].mxu0 %vm521_vm3, %v9488_v49  ;;  %v357_v53 = vrot.slane %v190_v0, 5  ;;  %v229_v54 = vrot.slane %v191_v27, 1  ;;  %v298_v55 = vrot.slane %v191_v27, 7  ;;  %v9553_v57 = vsel %vm443_vm2, %v479_v22, %v480_v26 }
  0x2f   : > { %7846 = vmatprep.mubr.msk.f32.mxu0 %vm521_vm3, %v9498_v58  ;;  %12749 = vst [vmem:[#allocation14_spill] sm:$0xff] %v9553_v57  ;;  %v299_v60 = vrot.slane %v192_v39, 7  ;;  %v9560_v1 = vsel %vm443_vm2, %v480_v26, %v482_v33  ;;  %v487_v7 = vrot.slane %v9542_v46, 1  ;;  %v489_v9 = vrot.slane %v9545_v47, 1  ;;  %v195_v58 = vld [vmem:[%s9335_s21 + $0xc0] sm:$0xff] }
  0x30   : > { %12750 = vst [vmem:[#allocation15_spill] sm:$0xff] %v9560_v1  ;;  %v490_v0 = vrot.slane %v9550_v52, 1  ;;  %v9568_v10 = vsel %vm443_vm2, %v484_v40, %v485_v45  ;;  %v9571_v22 = vsel %vm267_vm1, %v296_v20, %v357_v53  ;;  %v9574_v27 = vsel %vm267_vm1, %v229_v54, %v298_v55 }
  0x31   : > { %12751 = vst [vmem:[#allocation16_spill] sm:$0xff] %v9568_v10  ;;  %v358_v26 = vrot.slane %v192_v39, 5  ;;  %v9577_v33 = vsel %vm267_vm1, %v298_v55, %v299_v60  ;;  %v9583_v40 = vsel %vm443_vm2, %v485_v45, %v487_v7  ;;  %v492_v53 = vrot.slane %v9571_v22, 1  ;;  %v196_v39 = vld [vmem:[%s9335_s21 + $0xc8] sm:$0xff] }
  0x32   : > { %7847 = vmatmul.mubr.msk.f32.gmra.mrb[12].mxu0 %vm521_vm3, %v9518_v13  ;;  %v302_v13 = vrot.slane %v194_v56, 7  ;;  %12752 = vst [vmem:[#allocation17_spill] sm:$0xff] %v9583_v40  ;;  %v9586_v20 = vsel %vm443_vm2, %v489_v9, %v490_v0  ;;  %v494_v54 = vrot.slane %v9574_v27, 1  ;;  %v495_v55 = vrot.slane %v9577_v33, 1 }
  0x33   : > { %7849 = vmatprep.mubr.msk.f32.mxu0 %vm521_vm3, %v9527_v21  ;;  %v301_v21 = vrot.slane %v193_v61, 7  ;;  %12753 = vst [vmem:[#allocation18_spill] sm:$0xff] %v9586_v20  ;;  %v231_v9 = vrot.slane %v195_v58, 1  ;;  %v305_v49 = vrot.slane %v196_v39, 7  ;;  %v307_v30 = vrot.slane %v197_v32, 7 }
  0x35   : > { %v9598_v45 = vsel %vm267_vm1, %v301_v21, %v302_v13 }
  0x36   : > { %7850 = vmatmul.mubr.msk.f32.gmra.mrb[14].mxu0 %vm521_vm3, %v9533_v31  ;;  %v230_v31 = vrot.slane %v193_v61, 1  ;;  %v9595_v61 = vsel %vm267_vm1, %v299_v60, %v358_v26 }
  0x37   : > { %7852 = vmatprep.mubr.msk.f32.mxu0 %vm521_vm3, %v9553_v57  ;;  %v304_v57 = vrot.slane %v195_v58, 7  ;;  %v497_v60 = vrot.slane %v9595_v61, 1 }
  0x38   : > { %v9601_v7 = vsel %vm267_vm1, %v230_v31, %v301_v21  ;;  %v9614_v21 = vsel %vm443_vm2, %v494_v54, %v495_v55  ;;  %v500_v31 = vrot.slane %v9598_v45, 1  ;;  %v199_v54 = vld [vmem:[%s9335_s21 + $0xe0] sm:$0xff] }
  0x39   : > { %12755 = vst [vmem:[#allocation20_spill] sm:$0xff] %v9614_v21  ;;  %v499_v58 = vrot.slane %v9601_v7, 1  ;;  %v9625_v8 = vsel %vm267_vm1, %v304_v57, %v305_v49 }
  0x3a   : > { %7853 = vmatmul.mubr.msk.f32.gmra.mrb[16].mxu0 %vm521_vm3, %v9560_v1  ;;  %v359_v1 = vrot.slane %v194_v56, 5  ;;  %v198_v56 = vld [vmem:[%s9335_s21 + $0xd8] sm:$0xff] }
  0x3b   : > { %7855 = vmatprep.mubr.msk.f32.mxu0 %vm521_vm3, %v9568_v10  ;;  %v9607_v10 = vsel %vm443_vm2, %v490_v0, %v492_v53  ;;  %v9622_v0 = vsel %vm267_vm1, %v231_v9, %v304_v57  ;;  %v360_v53 = vrot.slane %v196_v39, 5  ;;  %v505_v39 = vrot.slane %v9625_v8, 1 }
  0x3c   : > { %12754 = vst [vmem:[#allocation19_spill] sm:$0xff] %v9607_v10  ;;  %v9619_v26 = vsel %vm267_vm1, %v302_v13, %v359_v1  ;;  %v9634_v13 = vsel %vm443_vm2, %v495_v55, %v497_v60  ;;  %v9637_v1 = vsel %vm443_vm2, %v499_v58, %v500_v31  ;;  %v504_v57 = vrot.slane %v9622_v0, 1 }
  0x3d   : > { %12756 = vst [vmem:[#allocation21_spill] sm:$0xff] %v9634_v13  ;;  %12757 = vst [vmem:[#allocation22_spill] sm:$0xff] %v9637_v1  ;;  %v9643_v9 = vsel %vm267_vm1, %v305_v49, %v360_v53  ;;  %v361_v62 = vrot.slane %v198_v56, 5  ;;  %v233_v55 = vrot.slane %v199_v54, 1  ;;  %v310_v60 = vrot.slane %v199_v54, 7 }
  0x3e   : > { %7856 = vmatmul.mubr.msk.f32.gmra.mrb[18].mxu0 %vm521_vm3, %v9583_v40  ;;  %v232_v40 = vrot.slane %v197_v32, 1  ;;  %v502_v32 = vrot.slane %v9619_v26, 1  ;;  %v311_v58 = vrot.slane %v200_v5, 7  ;;  %v507_v49 = vrot.slane %v9643_v9, 1 }
  0x3f   : > { %7858 = vmatprep.mubr.msk.f32.mxu0 %vm521_vm3, %v9586_v20  ;;  %v308_v20 = vrot.slane %v198_v56, 7  ;;  %v9661_v56 = vsel %vm443_vm2, %v504_v57, %v505_v39  ;;  %v362_v54 = vrot.slane %v200_v5, 5 }
  0x40   : > { %v9656_v29 = vsel %vm443_vm2, %v500_v31, %v502_v32  ;;  %12758 = vst [vmem:[#allocation23_spill] sm:$0xff] %v9661_v56  ;;  %v9678_v31 = vsel %vm443_vm2, %v505_v39, %v507_v49  ;;  %v6719_v49 = vld [vmem:[%s12533_s1 + $0xc] sm:$0xf] }
  0x41   : > { %v9665_v53 = vsel %vm267_vm1, %v308_v20, %v361_v62  ;;  %v9687_v57 = vsel %vm267_vm1, %v311_v58, %v362_v54 }
  0x42   : > { %7859 = vmatmul.mubr.msk.f32.gmra.mrb[20].mxu0 %vm521_vm3, %v9607_v10  ;;  %v9646_v10 = vsel %vm267_vm1, %v232_v40, %v307_v30  ;;  %v512_v32 = vrot.slane %v9665_v53, 1 }
  0x43   : > { %7861 = vmatprep.mubr.msk.f32.mxu0 %vm521_vm3, %v9614_v21  ;;  %v9649_v21 = vsel %vm267_vm1, %v307_v30, %v308_v20  ;;  %v509_v40 = vrot.slane %v9646_v10, 1 }
  0x44   : > { %v510_v30 = vrot.slane %v9649_v21, 1 }
  0x46   : > { %7862 = vmatmul.mubr.msk.f32.gmra.mrb[22].mxu0 %vm521_vm3, %v9634_v13  ;;  %v9668_v13 = vsel %vm267_vm1, %v310_v60, %v311_v58  ;;  %v9682_v62 = vsel %vm443_vm2, %v509_v40, %v510_v30  ;;  %v9694_v39 = vsel %vm443_vm2, %v510_v30, %v512_v32  ;;  %v1101_v40 = vrot.slane %v9343_v15, 2 }
  0x47   : > { %7864 = vmatprep.mubr.msk.f32.mxu0 %vm521_vm3, %v9637_v1  ;;  %v9671_v1 = vsel %vm267_vm1, %v233_v55, %v310_v60  ;;  %12759 = vst [vmem:[#allocation24_spill] sm:$0xff] %v9682_v62  ;;  %v515_v20 = vrot.slane %v9668_v13, 1  ;;  %v517_v55 = vrot.slane %v9687_v57, 1  ;;  %v1103_v30 = vrot.slane %v9349_v17, 2 }
  0x48   : > { %v514_v5 = vrot.slane %v9671_v1, 1  ;;  %v1105_v32 = vrot.slane %v9359_v24, 2  ;;  %v1108_v17 = vrot.slane %v9362_v25, 2  ;;  %v1110_v25 = vrot.slane %v9378_v35, 2 }
  0x49   : > { %v9705_v58 = vsel %vm443_vm2, %v515_v20, %v517_v55 }
  0x4a   : > { %7865 = vmatmul.mubr.msk.f32.gmra.mrb[24].mxu0 %vm521_vm3, %v9656_v29  ;;  %v9698_v60 = vsel %vm443_vm2, %v514_v5, %v515_v20  ;;  %12760 = vst [vmem:[#allocation25_spill] sm:$0xff] %v9705_v58  ;;  %v1106_v5 = vrot.slane %v9356_v23, 2  ;;  %v9790_v20 = vsel %vm1099_vm4, %v1101_v40, %v1103_v30  ;;  %v1111_v30 = vrot.slane %v9398_v43, 2 }
  0x4b   : > { %7867 = vmatprep.mubr.msk.f32.mxu0 %vm521_vm3, %v9661_v56 }
  0x4c   : > { %v9794_v55 = vsel %vm1099_vm4, %v1105_v32, %v1106_v5  ;;  %v9819_v32 = vsel %vm1099_vm4, %v1110_v25, %v1111_v30  ;;  %v1120_v25 = vrot.slane %v9430_v63, 2 }
  0x4d   : > { %12762 = vst [vmem:[#allocation27_spill] sm:$0xff] %v9794_v55  ;;  %12764 = vst [vmem:[#allocation29_spill] sm:$0xff] %v9819_v32 }
  0x4e   : > { %7868 = vmatmul.mubr.msk.f32.gmra.mrb[26].mxu0 %vm521_vm3, %v9678_v31 }
  0x4f   : > { %7870 = vmatprep.mubr.msk.f32.mxu0 %vm521_vm3, %v9682_v62 }
  0x52   : > { %7871 = vmatmul.mubr.msk.f32.gmra.mrb[28].mxu0 %vm521_vm3, %v9694_v39 }
  0x53   : > { %7873 = vmatprep.mubr.msk.f32.mxu0 %vm521_vm3, %v9698_v60 }
  0x56   : > { %7874 = vmatmul.mubr.msk.f32.gmra.mrb[30].mxu0 %vm521_vm3, %v9705_v58 }
  0x57   : > { %7878 = vmatprep.mubr.msk.f32.mxu0 %vm521_vm3, %v9346_v16 }
  0x5a   : > { %7879 = vmatmul.mubr.msk.f32.vlgmr.msra.gmra.mrb[0].mxu0 %vm521_vm3, %v9343_v15 }
  0x5b   : > { %7927 = vmatpush3.msk.msra.mxu0 %vm582_vm0, %v9383_v37  ;;  %7881 = vmatprep.mubr.msk.f32.mxu0 %vm521_vm3, %v9359_v24  ;;  %v1100_v37 = vrot.slane %v9346_v16, 2 }
  0x5c   : > { %7976 = vmatprep.subr.msk.mxu0 %vm582_vm0, %v6719_v49 }
  0x5d   : > { %v9781_v54 = vsel %vm1099_vm4, %v1100_v37, %v1101_v40  ;;  %v9799_v37 = vld [vmem:[%s12533_s1 + $0x10] sm:$0xf]  ;;  %v9807_v40 = vsel %vm1099_vm4, %v1106_v5, %v1108_v17  ;;  %v1115_v5 = vrot.slane %v9406_v48, 2  ;;  %v1116_v17 = vrot.slane %v9412_v51, 2 }
  0x5e   : > { %7882 = vmatmul.mubr.msk.f32.gmra.mrb[2].mxu0 %vm521_vm3, %v9356_v23  ;;  %12761 = vst [vmem:[#allocation26_spill] sm:$0xff] %v9781_v54  ;;  %12763 = vst [vmem:[#allocation28_spill] sm:$0xff] %v9807_v40 }
  0x5f   : > { %7884 = vmatprep.mubr.msk.f32.mxu0 %vm521_vm3, %v9346_v16 }
  0x62   : > { %7885 = vmatmul.mubr.msk.f32.gmra.mrb[4].mxu0 %vm521_vm3, %v9343_v15 }
  0x63   : > { %7887 = vmatprep.mubr.msk.f32.mxu0 %vm521_vm3, %v9378_v35 }
  0x66   : > { %7888 = vmatmul.mubr.msk.f32.gmra.mrb[6].mxu0 %vm521_vm3, %v9398_v43 }
  0x67   : > { %7890 = vmatprep.mubr.msk.f32.mxu0 %vm521_vm3, %v9406_v48 }
  0x6a   : > { %7891 = vmatmul.mubr.msk.f32.gmra.mrb[8].mxu0 %vm521_vm3, %v9412_v51 }
  0x6b   : > { %7893 = vmatprep.mubr.msk.f32.mxu0 %vm521_vm3, %v9430_v63 }
  0x6e   : > { %7894 = vmatmul.mubr.msk.f32.gmra.mrb[10].mxu0 %vm521_vm3, %v9433_v2 }
  0x6f   : > { %7896 = vmatprep.mubr.msk.f32.mxu0 %vm521_vm3, %v9454_v12 }
  0x72   : > { %7897 = vmatmul.mubr.msk.f32.gmra.mrb[12].mxu0 %vm521_vm3, %v9457_v19 }
  0x73   : > { %7899 = vmatprep.mubr.msk.f32.mxu0 %vm521_vm3, %v9478_v36 }
  0x76   : > { %7900 = vmatmul.mubr.msk.f32.gmra.mrb[14].mxu0 %vm521_vm3, %v9483_v41 }
  0x77   : > { %7902 = vmatprep.mubr.msk.f32.mxu0 %vm521_vm3, %v9508_v4 }
  0x7a   : > { %7903 = vmatmul.mubr.msk.f32.gmra.mrb[16].mxu0 %vm521_vm3, %v9505_v3 }
  0x7b   : > { %7905 = vmatprep.mubr.msk.f32.mxu0 %vm521_vm3, %v9524_v18 }
  0x7e   : > { %7906 = vmatmul.mubr.msk.f32.gmra.mrb[18].mxu0 %vm521_vm3, %v9521_v14 }
  0x7f   : > { %7908 = vmatprep.mubr.msk.f32.mxu0 %vm521_vm3, %v9545_v47 }
  0x82   : > { %7909 = vmatmul.mubr.msk.f32.gmra.mrb[20].mxu0 %vm521_vm3, %v9550_v52 }
  0x83   : > { %7911 = vmatprep.mubr.msk.f32.mxu0 %vm521_vm3, %v9574_v27 }
  0x86   : > { %7912 = vmatmul.mubr.msk.f32.gmra.mrb[22].mxu0 %vm521_vm3, %v9577_v33 }
  0x87   : > { %7914 = vmatprep.mubr.msk.f32.mxu0 %vm521_vm3, %v9601_v7 }
  0x8a   : > { %7915 = vmatmul.mubr.msk.f32.gmra.mrb[24].mxu0 %vm521_vm3, %v9598_v45 }
  0x8b   : > { %7917 = vmatprep.mubr.msk.f32.mxu0 %vm521_vm3, %v9622_v0 }
  0x8e   : > { %7918 = vmatmul.mubr.msk.f32.gmra.mrb[26].mxu0 %vm521_vm3, %v9625_v8 }
  0x8f   : > { %7920 = vmatprep.mubr.msk.f32.mxu0 %vm521_vm3, %v9646_v10 }
  0x92   : > { %7921 = vmatmul.mubr.msk.f32.gmra.mrb[28].mxu0 %vm521_vm3, %v9649_v21 }
  0x93   : > { %7923 = vmatprep.mubr.msk.f32.mxu0 %vm521_vm3, %v9671_v1 }
  0x96   : > { %7924 = vmatmul.mubr.msk.f32.gmra.mrb[30].mxu0 %vm521_vm3, %v9668_v13 }
  0x97   : > { %7928 = vmatprep.mubr.msk.f32.mxu0 %vm521_vm3, %v9781_v54 }
  0x9a   : > { %7929 = vmatmul.mubr.msk.f32.vlgmr.msra.gmra.mrb[0].mxu0 %vm521_vm3, %v9790_v20 }
  0x9b   : > { %7977 = vmatpush3.msk.msra.mxu0 %vm582_vm0, %v6719_v49  ;;  %7931 = vmatprep.mubr.msk.f32.mxu0 %vm521_vm3, %v9794_v55  ;;  %v1113_v49 = vrot.slane %v9401_v44, 2  ;;  %v9832_v44 = vsel %vm1099_vm4, %v1115_v5, %v1116_v17  ;;  %v1121_v55 = vrot.slane %v9433_v2, 2  ;;  %v1126_v5 = vrot.slane %v9457_v19, 2 }
  0x9c   : > { %8026 = vmatprep.subr.msk.mxu0 %vm582_vm0, %v9799_v37  ;;  %12765 = vst [vmem:[#allocation30_spill] sm:$0xff] %v9832_v44 }
  0x9e   : > { %7932 = vmatmul.mubr.msk.f32.gmra.mrb[2].mxu0 %vm521_vm3, %v9807_v40  ;;  %v9828_v40 = vsel %vm1099_vm4, %v1111_v30, %v1113_v49  ;;  %v1123_v30 = vrot.slane %v9451_v11, 2  ;;  %v1125_v49 = vrot.slane %v9454_v12, 2 }
  0x9f   : > { %7934 = vmatprep.mubr.msk.f32.mxu0 %vm521_vm3, %v9781_v54  ;;  %v1118_v54 = vrot.slane %v9424_v59, 2  ;;  %v9845_v59 = vsel %vm1099_vm4, %v1120_v25, %v1121_v55  ;;  %v1131_v25 = vrot.slane %v9483_v41, 2 }
  0xa0   : > { %12766 = vst [vmem:[#allocation31_spill] sm:$0xff] %v9845_v59  ;;  %v9858_v11 = vsel %vm1099_vm4, %v1125_v49, %v1126_v5  ;;  %v1136_v49 = vrot.slane %v9505_v3, 2 }
  0xa1   : > { %12767 = vst [vmem:[#allocation32_spill] sm:$0xff] %v9858_v11 }
  0xa2   : > { %7935 = vmatmul.mubr.msk.f32.gmra.mrb[4].mxu0 %vm521_vm3, %v9790_v20 }
  0xa3   : > { %7937 = vmatprep.mubr.msk.f32.mxu0 %vm521_vm3, %v9819_v32  ;;  %v9841_v32 = vsel %vm1099_vm4, %v1116_v17, %v1118_v54  ;;  %v1128_v54 = vrot.slane %v9475_v34, 2  ;;  %v1130_v17 = vrot.slane %v9478_v36, 2 }
  0xa5   : > { %v9871_v34 = vsel %vm1099_vm4, %v1130_v17, %v1131_v25  ;;  %v1141_v17 = vrot.slane %v9521_v14, 2 }
  0xa6   : > { %7938 = vmatmul.mubr.msk.f32.gmra.mrb[6].mxu0 %vm521_vm3, %v9828_v40  ;;  %12768 = vst [vmem:[#allocation33_spill] sm:$0xff] %v9871_v34 }
  0xa7   : > { %7940 = vmatprep.mubr.msk.f32.mxu0 %vm521_vm3, %v9832_v44  ;;  %v9854_v44 = vsel %vm1099_vm4, %v1121_v55, %v1123_v30  ;;  %v1133_v55 = vrot.slane %v9491_v50, 2  ;;  %v1135_v30 = vrot.slane %v9508_v4, 2 }
  0xa9   : > { %v9884_v50 = vsel %vm1099_vm4, %v1135_v30, %v1136_v49  ;;  %v1146_v30 = vrot.slane %v9550_v52, 2 }
  0xaa   : > { %7941 = vmatmul.mubr.msk.f32.gmra.mrb[8].mxu0 %vm521_vm3, %v9841_v32  ;;  %12769 = vst [vmem:[#allocation34_spill] sm:$0xff] %v9884_v50 }
  0xab   : > { %7943 = vmatprep.mubr.msk.f32.mxu0 %vm521_vm3, %v9845_v59  ;;  %v9867_v59 = vsel %vm1099_vm4, %v1126_v5, %v1128_v54  ;;  %v1138_v5 = vrot.slane %v9513_v6, 2  ;;  %v1140_v54 = vrot.slane %v9524_v18, 2 }
  0xad   : > { %v9897_v6 = vsel %vm1099_vm4, %v1140_v54, %v1141_v17  ;;  %v1151_v54 = vrot.slane %v9577_v33, 2 }
  0xae   : > { %7944 = vmatmul.mubr.msk.f32.gmra.mrb[10].mxu0 %vm521_vm3, %v9854_v44  ;;  %12770 = vst [vmem:[#allocation35_spill] sm:$0xff] %v9897_v6 }
  0xaf   : > { %7946 = vmatprep.mubr.msk.f32.mxu0 %vm521_vm3, %v9858_v11  ;;  %v9880_v11 = vsel %vm1099_vm4, %v1131_v25, %v1133_v55  ;;  %v1143_v25 = vrot.slane %v9542_v46, 2  ;;  %v1145_v55 = vrot.slane %v9545_v47, 2 }
  0xb1   : > { %v9910_v46 = vsel %vm1099_vm4, %v1145_v55, %v1146_v30  ;;  %v1156_v55 = vrot.slane %v9598_v45, 2 }
  0xb2   : > { %7947 = vmatmul.mubr.msk.f32.gmra.mrb[12].mxu0 %vm521_vm3, %v9867_v59  ;;  %12771 = vst [vmem:[#allocation36_spill] sm:$0xff] %v9910_v46 }
  0xb3   : > { %7949 = vmatprep.mubr.msk.f32.mxu0 %vm521_vm3, %v9871_v34  ;;  %v9893_v34 = vsel %vm1099_vm4, %v1136_v49, %v1138_v5  ;;  %v1148_v49 = vrot.slane %v9571_v22, 2  ;;  %v1150_v5 = vrot.slane %v9574_v27, 2 }
  0xb5   : > { %v9923_v22 = vsel %vm1099_vm4, %v1150_v5, %v1151_v54  ;;  %v1161_v5 = vrot.slane %v9625_v8, 2 }
  0xb6   : > { %7950 = vmatmul.mubr.msk.f32.gmra.mrb[14].mxu0 %vm521_vm3, %v9880_v11  ;;  %12773 = vst [vmem:[#allocation38_spill] sm:$0xff] %v9923_v22 }
  0xb7   : > { %7952 = vmatprep.mubr.msk.f32.mxu0 %vm521_vm3, %v9884_v50  ;;  %v9906_v50 = vsel %vm1099_vm4, %v1141_v17, %v1143_v25  ;;  %v1153_v17 = vrot.slane %v9595_v61, 2  ;;  %v1155_v25 = vrot.slane %v9601_v7, 2 }
  0xb9   : > { %v9936_v61 = vsel %vm1099_vm4, %v1155_v25, %v1156_v55  ;;  %v1166_v25 = vrot.slane %v9649_v21, 2 }
  0xba   : > { %7953 = vmatmul.mubr.msk.f32.gmra.mrb[16].mxu0 %vm521_vm3, %v9893_v34  ;;  %12774 = vst [vmem:[#allocation39_spill] sm:$0xff] %v9936_v61 }
  0xbb   : > { %7955 = vmatprep.mubr.msk.f32.mxu0 %vm521_vm3, %v9897_v6  ;;  %v9919_v6 = vsel %vm1099_vm4, %v1146_v30, %v1148_v49  ;;  %v1158_v30 = vrot.slane %v9619_v26, 2  ;;  %v1160_v49 = vrot.slane %v9622_v0, 2 }
  0xbc   : > { %12772 = vst [vmem:[#allocation37_spill] sm:$0xff] %v9919_v6 }
  0xbd   : > { %v9949_v26 = vsel %vm1099_vm4, %v1160_v49, %v1161_v5  ;;  %v1171_v49 = vrot.slane %v9668_v13, 2 }
  0xbe   : > { %7956 = vmatmul.mubr.msk.f32.gmra.mrb[18].mxu0 %vm521_vm3, %v9906_v50  ;;  %12776 = vst [vmem:[#allocation41_spill] sm:$0xff] %v9949_v26 }
  0xbf   : > { %7958 = vmatprep.mubr.msk.f32.mxu0 %vm521_vm3, %v9910_v46  ;;  %v9932_v46 = vsel %vm1099_vm4, %v1151_v54, %v1153_v17  ;;  %v1163_v54 = vrot.slane %v9643_v9, 2  ;;  %v1165_v17 = vrot.slane %v9646_v10, 2 }
  0xc1   : > { %v9962_v9 = vsel %vm1099_vm4, %v1165_v17, %v1166_v25  ;;  %v202_v17 = vld [vmem:[%s9335_s21 + $0xf8] sm:$0xff] }
  0xc2   : > { %7959 = vmatmul.mubr.msk.f32.gmra.mrb[20].mxu0 %vm521_vm3, %v9919_v6  ;;  %12777 = vst [vmem:[#allocation42_spill] sm:$0xff] %v9962_v9 }
  0xc3   : > { %7961 = vmatprep.mubr.msk.f32.mxu0 %vm521_vm3, %v9923_v22  ;;  %v9945_v22 = vsel %vm1099_vm4, %v1156_v55, %v1158_v30  ;;  %v1168_v55 = vrot.slane %v9665_v53, 2  ;;  %v1170_v30 = vrot.slane %v9671_v1, 2 }
  0xc4   : > { %12775 = vst [vmem:[#allocation40_spill] sm:$0xff] %v9945_v22 }
  0xc5   : > { %v9975_v53 = vsel %vm1099_vm4, %v1170_v30, %v1171_v49 }
  0xc6   : > { %7962 = vmatmul.mubr.msk.f32.gmra.mrb[22].mxu0 %vm521_vm3, %v9932_v46 }
  0xc7   : > { %7964 = vmatprep.mubr.msk.f32.mxu0 %vm521_vm3, %v9936_v61  ;;  %v9958_v61 = vsel %vm1099_vm4, %v1161_v5, %v1163_v54  ;;  %v1173_v5 = vrot.slane %v9687_v57, 2  ;;  %v6787_v57 = vld [vmem:[%s12533_s1 + $0x14] sm:$0xf] }
  0xc9   : > { %v9982_v54 = vsel %vm1099_vm4, %v1171_v49, %v1173_v5  ;;  %v6821_v49 = vld [vmem:[%s12533_s1 + $0x18] sm:$0xf]  ;;  %v12778_v5 = vld [vmem:[#allocation3_spill] sm:$0xff] }
  0xca   : > { %7965 = vmatmul.mubr.msk.f32.gmra.mrb[24].mxu0 %vm521_vm3, %v9945_v22 }
  0xcb   : > { %7967 = vmatprep.mubr.msk.f32.mxu0 %vm521_vm3, %v9949_v26  ;;  %v9971_v26 = vsel %vm1099_vm4, %v1166_v25, %v1168_v55  ;;  %v314_v25 = vrot.slane %v202_v17, 7 }
  0xce   : > { %7968 = vmatmul.mubr.msk.f32.gmra.mrb[26].mxu0 %vm521_vm3, %v9958_v61 }
  0xcf   : > { %7970 = vmatprep.mubr.msk.f32.mxu0 %vm521_vm3, %v9962_v9 }
  0xd2   : > { %7971 = vmatmul.mubr.msk.f32.gmra.mrb[28].mxu0 %vm521_vm3, %v9971_v26 }
  0xd3   : > { %7973 = vmatprep.mubr.msk.f32.mxu0 %vm521_vm3, %v9975_v53 }
  0xd6   : > { %7974 = vmatmul.mubr.msk.f32.gmra.mrb[30].mxu0 %vm521_vm3, %v9982_v54 }
  0xd7   : > { %7978 = vmatprep.mubr.msk.f32.mxu0 %vm521_vm3, %v9359_v24 }
  0xda   : > { %7979 = vmatmul.mubr.msk.f32.vlgmr.msra.gmra.mrb[0].mxu0 %vm521_vm3, %v9356_v23  ;;  %v201_v23 = vld [vmem:[%s9335_s21 + $0xf0] sm:$0xff] }
  0xdb   : > { %8027 = vmatpush3.msk.msra.mxu0 %vm582_vm0, %v9799_v37  ;;  %7981 = vmatprep.mubr.msk.f32.mxu0 %vm521_vm3, %v9346_v16  ;;  %v234_v24 = vrot.slane %v201_v23, 1  ;;  %v313_v37 = vrot.slane %v201_v23, 7  ;;  %v12779_v23 = vld [vmem:[#allocation4_spill] sm:$0xff] }
  0xdc   : > { %8076 = vmatprep.subr.msk.mxu0 %vm582_vm0, %v6787_v57 }
  0xdd   : > { %v10053_v55 = vsel %vm267_vm1, %v234_v24, %v313_v37  ;;  %v10060_v30 = vsel %vm267_vm1, %v313_v37, %v314_v25  ;;  %v12781_v24 = vld [vmem:[#allocation6_spill] sm:$0xff]  ;;  %v12784_v37 = vld [vmem:[#allocation9_spill] sm:$0xff] }
  0xde   : > { %7982 = vmatmul.mubr.msk.f32.gmra.mrb[2].mxu0 %vm521_vm3, %v9343_v15 }
  0xdf   : > { %7984 = vmatprep.mubr.msk.f32.mxu0 %vm521_vm3, %v9378_v35 }
  0xe2   : > { %7985 = vmatmul.mubr.msk.f32.gmra.mrb[4].mxu0 %vm521_vm3, %v9398_v43 }
  0xe3   : > { %7987 = vmatprep.mubr.msk.f32.mxu0 %vm521_vm3, %v9406_v48 }
  0xe6   : > { %7988 = vmatmul.mubr.msk.f32.gmra.mrb[6].mxu0 %vm521_vm3, %v9412_v51 }
  0xe7   : > { %7990 = vmatprep.mubr.msk.f32.mxu0 %vm521_vm3, %v9430_v63 }
  0xea   : > { %7991 = vmatmul.mubr.msk.f32.gmra.mrb[8].mxu0 %vm521_vm3, %v9433_v2 }
  0xeb   : > { %7993 = vmatprep.mubr.msk.f32.mxu0 %vm521_vm3, %v9454_v12 }
  0xee   : > { %7994 = vmatmul.mubr.msk.f32.gmra.mrb[10].mxu0 %vm521_vm3, %v9457_v19 }
  0xef   : > { %7996 = vmatprep.mubr.msk.f32.mxu0 %vm521_vm3, %v9478_v36 }
  0xf2   : > { %7997 = vmatmul.mubr.msk.f32.gmra.mrb[12].mxu0 %vm521_vm3, %v9483_v41 }
  0xf3   : > { %7999 = vmatprep.mubr.msk.f32.mxu0 %vm521_vm3, %v9508_v4 }
  0xf6   : > { %8000 = vmatmul.mubr.msk.f32.gmra.mrb[14].mxu0 %vm521_vm3, %v9505_v3 }
  0xf7   : > { %8002 = vmatprep.mubr.msk.f32.mxu0 %vm521_vm3, %v9524_v18 }
  0xfa   : > { %8003 = vmatmul.mubr.msk.f32.gmra.mrb[16].mxu0 %vm521_vm3, %v9521_v14 }
  0xfb   : > { %8005 = vmatprep.mubr.msk.f32.mxu0 %vm521_vm3, %v9545_v47 }
  0xfe   : > { %8006 = vmatmul.mubr.msk.f32.gmra.mrb[18].mxu0 %vm521_vm3, %v9550_v52 }
  0xff   : > { %8008 = vmatprep.mubr.msk.f32.mxu0 %vm521_vm3, %v9574_v27 }
 0x102   : > { %8009 = vmatmul.mubr.msk.f32.gmra.mrb[20].mxu0 %vm521_vm3, %v9577_v33 }
 0x103   : > { %8011 = vmatprep.mubr.msk.f32.mxu0 %vm521_vm3, %v9601_v7 }
 0x106   : > { %8012 = vmatmul.mubr.msk.f32.gmra.mrb[22].mxu0 %vm521_vm3, %v9598_v45 }
 0x107   : > { %8014 = vmatprep.mubr.msk.f32.mxu0 %vm521_vm3, %v9622_v0 }
 0x10a   : > { %8015 = vmatmul.mubr.msk.f32.gmra.mrb[24].mxu0 %vm521_vm3, %v9625_v8 }
 0x10b   : > { %8017 = vmatprep.mubr.msk.f32.mxu0 %vm521_vm3, %v9646_v10 }
 0x10e   : > { %8018 = vmatmul.mubr.msk.f32.gmra.mrb[26].mxu0 %vm521_vm3, %v9649_v21 }
 0x10f   : > { %8020 = vmatprep.mubr.msk.f32.mxu0 %vm521_vm3, %v9671_v1 }
 0x112   : > { %8021 = vmatmul.mubr.msk.f32.gmra.mrb[28].mxu0 %vm521_vm3, %v9668_v13 }
 0x113   : > { %8023 = vmatprep.mubr.msk.f32.mxu0 %vm521_vm3, %v10053_v55 }
 0x116   : > { %8024 = vmatmul.mubr.msk.f32.gmra.mrb[30].mxu0 %vm521_vm3, %v10060_v30 }
 0x117   : > { %8028 = vmatprep.mubr.msk.f32.mxu0 %vm521_vm3, %v9388_v38  ;;  %v12780_v38 = vld [vmem:[#allocation5_spill] sm:$0xff] }
 0x11a   : > { %8029 = vmatmul.mubr.msk.f32.vlgmr.msra.gmra.mrb[0].mxu0 %vm521_vm3, %v9395_v42  ;;  %v12782_v42 = vld [vmem:[#allocation7_spill] sm:$0xff] }
 0x11b   : > { %8077 = vmatpush3.msk.msra.mxu0 %vm582_vm0, %v6787_v57  ;;  %8031 = vmatprep.mubr.msk.f32.mxu0 %vm521_vm3, %v9366_v28  ;;  %v12783_v57 = vld [vmem:[#allocation8_spill] sm:$0xff]  ;;  %v12785_v28 = vld [vmem:[#allocation10_spill] sm:$0xff] }
 0x11c   : > { %8126 = vmatprep.subr.msk.mxu0 %vm582_vm0, %v6821_v49 }
 0x11e   : > { %8032 = vmatmul.mubr.msk.f32.gmra.mrb[2].mxu0 %vm521_vm3, %v12778_v5  ;;  %v12786_v5 = vld [vmem:[#allocation11_spill] sm:$0xff] }
 0x11f   : > { %8034 = vmatprep.mubr.msk.f32.mxu0 %vm521_vm3, %v12779_v23  ;;  %v12787_v23 = vld [vmem:[#allocation12_spill] sm:$0xff] }
 0x122   : > { %8035 = vmatmul.mubr.msk.f32.gmra.mrb[4].mxu0 %vm521_vm3, %v12780_v38  ;;  %v12788_v38 = vld [vmem:[#allocation13_spill] sm:$0xff] }
 0x123   : > { %8037 = vmatprep.mubr.msk.f32.mxu0 %vm521_vm3, %v12781_v24  ;;  %v12789_v24 = vld [vmem:[#allocation14_spill] sm:$0xff] }
 0x126   : > { %8038 = vmatmul.mubr.msk.f32.gmra.mrb[6].mxu0 %vm521_vm3, %v12782_v42  ;;  %v12790_v42 = vld [vmem:[#allocation15_spill] sm:$0xff] }
 0x127   : > { %8040 = vmatprep.mubr.msk.f32.mxu0 %vm521_vm3, %v12783_v57  ;;  %v12791_v57 = vld [vmem:[#allocation16_spill] sm:$0xff] }
 0x12a   : > { %8041 = vmatmul.mubr.msk.f32.gmra.mrb[8].mxu0 %vm521_vm3, %v12784_v37  ;;  %v12792_v37 = vld [vmem:[#allocation17_spill] sm:$0xff] }
 0x12b   : > { %8043 = vmatprep.mubr.msk.f32.mxu0 %vm521_vm3, %v12785_v28  ;;  %v12793_v28 = vld [vmem:[#allocation18_spill] sm:$0xff] }
 0x12e   : > { %8044 = vmatmul.mubr.msk.f32.gmra.mrb[10].mxu0 %vm521_vm3, %v12786_v5  ;;  %v12794_v5 = vld [vmem:[#allocation19_spill] sm:$0xff] }
 0x12f   : > { %8046 = vmatprep.mubr.msk.f32.mxu0 %vm521_vm3, %v12787_v23  ;;  %v12795_v23 = vld [vmem:[#allocation20_spill] sm:$0xff] }
 0x132   : > { %8047 = vmatmul.mubr.msk.f32.gmra.mrb[12].mxu0 %vm521_vm3, %v12788_v38  ;;  %v12796_v38 = vld [vmem:[#allocation21_spill] sm:$0xff] }
 0x133   : > { %8049 = vmatprep.mubr.msk.f32.mxu0 %vm521_vm3, %v12789_v24  ;;  %v12797_v24 = vld [vmem:[#allocation22_spill] sm:$0xff] }
 0x136   : > { %8050 = vmatmul.mubr.msk.f32.gmra.mrb[14].mxu0 %vm521_vm3, %v12790_v42 }
 0x137   : > { %8052 = vmatprep.mubr.msk.f32.mxu0 %vm521_vm3, %v12791_v57 }
 0x13a   : > { %8053 = vmatmul.mubr.msk.f32.gmra.mrb[16].mxu0 %vm521_vm3, %v12792_v37  ;;  %v363_v37 = vrot.slane %v202_v17, 5 }
 0x13b   : > { %8055 = vmatprep.mubr.msk.f32.mxu0 %vm521_vm3, %v12793_v28 }
 0x13e   : > { %8056 = vmatmul.mubr.msk.f32.gmra.mrb[18].mxu0 %vm521_vm3, %v12794_v5  ;;  %v411_v5 = vsel %vm267_vm1, %v314_v25, %v363_v37  ;;  %v12798_v25 = vld [vmem:[#allocation27_spill] sm:$0xff]  ;;  %v12799_v37 = vld [vmem:[#allocation28_spill] sm:$0xff] }
 0x13f   : > { %8058 = vmatprep.mubr.msk.f32.mxu0 %vm521_vm3, %v12795_v23  ;;  %v1765_v23 = vrot.slane %v10053_v55, 1 }
 0x142   : > { %8059 = vmatmul.mubr.msk.f32.gmra.mrb[20].mxu0 %vm521_vm3, %v12796_v38  ;;  %v1766_v38 = vrot.slane %v10060_v30, 1 }
 0x143   : > { %8061 = vmatprep.mubr.msk.f32.mxu0 %vm521_vm3, %v12797_v24 }
 0x144   : > { %v10131_v17 = vsel %vm443_vm2, %v1765_v23, %v1766_v38  ;;  %v6855_v23 = vld [vmem:[%s12533_s1 + $0x1c] sm:$0xf] }
 0x146   : > { %8062 = vmatmul.mubr.msk.f32.gmra.mrb[22].mxu0 %vm521_vm3, %v9656_v29 }
 0x147   : > { %8064 = vmatprep.mubr.msk.f32.mxu0 %vm521_vm3, %v9661_v56  ;;  %v1768_v56 = vrot.slane %v411_v5, 1 }
 0x14a   : > { %8065 = vmatmul.mubr.msk.f32.gmra.mrb[24].mxu0 %vm521_vm3, %v9678_v31 }
 0x14b   : > { %8067 = vmatprep.mubr.msk.f32.mxu0 %vm521_vm3, %v9682_v62  ;;  %v10138_v62 = vsel %vm443_vm2, %v1766_v38, %v1768_v56  ;;  %v12801_v56 = vld [vmem:[#allocation29_spill] sm:$0xff]  ;;  %v12802_v38 = vld [vmem:[#allocation30_spill] sm:$0xff] }
 0x14e   : > { %8068 = vmatmul.mubr.msk.f32.gmra.mrb[26].mxu0 %vm521_vm3, %v9694_v39 }
 0x14f   : > { %8070 = vmatprep.mubr.msk.f32.mxu0 %vm521_vm3, %v9698_v60 }
 0x152   : > { %8071 = vmatmul.mubr.msk.f32.gmra.mrb[28].mxu0 %vm521_vm3, %v9705_v58  ;;  %v12800_v58 = vld [vmem:[#allocation26_spill] sm:$0xff] }
 0x153   : > { %8073 = vmatprep.mubr.msk.f32.mxu0 %vm521_vm3, %v10131_v17 }
 0x156   : > { %8074 = vmatmul.mubr.msk.f32.gmra.mrb[30].mxu0 %vm521_vm3, %v10138_v62 }
 0x157   : > { %8078 = vmatprep.mubr.msk.f32.mxu0 %vm521_vm3, %v12798_v25  ;;  %v12804_v25 = vld [vmem:[#allocation32_spill] sm:$0xff] }
 0x15a   : > { %8079 = vmatmul.mubr.msk.f32.vlgmr.msra.gmra.mrb[0].mxu0 %vm521_vm3, %v12799_v37  ;;  %v12805_v37 = vld [vmem:[#allocation33_spill] sm:$0xff] }
 0x15b   : > { %8127 = vmatpush3.msk.msra.mxu0 %vm582_vm0, %v6821_v49  ;;  %8081 = vmatprep.mubr.msk.f32.mxu0 %vm521_vm3, %v12800_v58  ;;  %v12803_v49 = vld [vmem:[#allocation31_spill] sm:$0xff] }
 0x15c   : > { %8176 = vmatprep.subr.msk.mxu0 %vm582_vm0, %v6855_v23 }
 0x15e   : > { %8082 = vmatmul.mubr.msk.f32.gmra.mrb[2].mxu0 %vm521_vm3, %v9790_v20 }
 0x15f   : > { %8084 = vmatprep.mubr.msk.f32.mxu0 %vm521_vm3, %v12801_v56 }
 0x162   : > { %8085 = vmatmul.mubr.msk.f32.gmra.mrb[4].mxu0 %vm521_vm3, %v9828_v40 }
 0x163   : > { %8087 = vmatprep.mubr.msk.f32.mxu0 %vm521_vm3, %v12802_v38  ;;  %v12806_v38 = vld [vmem:[#allocation34_spill] sm:$0xff] }
 0x166   : > { %8088 = vmatmul.mubr.msk.f32.gmra.mrb[6].mxu0 %vm521_vm3, %v9841_v32 }
 0x167   : > { %8090 = vmatprep.mubr.msk.f32.mxu0 %vm521_vm3, %v12803_v49  ;;  %v12807_v49 = vld [vmem:[#allocation35_spill] sm:$0xff] }
 0x16a   : > { %8091 = vmatmul.mubr.msk.f32.gmra.mrb[8].mxu0 %vm521_vm3, %v9854_v44 }
 0x16b   : > { %8093 = vmatprep.mubr.msk.f32.mxu0 %vm521_vm3, %v12804_v25  ;;  %v12808_v25 = vld [vmem:[#allocation36_spill] sm:$0xff] }
 0x16e   : > { %8094 = vmatmul.mubr.msk.f32.gmra.mrb[10].mxu0 %vm521_vm3, %v9867_v59 }
 0x16f   : > { %8096 = vmatprep.mubr.msk.f32.mxu0 %vm521_vm3, %v12805_v37  ;;  %v12809_v37 = vld [vmem:[#allocation38_spill] sm:$0xff] }
 0x172   : > { %8097 = vmatmul.mubr.msk.f32.gmra.mrb[12].mxu0 %vm521_vm3, %v9880_v11 }
 0x173   : > { %8099 = vmatprep.mubr.msk.f32.mxu0 %vm521_vm3, %v12806_v38  ;;  %v12810_v38 = vld [vmem:[#allocation39_spill] sm:$0xff] }
 0x176   : > { %8100 = vmatmul.mubr.msk.f32.gmra.mrb[14].mxu0 %vm521_vm3, %v9893_v34 }
 0x177   : > { %8102 = vmatprep.mubr.msk.f32.mxu0 %vm521_vm3, %v12807_v49  ;;  %v12811_v49 = vld [vmem:[#allocation41_spill] sm:$0xff] }
 0x17a   : > { %8103 = vmatmul.mubr.msk.f32.gmra.mrb[16].mxu0 %vm521_vm3, %v9906_v50 }
 0x17b   : > { %8105 = vmatprep.mubr.msk.f32.mxu0 %vm521_vm3, %v12808_v25 }
 0x17e   : > { %8106 = vmatmul.mubr.msk.f32.gmra.mrb[18].mxu0 %vm521_vm3, %v9919_v6  ;;  %v2037_v6 = vrot.slane %v10060_v30, 2 }
 0x17f   : > { %8108 = vmatprep.mubr.msk.f32.mxu0 %vm521_vm3, %v12809_v37  ;;  %v2036_v37 = vrot.slane %v10053_v55, 2 }
 0x182   : > { %8109 = vmatmul.mubr.msk.f32.gmra.mrb[20].mxu0 %vm521_vm3, %v9932_v46 }
 0x183   : > { %8111 = vmatprep.mubr.msk.f32.mxu0 %vm521_vm3, %v12810_v38  ;;  %v10208_v38 = vsel %vm1099_vm4, %v2036_v37, %v2037_v6 }
 0x186   : > { %8112 = vmatmul.mubr.msk.f32.gmra.mrb[22].mxu0 %vm521_vm3, %v9945_v22  ;;  %v2039_v22 = vrot.slane %v411_v5, 2  ;;  %v6889_v5 = vld [vmem:[%s12533_s1 + $0x20] sm:$0xf] }
 0x187   : > { %8114 = vmatprep.mubr.msk.f32.mxu0 %vm521_vm3, %v12811_v49 }
 0x18a   : > { %8115 = vmatmul.mubr.msk.f32.gmra.mrb[24].mxu0 %vm521_vm3, %v9958_v61 }
 0x18b   : > { %8117 = vmatprep.mubr.msk.f32.mxu0 %vm521_vm3, %v9962_v9  ;;  %v10215_v9 = vsel %vm1099_vm4, %v2037_v6, %v2039_v22 }
 0x18e   : > { %8118 = vmatmul.mubr.msk.f32.gmra.mrb[26].mxu0 %vm521_vm3, %v9971_v26 }
 0x18f   : > { %8120 = vmatprep.mubr.msk.f32.mxu0 %vm521_vm3, %v9975_v53 }
 0x192   : > { %8121 = vmatmul.mubr.msk.f32.gmra.mrb[28].mxu0 %vm521_vm3, %v9982_v54 }
 0x193   : > { %8123 = vmatprep.mubr.msk.f32.mxu0 %vm521_vm3, %v10208_v38 }
 0x196   : > { %8124 = vmatmul.mubr.msk.f32.gmra.mrb[30].mxu0 %vm521_vm3, %v10215_v9 }
 0x197   : > { %8128 = vmatprep.mubr.msk.f32.mxu0 %vm521_vm3, %v9346_v16  ;;  %v12813_v16 = vld [vmem:[#allocation3_spill] sm:$0xff] }
 0x19a   : > { %8129 = vmatmul.mubr.msk.f32.vlgmr.msra.gmra.mrb[0].mxu0 %vm521_vm3, %v9343_v15  ;;  %v12812_v15 = vld [vmem:[#allocation2_spill] sm:$0xff] }
 0x19b   : > { %8177 = vmatpush3.msk.msra.mxu0 %vm582_vm0, %v6855_v23  ;;  %8131 = vmatprep.mubr.msk.f32.mxu0 %vm521_vm3, %v9378_v35  ;;  %v12814_v35 = vld [vmem:[#allocation4_spill] sm:$0xff] }
 0x19c   : > { %8226 = vmatprep.subr.msk.mxu0 %vm582_vm0, %v6889_v5 }
 0x19e   : > { %8132 = vmatmul.mubr.msk.f32.gmra.mrb[2].mxu0 %vm521_vm3, %v9398_v43  ;;  %v12815_v43 = vld [vmem:[#allocation5_spill] sm:$0xff] }
 0x19f   : > { %8134 = vmatprep.mubr.msk.f32.mxu0 %vm521_vm3, %v9406_v48  ;;  %v12816_v48 = vld [vmem:[#allocation6_spill] sm:$0xff] }
 0x1a2   : > { %8135 = vmatmul.mubr.msk.f32.gmra.mrb[4].mxu0 %vm521_vm3, %v9412_v51  ;;  %v12817_v51 = vld [vmem:[#allocation7_spill] sm:$0xff] }
 0x1a3   : > { %8137 = vmatprep.mubr.msk.f32.mxu0 %vm521_vm3, %v9430_v63  ;;  %v12818_v63 = vld [vmem:[#allocation8_spill] sm:$0xff] }
 0x1a6   : > { %8138 = vmatmul.mubr.msk.f32.gmra.mrb[6].mxu0 %vm521_vm3, %v9433_v2  ;;  %v12819_v2 = vld [vmem:[#allocation9_spill] sm:$0xff] }
 0x1a7   : > { %8140 = vmatprep.mubr.msk.f32.mxu0 %vm521_vm3, %v9454_v12  ;;  %v12821_v12 = vld [vmem:[#allocation11_spill] sm:$0xff] }
 0x1aa   : > { %8141 = vmatmul.mubr.msk.f32.gmra.mrb[8].mxu0 %vm521_vm3, %v9457_v19  ;;  %v12822_v19 = vld [vmem:[#allocation12_spill] sm:$0xff] }
 0x1ab   : > { %8143 = vmatprep.mubr.msk.f32.mxu0 %vm521_vm3, %v9478_v36  ;;  %v12823_v36 = vld [vmem:[#allocation13_spill] sm:$0xff] }
 0x1ae   : > { %8144 = vmatmul.mubr.msk.f32.gmra.mrb[10].mxu0 %vm521_vm3, %v9483_v41  ;;  %v12824_v41 = vld [vmem:[#allocation14_spill] sm:$0xff] }
 0x1af   : > { %8146 = vmatprep.mubr.msk.f32.mxu0 %vm521_vm3, %v9508_v4  ;;  %v12826_v4 = vld [vmem:[#allocation19_spill] sm:$0xff] }
 0x1b2   : > { %8147 = vmatmul.mubr.msk.f32.gmra.mrb[12].mxu0 %vm521_vm3, %v9505_v3  ;;  %v12825_v3 = vld [vmem:[#allocation17_spill] sm:$0xff] }
 0x1b3   : > { %8149 = vmatprep.mubr.msk.f32.mxu0 %vm521_vm3, %v9524_v18  ;;  %v12828_v18 = vld [vmem:[#allocation21_spill] sm:$0xff] }
 0x1b6   : > { %8150 = vmatmul.mubr.msk.f32.gmra.mrb[14].mxu0 %vm521_vm3, %v9521_v14  ;;  %v12827_v14 = vld [vmem:[#allocation20_spill] sm:$0xff] }
 0x1b7   : > { %8152 = vmatprep.mubr.msk.f32.mxu0 %vm521_vm3, %v9545_v47  ;;  %v12829_v47 = vld [vmem:[#allocation23_spill] sm:$0xff] }
 0x1ba   : > { %8153 = vmatmul.mubr.msk.f32.gmra.mrb[16].mxu0 %vm521_vm3, %v9550_v52  ;;  %v12831_v52 = vld [vmem:[#allocation25_spill] sm:$0xff] }
 0x1bb   : > { %8155 = vmatprep.mubr.msk.f32.mxu0 %vm521_vm3, %v9574_v27  ;;  %v12834_v27 = vld [vmem:[#allocation32_spill] sm:$0xff] }
 0x1be   : > { %8156 = vmatmul.mubr.msk.f32.gmra.mrb[18].mxu0 %vm521_vm3, %v9577_v33  ;;  %v12835_v33 = vld [vmem:[#allocation33_spill] sm:$0xff] }
 0x1bf   : > { %8158 = vmatprep.mubr.msk.f32.mxu0 %vm521_vm3, %v9601_v7  ;;  %v12837_v7 = vld [vmem:[#allocation35_spill] sm:$0xff] }
 0x1c2   : > { %8159 = vmatmul.mubr.msk.f32.gmra.mrb[20].mxu0 %vm521_vm3, %v9598_v45  ;;  %v12836_v45 = vld [vmem:[#allocation34_spill] sm:$0xff] }
 0x1c3   : > { %8161 = vmatprep.mubr.msk.f32.mxu0 %vm521_vm3, %v9622_v0  ;;  %v12839_v0 = vld [vmem:[#allocation38_spill] sm:$0xff] }
 0x1c6   : > { %8162 = vmatmul.mubr.msk.f32.gmra.mrb[22].mxu0 %vm521_vm3, %v9625_v8  ;;  %v12820_v8 = vld [vmem:[#allocation10_spill] sm:$0xff] }
 0x1c7   : > { %8164 = vmatprep.mubr.msk.f32.mxu0 %vm521_vm3, %v9646_v10  ;;  %v12833_v10 = vld [vmem:[#allocation31_spill] sm:$0xff] }
 0x1ca   : > { %8165 = vmatmul.mubr.msk.f32.gmra.mrb[24].mxu0 %vm521_vm3, %v9649_v21  ;;  %v12838_v21 = vld [vmem:[#allocation37_spill] sm:$0xff] }
 0x1cb   : > { %8167 = vmatprep.mubr.msk.f32.mxu0 %vm521_vm3, %v9671_v1 }
 0x1ce   : > { %8168 = vmatmul.mubr.msk.f32.gmra.mrb[26].mxu0 %vm521_vm3, %v9668_v13 }
 0x1cf   : > { %8170 = vmatprep.mubr.msk.f32.mxu0 %vm521_vm3, %v10053_v55 }
 0x1d2   : > { %8171 = vmatmul.mubr.msk.f32.gmra.mrb[28].mxu0 %vm521_vm3, %v10060_v30 }
 0x1d3   : > { %8173 = vmatprep.mubr.msk.f32.mxu0 %vm521_vm3, %v9671_v1  ;;  %v12841_v1 = vld [vmem:[#allocation40_spill] sm:$0xff] }
 0x1d6   : > { %8174 = vmatmul.mubr.msk.f32.gmra.mrb[30].mxu0 %vm521_vm3, %v9668_v13  ;;  %v12840_v13 = vld [vmem:[#allocation39_spill] sm:$0xff] }
 0x1d7   : > { %8178 = vmatprep.mubr.msk.f32.mxu0 %vm521_vm3, %v12812_v15 }
 0x1da   : > { %8179 = vmatmul.mubr.msk.f32.vlgmr.msra.gmra.mrb[0].mxu0 %vm521_vm3, %v12813_v16 }
 0x1db   : > { %8227 = vmatpush3.msk.msra.mxu0 %vm582_vm0, %v6889_v5  ;;  %8181 = vmatprep.mubr.msk.f32.mxu0 %vm521_vm3, %v12814_v35  ;;  %v10468_v5 = vld [vmem:[%s12534_s2] sm:$0xf] }
 0x1de   : > { %8182 = vmatmul.mubr.msk.f32.gmra.mrb[2].mxu0 %vm521_vm3, %v12815_v43 }
 0x1df   : > { %8184 = vmatprep.mubr.msk.f32.mxu0 %vm521_vm3, %v12816_v48 }
 0x1e2   : > { %8185 = vmatmul.mubr.msk.f32.gmra.mrb[4].mxu0 %vm521_vm3, %v12817_v51 }
 0x1e3   : > { %8187 = vmatprep.mubr.msk.f32.mxu0 %vm521_vm3, %v12818_v63 }
 0x1e6   : > { %8188 = vmatmul.mubr.msk.f32.gmra.mrb[6].mxu0 %vm521_vm3, %v12819_v2 }
 0x1e7   : > { %8190 = vmatprep.mubr.msk.f32.mxu0 %vm521_vm3, %v12820_v8 }
 0x1ea   : > { %8191 = vmatmul.mubr.msk.f32.gmra.mrb[8].mxu0 %vm521_vm3, %v12821_v12 }
 0x1eb   : > { %8193 = vmatprep.mubr.msk.f32.mxu0 %vm521_vm3, %v12822_v19 }
 0x1ee   : > { %8194 = vmatmul.mubr.msk.f32.gmra.mrb[10].mxu0 %vm521_vm3, %v12823_v36 }
 0x1ef   : > { %8196 = vmatprep.mubr.msk.f32.mxu0 %vm521_vm3, %v12824_v41 }
 0x1f2   : > { %8197 = vmatmul.mubr.msk.f32.gmra.mrb[12].mxu0 %vm521_vm3, %v12790_v42 }
 0x1f3   : > { %8199 = vmatprep.mubr.msk.f32.mxu0 %vm521_vm3, %v12791_v57 }
 0x1f6   : > { %8200 = vmatmul.mubr.msk.f32.gmra.mrb[14].mxu0 %vm521_vm3, %v12825_v3 }
 0x1f7   : > { %8202 = vmatprep.mubr.msk.f32.mxu0 %vm521_vm3, %v12793_v28  ;;  %v12830_v28 = vld [vmem:[#allocation24_spill] sm:$0xff] }
 0x1fa   : > { %8203 = vmatmul.mubr.msk.f32.gmra.mrb[16].mxu0 %vm521_vm3, %v12826_v4 }
 0x1fb   : > { %8205 = vmatprep.mubr.msk.f32.mxu0 %vm521_vm3, %v12827_v14 }
 0x1fe   : > { %8206 = vmatmul.mubr.msk.f32.gmra.mrb[18].mxu0 %vm521_vm3, %v12828_v18 }
 0x1ff   : > { %8208 = vmatprep.mubr.msk.f32.mxu0 %vm521_vm3, %v12797_v24 }
 0x202   : > { %8209 = vmatmul.mubr.msk.f32.gmra.mrb[20].mxu0 %vm521_vm3, %v9656_v29  ;;  %v12832_v29 = vld [vmem:[#allocation30_spill] sm:$0xff] }
 0x203   : > { %8211 = vmatprep.mubr.msk.f32.mxu0 %vm521_vm3, %v12829_v47 }
 0x206   : > { %8212 = vmatmul.mubr.msk.f32.gmra.mrb[22].mxu0 %vm521_vm3, %v9678_v31  ;;  %v12842_v31 = vld [vmem:[#allocation42_spill] sm:$0xff] }
 0x207   : > { %8214 = vmatprep.mubr.msk.f32.mxu0 %vm521_vm3, %v12830_v28 }
 0x20a   : > { %8215 = vmatmul.mubr.msk.f32.gmra.mrb[24].mxu0 %vm521_vm3, %v9694_v39 }
 0x20b   : > { %8217 = vmatprep.mubr.msk.f32.mxu0 %vm521_vm3, %v9698_v60 }
 0x20e   : > { %8218 = vmatmul.mubr.msk.f32.gmra.mrb[26].mxu0 %vm521_vm3, %v12831_v52 }
 0x20f   : > { %8220 = vmatprep.mubr.msk.f32.mxu0 %vm521_vm3, %v10131_v17 }
 0x212   : > { %8221 = vmatmul.mubr.msk.f32.gmra.mrb[28].mxu0 %vm521_vm3, %v10138_v62 }
 0x213   : > { %8223 = vmatprep.mubr.msk.f32.mxu0 %vm521_vm3, %v9698_v60 }
 0x216   : > { %8224 = vmatmul.mubr.msk.f32.gmra.mrb[30].mxu0 %vm521_vm3, %v12831_v52 }
 0x217   : > { %8228 = vmatprep.mubr.msk.f32.mxu0 %vm521_vm3, %v12800_v58 }
 0x21a   : > { %8229 = vmatmul.mubr.msk.f32.vlgmr.msra.gmra.mrb[0].mxu0 %vm521_vm3, %v9790_v20 }
 0x21b   : > { %8231 = vmatprep.mubr.msk.f32.mxu0 %vm521_vm3, %v12801_v56 }
 0x21e   : > { %8232 = vmatmul.mubr.msk.f32.gmra.mrb[2].mxu0 %vm521_vm3, %v9828_v40 }
 0x21f   : > { %8234 = vmatprep.mubr.msk.f32.mxu0 %vm521_vm3, %v12832_v29 }
 0x222   : > { %8235 = vmatmul.mubr.msk.f32.gmra.mrb[4].mxu0 %vm521_vm3, %v9841_v32 }
 0x223   : > { %8237 = vmatprep.mubr.msk.f32.mxu0 %vm521_vm3, %v12833_v10 }
 0x226   : > { %8238 = vmatmul.mubr.msk.f32.gmra.mrb[6].mxu0 %vm521_vm3, %v9854_v44 }
 0x227   : > { %8240 = vmatprep.mubr.msk.f32.mxu0 %vm521_vm3, %v12834_v27 }
 0x22a   : > { %8241 = vmatmul.mubr.msk.f32.gmra.mrb[8].mxu0 %vm521_vm3, %v9867_v59 }
 0x22b   : > { %8243 = vmatprep.mubr.msk.f32.mxu0 %vm521_vm3, %v12835_v33 }
 0x22e   : > { %8244 = vmatmul.mubr.msk.f32.gmra.mrb[10].mxu0 %vm521_vm3, %v9880_v11 }
 0x22f   : > { %8246 = vmatprep.mubr.msk.f32.mxu0 %vm521_vm3, %v12836_v45 }
 0x232   : > { %8247 = vmatmul.mubr.msk.f32.gmra.mrb[12].mxu0 %vm521_vm3, %v9893_v34 }
 0x233   : > { %8249 = vmatprep.mubr.msk.f32.mxu0 %vm521_vm3, %v12837_v7 }
 0x236   : > { %8250 = vmatmul.mubr.msk.f32.gmra.mrb[14].mxu0 %vm521_vm3, %v9906_v50 }
 0x237   : > { %8252 = vmatprep.mubr.msk.f32.mxu0 %vm521_vm3, %v12808_v25 }
 0x23a   : > { %8253 = vmatmul.mubr.msk.f32.gmra.mrb[16].mxu0 %vm521_vm3, %v12838_v21 }
 0x23b   : > { %8255 = vmatprep.mubr.msk.f32.mxu0 %vm521_vm3, %v12839_v0 }
 0x23e   : > { %8256 = vmatmul.mubr.msk.f32.gmra.mrb[18].mxu0 %vm521_vm3, %v9932_v46 }
 0x23f   : > { %8258 = vmatprep.mubr.msk.f32.mxu0 %vm521_vm3, %v12840_v13 }
 0x242   : > { %8259 = vmatmul.mubr.msk.f32.gmra.mrb[20].mxu0 %vm521_vm3, %v12841_v1 }
 0x243   : > { %8261 = vmatprep.mubr.msk.f32.mxu0 %vm521_vm3, %v12811_v49 }
 0x246   : > { %8262 = vmatmul.mubr.msk.f32.gmra.mrb[22].mxu0 %vm521_vm3, %v9958_v61 }
 0x247   : > { %8264 = vmatprep.mubr.msk.f32.mxu0 %vm521_vm3, %v12842_v31 }
 0x24a   : > { %8265 = vmatmul.mubr.msk.f32.gmra.mrb[24].mxu0 %vm521_vm3, %v9971_v26 }
 0x24b   : > { %8267 = vmatprep.mubr.msk.f32.mxu0 %vm521_vm3, %v9975_v53 }
 0x24e   : > { %8268 = vmatmul.mubr.msk.f32.gmra.mrb[26].mxu0 %vm521_vm3, %v9982_v54 }
 0x24f   : > { %8270 = vmatprep.mubr.msk.f32.mxu0 %vm521_vm3, %v10208_v38 }
 0x252   : > { %8271 = vmatmul.mubr.msk.f32.gmra.mrb[28].mxu0 %vm521_vm3, %v10215_v9 }
 0x253   : > { %8273 = vmatprep.mubr.msk.f32.mxu0 %vm521_vm3, %v9975_v53 }
 0x256   : > { %8274 = vmatmul.mubr.msk.f32.gmra.mrb[30].mxu0 %vm521_vm3, %v9982_v54  ;;  %v6923_v54 = vld [vmem:[%s12534_s2 + $0x4] sm:$0xf] }
 0x257   : > { %8276 = vmatprep.subr.msk.mxu1 %vm582_vm0, %v6923_v54 }
 0x258   : > { %8277 = vmatpush3.msk.msra.mxu1 %vm582_vm0, %v6923_v54 }
 0x259   : > { %8326 = vmatprep.subr.msk.mxu1 %vm582_vm0, %v10468_v5 }
 0x2ed   : > { %v10417_v62 = vpop.f32.mrb[0].mxu0 }
 0x2ee   : > { %v3094_v39 = vsel %vm521_vm3, %v10417_v62, 0.0  ;;  %v3163_v60 = vmul.f32 %v10417_v62, %v10417_v62  ;;  %v10423_v58 = vpop.f32.mrb[1].mxu0 }
 0x2ef   : > { %v3093_v20 = vsel %vm521_vm3, %v10423_v58, 0.0  ;;  %v3162_v40 = vmul.f32 %v10423_v58, %v10423_v58 }
 0x2f0   : > { %v3195_v32 = vsel %vm521_vm3, %v3163_v60, 0.0  ;;  %v3095_v44 = vadd.f32 %v3094_v39, %v3093_v20 }
 0x2f1   : > { %v3194_v59 = vsel %vm521_vm3, %v3162_v40, 0.0  ;;  %v10431_v11 = vpop.f32.mrb[2].mxu0 }
 0x2f2   : > { %v3196_v34 = vadd.f32 %v3195_v32, %v3194_v59  ;;  %v10433_v50 = vpop.f32.mrb[3].mxu0  ;;  %v3165_v6 = vmul.f32 %v10431_v11, %v10431_v11  ;;  %v3098_v26 = vsel %vm521_vm3, %v10431_v11, 0.0 }
 0x2f3   : > { %v3096_v46 = vsel %vm521_vm3, %v10433_v50, 0.0  ;;  %v3164_v22 = vmul.f32 %v10433_v50, %v10433_v50 }
 0x2f4   : > { %v3097_v61 = vadd.f32 %v3096_v46, %v3095_v44  ;;  %v3199_v42 = vsel %vm521_vm3, %v3165_v6, 0.0 }
 0x2f5   : > { %v3197_v9 = vsel %vm521_vm3, %v3164_v22, 0.0  ;;  %v10444_v53 = vpop.f32.mrb[4].mxu0 }
 0x2f6   : > { %v3198_v55 = vadd.f32 %v3197_v9, %v3196_v34  ;;  %v10449_v30 = vpop.f32.mrb[5].mxu0  ;;  %v3099_v24 = vadd.f32 %v3098_v26, %v3097_v61  ;;  %v3167_v57 = vmul.f32 %v10444_v53, %v10444_v53  ;;  %v3102_v49 = vsel %vm521_vm3, %v10444_v53, 0.0 }
 0x2f7   : > { %v3100_v17 = vsel %vm521_vm3, %v10449_v30, 0.0  ;;  %v3166_v23 = vmul.f32 %v10449_v30, %v10449_v30 }
 0x2f8   : > { %v3101_v56 = vadd.f32 %v3100_v17, %v3099_v24  ;;  %v3200_v38 = vadd.f32 %v3199_v42, %v3198_v55  ;;  %v3203_v43 = vsel %vm521_vm3, %v3167_v57, 0.0 }
 0x2f9   : > { %v3201_v25 = vsel %vm521_vm3, %v3166_v23, 0.0  ;;  %v10463_v37 = vpop.f32.mrb[6].mxu0 }
 0x2fa   : > { %v3202_v15 = vadd.f32 %v3201_v25, %v3200_v38  ;;  %v10470_v16 = vpop.f32.mrb[7].mxu0  ;;  %v3103_v35 = vadd.f32 %v3102_v49, %v3101_v56  ;;  %v3169_v48 = vmul.f32 %v10463_v37, %v10463_v37  ;;  %v3106_v12 = vsel %vm521_vm3, %v10463_v37, 0.0 }
 0x2fb   : > { %v3104_v51 = vsel %vm521_vm3, %v10470_v16, 0.0  ;;  %v3168_v63 = vmul.f32 %v10470_v16, %v10470_v16 }
 0x2fc   : > { %v3105_v2 = vadd.f32 %v3104_v51, %v3103_v35  ;;  %v3204_v8 = vadd.f32 %v3203_v43, %v3202_v15  ;;  %v3207_v14 = vsel %vm521_vm3, %v3169_v48, 0.0 }
 0x2fd   : > { %v3205_v19 = vsel %vm521_vm3, %v3168_v63, 0.0  ;;  %v10484_v36 = vpop.f32.mrb[8].mxu0 }
 0x2fe   : > { %v3206_v41 = vadd.f32 %v3205_v19, %v3204_v8  ;;  %v10486_v3 = vpop.f32.mrb[9].mxu0  ;;  %v3107_v4 = vadd.f32 %v3106_v12, %v3105_v2  ;;  %v3171_v18 = vmul.f32 %v10484_v36, %v10484_v36  ;;  %v3110_v10 = vsel %vm521_vm3, %v10484_v36, 0.0 }
 0x2ff   : > { %v3108_v47 = vsel %vm521_vm3, %v10486_v3, 0.0  ;;  %v3170_v28 = vmul.f32 %v10486_v3, %v10486_v3 }
 0x300   : > { %v3109_v52 = vadd.f32 %v3108_v47, %v3107_v4  ;;  %v3208_v29 = vadd.f32 %v3207_v14, %v3206_v41  ;;  %v3211_v0 = vsel %vm521_vm3, %v3171_v18, 0.0 }
 0x301   : > { %v3209_v27 = vsel %vm521_vm3, %v3170_v28, 0.0  ;;  %v10498_v33 = vpop.f32.mrb[10].mxu0 }
 0x302   : > { %v3210_v45 = vadd.f32 %v3209_v27, %v3208_v29  ;;  %v10500_v7 = vpop.f32.mrb[11].mxu0  ;;  %v3111_v21 = vadd.f32 %v3110_v10, %v3109_v52  ;;  %v3173_v13 = vmul.f32 %v10498_v33, %v10498_v33  ;;  %v3114_v20 = vsel %vm521_vm3, %v10498_v33, 0.0 }
 0x303   : > { %v3112_v1 = vsel %vm521_vm3, %v10500_v7, 0.0  ;;  %v3172_v31 = vmul.f32 %v10500_v7, %v10500_v7 }
 0x304   : > { %v3113_v39 = vadd.f32 %v3112_v1, %v3111_v21  ;;  %v3212_v60 = vadd.f32 %v3211_v0, %v3210_v45  ;;  %v3215_v6 = vsel %vm521_vm3, %v3173_v13, 0.0 }
 0x305   : > { %v3213_v40 = vsel %vm521_vm3, %v3172_v31, 0.0  ;;  %v10512_v32 = vpop.f32.mrb[12].mxu0 }
 0x306   : > { %v3214_v44 = vadd.f32 %v3213_v40, %v3212_v60  ;;  %v10514_v59 = vpop.f32.mrb[13].mxu0  ;;  %v3115_v34 = vadd.f32 %v3114_v20, %v3113_v39  ;;  %v3175_v46 = vmul.f32 %v10512_v32, %v10512_v32  ;;  %v3118_v54 = vsel %vm521_vm3, %v10512_v32, 0.0 }
 0x307   : > { %v3116_v22 = vsel %vm521_vm3, %v10514_v59, 0.0  ;;  %v3174_v61 = vmul.f32 %v10514_v59, %v10514_v59 }
 0x308   : > { %v3117_v26 = vadd.f32 %v3116_v22, %v3115_v34  ;;  %v3216_v9 = vadd.f32 %v3215_v6, %v3214_v44  ;;  %v3219_v23 = vsel %vm521_vm3, %v3175_v46, 0.0 }
 0x309   : > { %v3217_v55 = vsel %vm521_vm3, %v3174_v61, 0.0  ;;  %v10526_v24 = vpop.f32.mrb[14].mxu0 }
 0x30a   : > { %v3218_v42 = vadd.f32 %v3217_v55, %v3216_v9  ;;  %v10528_v57 = vpop.f32.mrb[15].mxu0  ;;  %v3119_v17 = vadd.f32 %v3118_v54, %v3117_v26  ;;  %v3177_v56 = vmul.f32 %v10526_v24, %v10526_v24  ;;  %v3122_v35 = vsel %vm521_vm3, %v10526_v24, 0.0 }
 0x30b   : > { %v3120_v38 = vsel %vm521_vm3, %v10528_v57, 0.0  ;;  %v3176_v49 = vmul.f32 %v10528_v57, %v10528_v57 }
 0x30c   : > { %v3121_v25 = vadd.f32 %v3120_v38, %v3119_v17  ;;  %v3220_v15 = vadd.f32 %v3219_v23, %v3218_v42  ;;  %v3223_v8 = vsel %vm521_vm3, %v3177_v56, 0.0 }
 0x30d   : > { %v3221_v43 = vsel %vm521_vm3, %v3176_v49, 0.0  ;;  %v10540_v48 = vpop.f32.mrb[16].mxu0 }
 0x30e   : > { %v3222_v51 = vadd.f32 %v3221_v43, %v3220_v15  ;;  %v10542_v63 = vpop.f32.mrb[17].mxu0  ;;  %v3123_v2 = vadd.f32 %v3122_v35, %v3121_v25  ;;  %v3179_v12 = vmul.f32 %v10540_v48, %v10540_v48  ;;  %v3126_v18 = vsel %vm521_vm3, %v10540_v48, 0.0 }
 0x30f   : > { %v3124_v19 = vsel %vm521_vm3, %v10542_v63, 0.0  ;;  %v3178_v41 = vmul.f32 %v10542_v63, %v10542_v63 }
 0x310   : > { %v3125_v4 = vadd.f32 %v3124_v19, %v3123_v2  ;;  %v3224_v14 = vadd.f32 %v3223_v8, %v3222_v51  ;;  %v3227_v27 = vsel %vm521_vm3, %v3179_v12, 0.0 }
 0x311   : > { %v3225_v47 = vsel %vm521_vm3, %v3178_v41, 0.0  ;;  %v10554_v28 = vpop.f32.mrb[18].mxu0 }
 0x312   : > { %v3226_v52 = vadd.f32 %v3225_v47, %v3224_v14  ;;  %v10556_v29 = vpop.f32.mrb[19].mxu0  ;;  %v3127_v10 = vadd.f32 %v3126_v18, %v3125_v4  ;;  %v3181_v45 = vmul.f32 %v10554_v28, %v10554_v28  ;;  %v3130_v31 = vsel %vm521_vm3, %v10554_v28, 0.0 }
 0x313   : > { %v3128_v21 = vsel %vm521_vm3, %v10556_v29, 0.0  ;;  %v3180_v0 = vmul.f32 %v10556_v29, %v10556_v29 }
 0x314   : > { %v3129_v13 = vadd.f32 %v3128_v21, %v3127_v10  ;;  %v3228_v1 = vadd.f32 %v3227_v27, %v3226_v52  ;;  %v3231_v34 = vsel %vm521_vm3, %v3181_v45, 0.0 }
 0x315   : > { %v3229_v39 = vsel %vm521_vm3, %v3180_v0, 0.0  ;;  %v10568_v60 = vpop.f32.mrb[20].mxu0 }
 0x316   : > { %v3230_v20 = vadd.f32 %v3229_v39, %v3228_v1  ;;  %v10570_v40 = vpop.f32.mrb[21].mxu0  ;;  %v3131_v44 = vadd.f32 %v3130_v31, %v3129_v13  ;;  %v3183_v6 = vmul.f32 %v10568_v60, %v10568_v60  ;;  %v3134_v9 = vsel %vm521_vm3, %v10568_v60, 0.0 }
 0x317   : > { %v3132_v46 = vsel %vm521_vm3, %v10570_v40, 0.0  ;;  %v3182_v22 = vmul.f32 %v10570_v40, %v10570_v40 }
 0x318   : > { %v3133_v61 = vadd.f32 %v3132_v46, %v3131_v44  ;;  %v3232_v26 = vadd.f32 %v3231_v34, %v3230_v20  ;;  %v3235_v56 = vsel %vm521_vm3, %v3183_v6, 0.0 }
 0x319   : > { %v3233_v54 = vsel %vm521_vm3, %v3182_v22, 0.0  ;;  %v10582_v55 = vpop.f32.mrb[22].mxu0 }
 0x31a   : > { %v3234_v42 = vadd.f32 %v3233_v54, %v3232_v26  ;;  %v10584_v17 = vpop.f32.mrb[23].mxu0  ;;  %v3135_v23 = vadd.f32 %v3134_v9, %v3133_v61  ;;  %v3185_v38 = vmul.f32 %v10582_v55, %v10582_v55  ;;  %v3138_v43 = vsel %vm521_vm3, %v10582_v55, 0.0 }
 0x31b   : > { %v3136_v49 = vsel %vm521_vm3, %v10584_v17, 0.0  ;;  %v3184_v25 = vmul.f32 %v10584_v17, %v10584_v17 }
 0x31c   : > { %v3137_v15 = vadd.f32 %v3136_v49, %v3135_v23  ;;  %v3236_v35 = vadd.f32 %v3235_v56, %v3234_v42  ;;  %v3239_v41 = vsel %vm521_vm3, %v3185_v38, 0.0 }
 0x31d   : > { %v3237_v51 = vsel %vm521_vm3, %v3184_v25, 0.0  ;;  %v10596_v2 = vpop.f32.mrb[24].mxu0 }
 0x31e   : > { %v3238_v8 = vadd.f32 %v3237_v51, %v3236_v35  ;;  %v10598_v12 = vpop.f32.mrb[25].mxu0  ;;  %v3139_v19 = vadd.f32 %v3138_v43, %v3137_v15  ;;  %v3187_v4 = vmul.f32 %v10596_v2, %v10596_v2  ;;  %v3142_v10 = vsel %vm521_vm3, %v10596_v2, 0.0 }
 0x31f   : > { %v3140_v14 = vsel %vm521_vm3, %v10598_v12, 0.0  ;;  %v3186_v18 = vmul.f32 %v10598_v12, %v10598_v12 }
 0x320   : > { %v3141_v47 = vadd.f32 %v3140_v14, %v3139_v19  ;;  %v3240_v52 = vadd.f32 %v3239_v41, %v3238_v8  ;;  %v3243_v1 = vsel %vm521_vm3, %v3187_v4, 0.0 }
 0x321   : > { %v3241_v27 = vsel %vm521_vm3, %v3186_v18, 0.0  ;;  %v10610_v45 = vpop.f32.mrb[26].mxu0 }
 0x322   : > { %v3242_v21 = vadd.f32 %v3241_v27, %v3240_v52  ;;  %v10612_v0 = vpop.f32.mrb[27].mxu0  ;;  %v3143_v13 = vadd.f32 %v3142_v10, %v3141_v47  ;;  %v3189_v31 = vmul.f32 %v10610_v45, %v10610_v45  ;;  %v3146_v6 = vsel %vm521_vm3, %v10610_v45, 0.0 }
 0x323   : > { %v3144_v39 = vsel %vm521_vm3, %v10612_v0, 0.0  ;;  %v3188_v20 = vmul.f32 %v10612_v0, %v10612_v0 }
 0x324   : > { %v3145_v44 = vadd.f32 %v3144_v39, %v3143_v13  ;;  %v3244_v34 = vadd.f32 %v3243_v1, %v3242_v21  ;;  %v3247_v54 = vsel %vm521_vm3, %v3189_v31, 0.0 }
 0x325   : > { %v3245_v46 = vsel %vm521_vm3, %v3188_v20, 0.0  ;;  %v10624_v22 = vpop.f32.mrb[28].mxu0 }
 0x326   : > { %v3246_v61 = vadd.f32 %v3245_v46, %v3244_v34  ;;  %v10626_v26 = vpop.f32.mrb[29].mxu0  ;;  %v3147_v9 = vadd.f32 %v3146_v6, %v3145_v44  ;;  %v3191_v42 = vmul.f32 %v10624_v22, %v10624_v22  ;;  %v3150_v25 = vsel %vm521_vm3, %v10624_v22, 0.0 }
 0x327   : > { %v3148_v23 = vsel %vm521_vm3, %v10626_v26, 0.0  ;;  %v3190_v56 = vmul.f32 %v10626_v26, %v10626_v26 }
 0x328   : > { %v3149_v38 = vadd.f32 %v3148_v23, %v3147_v9  ;;  %v3248_v49 = vadd.f32 %v3247_v54, %v3246_v61  ;;  %v3251_v19 = vsel %vm521_vm3, %v3191_v42, 0.0 }
 0x329   : > { %v3249_v15 = vsel %vm521_vm3, %v3190_v56, 0.0  ;;  %v10638_v35 = vpop.f32.mrb[30].mxu0 }
 0x32a   : > { %v3250_v43 = vadd.f32 %v3249_v15, %v3248_v49  ;;  %v10640_v51 = vpop.f32.mrb[31].mxu0  ;;  %v3151_v8 = vadd.f32 %v3150_v25, %v3149_v38  ;;  %v3193_v41 = vmul.f32 %v10638_v35, %v10638_v35  ;;  %v3154_v52 = vsel %vm521_vm3, %v10638_v35, 0.0 }
 0x32b   : > { %v3152_v4 = vsel %vm521_vm3, %v10640_v51, 0.0  ;;  %v3192_v14 = vmul.f32 %v10640_v51, %v10640_v51 }
 0x32c   : > { %v3153_v18 = vadd.f32 %v3152_v4, %v3151_v8  ;;  %v3252_v47 = vadd.f32 %v3251_v19, %v3250_v43  ;;  %v3255_v13 = vsel %vm521_vm3, %v3193_v41, 0.0 }
 0x32d   : > { %v3253_v10 = vsel %vm521_vm3, %v3192_v14, 0.0 }
 0x32e   : > { %v3155_v27 = vadd.f32 %v3154_v52, %v3153_v18  ;;  %v3254_v21 = vadd.f32 %v3253_v10, %v3252_v47 }
 0x330   : > { %v3156_v1 = vrot.slane %v3155_v27, 4  ;;  %v3256_v31 = vadd.f32 %v3255_v13, %v3254_v21 }
 0x332   : > { %v3157_v39 = vadd.f32 %v3156_v1, %v3155_v27  ;;  %v3257_v20 = vrot.slane %v3256_v31, 4 }
 0x334   : > { %v3158_v44 = vrot.slane %v3157_v39, 2  ;;  %v3258_v34 = vadd.f32 %v3257_v20, %v3256_v31 }
 0x336   : > { %v3159_v6 = vadd.f32 %v3158_v44, %v3157_v39  ;;  %v3259_v46 = vrot.slane %v3258_v34, 2 }
 0x338   : > { %v3160_v61 = vrot.slane %v3159_v6, 1  ;;  %v3260_v9 = vadd.f32 %v3259_v46, %v3258_v34 }
 0x33a   : > { %v3161_v54 = vadd.f32 %v3160_v61, %v3159_v6  ;;  %v3261_v42 = vrot.slane %v3260_v9, 1 }
 0x33c   : > { %v3262_v23 = vadd.f32 %v3261_v42, %v3260_v9  ;;  %v10653_v56 = vmul.f32 0.00390625, %v3161_v54 }
 0x33e   : > { %v3264_v38 = vmul.f32 0.00390625, %v3262_v23  ;;  %v3265_v49 = vmul.f32 %v10653_v56, %v10653_v56  ;;  %v3297_v25 = vsub.f32 %v10640_v51, %v10653_v56  ;;  %v3267_v15 = vsub.f32 %v10423_v58, %v10653_v56 }
 0x33f   : > { %v3268_v43 = vsub.f32 %v10417_v62, %v10653_v56  ;;  %v3269_v8 = vsub.f32 %v10433_v50, %v10653_v56  ;;  %v3270_v19 = vsub.f32 %v10431_v11, %v10653_v56  ;;  %v3271_v41 = vsub.f32 %v10449_v30, %v10653_v56 }
 0x340   : > { %v3266_v4 = vsub.f32 %v3264_v38, %v3265_v49  ;;  %v3272_v14 = vsub.f32 %v10444_v53, %v10653_v56  ;;  %v3273_v51 = vsub.f32 %v10470_v16, %v10653_v56  ;;  %v3274_v58 = vsub.f32 %v10463_v37, %v10653_v56 }
 0x341   : > { %v3275_v62 = vsub.f32 %v10486_v3, %v10653_v56  ;;  %v3276_v50 = vsub.f32 %v10484_v36, %v10653_v56  ;;  %v3277_v11 = vsub.f32 %v10500_v7, %v10653_v56  ;;  %v3278_v30 = vsub.f32 %v10498_v33, %v10653_v56 }
 0x342   : > { %v3299_v18 = vadd.f32 1e-05, %v3266_v4  ;;  %v3279_v53 = vsub.f32 %v10514_v59, %v10653_v56  ;;  %v3280_v16 = vsub.f32 %v10512_v32, %v10653_v56  ;;  %v3281_v37 = vsub.f32 %v10528_v57, %v10653_v56 }
 0x343   : > { %v3282_v3 = vsub.f32 %v10526_v24, %v10653_v56  ;;  %v3283_v36 = vsub.f32 %v10542_v63, %v10653_v56  ;;  %v3284_v7 = vsub.f32 %v10540_v48, %v10653_v56  ;;  %v3285_v33 = vsub.f32 %v10556_v29, %v10653_v56 }
 0x344   : > { %9246 = vrsqrt.f32 %v3299_v18  ;;  %v3286_v59 = vsub.f32 %v10554_v28, %v10653_v56  ;;  %v3287_v32 = vsub.f32 %v10570_v40, %v10653_v56  ;;  %v3288_v57 = vsub.f32 %v10568_v60, %v10653_v56 }
 0x345   : > { %v3289_v24 = vsub.f32 %v10584_v17, %v10653_v56  ;;  %v3290_v63 = vsub.f32 %v10582_v55, %v10653_v56  ;;  %v3291_v48 = vsub.f32 %v10598_v12, %v10653_v56  ;;  %v3292_v29 = vsub.f32 %v10596_v2, %v10653_v56 }
 0x346   : > { %v3293_v28 = vsub.f32 %v10612_v0, %v10653_v56  ;;  %v3294_v40 = vsub.f32 %v10610_v45, %v10653_v56  ;;  %v3295_v60 = vsub.f32 %v10626_v26, %v10653_v56  ;;  %v3296_v17 = vsub.f32 %v10624_v22, %v10653_v56 }
 0x347   : > { %v3298_v55 = vsub.f32 %v10638_v35, %v10653_v56 }
 0x34e   : > { %v9247_v47 = vpop.eup %9246 }
 0x34f   : > { %v10721_v12 = vmul.f32 %v9247_v47, %v3297_v25  ;;  %v10723_v52 = vmul.f32 %v9247_v47, %v3267_v15  ;;  %v10725_v2 = vmul.f32 %v9247_v47, %v3268_v43  ;;  %v10727_v0 = vmul.f32 %v9247_v47, %v3269_v8 }
 0x350   : > { %v10729_v10 = vmul.f32 %v9247_v47, %v3270_v19  ;;  %v10731_v45 = vmul.f32 %v9247_v47, %v3271_v41  ;;  %v10733_v26 = vmul.f32 %v9247_v47, %v3272_v14  ;;  %v10735_v27 = vmul.f32 %v9247_v47, %v3273_v51 }
 0x351   : > { %12843 = vst [vmem:[#allocation15_spill] sm:$0xff] %v10721_v12  ;;  %v10737_v22 = vmul.f32 %v9247_v47, %v3274_v58  ;;  %v10739_v35 = vmul.f32 %v9247_v47, %v3275_v62  ;;  %v10741_v21 = vmul.f32 %v9247_v47, %v3276_v50  ;;  %v10743_v13 = vmul.f32 %v9247_v47, %v3277_v11 }
 0x352   : > { %v10745_v1 = vmul.f32 %v9247_v47, %v3278_v30  ;;  %v10747_v31 = vmul.f32 %v9247_v47, %v3279_v53  ;;  %v10749_v39 = vmul.f32 %v9247_v47, %v3280_v16  ;;  %v10751_v20 = vmul.f32 %v9247_v47, %v3281_v37 }
 0x353   : > { %v10753_v44 = vmul.f32 %v9247_v47, %v3282_v3  ;;  %v10755_v34 = vmul.f32 %v9247_v47, %v3283_v36  ;;  %v10757_v6 = vmul.f32 %v9247_v47, %v3284_v7  ;;  %v10759_v46 = vmul.f32 %v9247_v47, %v3285_v33 }
 0x354   : > { %v10761_v61 = vmul.f32 %v9247_v47, %v3286_v59  ;;  %v10763_v9 = vmul.f32 %v9247_v47, %v3287_v32  ;;  %v10765_v54 = vmul.f32 %v9247_v47, %v3288_v57  ;;  %v10767_v42 = vmul.f32 %v9247_v47, %v3289_v24 }
 0x355   : > { %v10769_v23 = vmul.f32 %v9247_v47, %v3290_v63  ;;  %v10771_v56 = vmul.f32 %v9247_v47, %v3291_v48  ;;  %v10773_v38 = vmul.f32 %v9247_v47, %v3292_v29  ;;  %v10775_v49 = vmul.f32 %v9247_v47, %v3293_v28 }
 0x356   : > { %12844 = vst [vmem:[#allocation16_spill] sm:$0xff] %v10763_v9  ;;  %12845 = vst [vmem:[#allocation18_spill] sm:$0xff] %v10765_v54  ;;  %v10777_v25 = vmul.f32 %v9247_v47, %v3294_v40  ;;  %v10779_v15 = vmul.f32 %v9247_v47, %v3295_v60  ;;  %v10781_v43 = vmul.f32 %v9247_v47, %v3296_v17  ;;  %v12611_v19 = vmax.f32 %v10727_v0, 0.0 }
 0x357   : > { %12846 = vst [vmem:[#allocation22_spill] sm:$0xff] %v10767_v42  ;;  %12847 = vst [vmem:[#allocation27_spill] sm:$0xff] %v10769_v23  ;;  %v10783_v8 = vmul.f32 %v9247_v47, %v3298_v55  ;;  %v12610_v41 = vmax.f32 %v10729_v10, 0.0  ;;  %v12612_v4 = vmax.f32 %v10731_v45, 0.0  ;;  %v12614_v14 = vmax.f32 %v10733_v26, 0.0 }
 0x358   : > { %12848 = vst [vmem:[#allocation28_spill] sm:$0xff] %v10771_v56  ;;  %12849 = vst [vmem:[#allocation26_spill] sm:$0xff] %v10773_v38  ;;  %v12613_v51 = vmax.f32 %v10735_v27, 0.0  ;;  %v12615_v58 = vmax.f32 %v10737_v22, 0.0  ;;  %v12616_v62 = vmax.f32 %v10739_v35, 0.0  ;;  %v12617_v50 = vmax.f32 %v10741_v21, 0.0 }
 0x359   : > { %12850 = vst [vmem:[#allocation29_spill] sm:$0xff] %v10775_v49  ;;  %12851 = vst [vmem:[#allocation36_spill] sm:$0xff] %v10777_v25  ;;  %v12618_v11 = vmax.f32 %v10743_v13, 0.0  ;;  %v12619_v30 = vmax.f32 %v10745_v1, 0.0  ;;  %v12620_v18 = vmax.f32 %v10747_v31, 0.0  ;;  %v12621_v53 = vmax.f32 %v10749_v39, 0.0 }
 0x35a   : > { %12852 = vst [vmem:[#allocation41_spill] sm:$0xff] %v10779_v15  ;;  %12853 = vst [vmem:[#allocation2_spill] sm:$0xff] %v10781_v43  ;;  %v12622_v16 = vmax.f32 %v10751_v20, 0.0  ;;  %v12623_v37 = vmax.f32 %v10753_v44, 0.0  ;;  %v12624_v3 = vmax.f32 %v10755_v34, 0.0  ;;  %v12625_v36 = vmax.f32 %v10757_v6, 0.0 }
 0x35b   : > { %12854 = vst [vmem:[#allocation3_spill] sm:$0xff] %v10783_v8  ;;  %v12626_v7 = vmax.f32 %v10759_v46, 0.0  ;;  %v12627_v33 = vmax.f32 %v10761_v61, 0.0  ;;  %v12629_v59 = vmax.f32 %v10763_v9, 0.0  ;;  %v12634_v32 = vmax.f32 %v10765_v54, 0.0 }
 0x35c   : > { %v3429_v60 = vrot.slane %v12611_v19, 7  ;;  %v3430_v17 = vrot.slane %v12610_v41, 7  ;;  %v10819_v47 = vrot.slane %v12612_v4, 7  ;;  %v10823_v48 = vrot.slane %v12614_v14, 7 }
 0x35d   : > { %v10827_v28 = vrot.slane %v12613_v51, 7  ;;  %v10834_v41 = vrot.slane %v12615_v58, 7  ;;  %v10838_v19 = vrot.slane %v12616_v62, 7  ;;  %v10842_v4 = vrot.slane %v12617_v50, 7 }
 0x35e   : > { %v10830_v40 = vsel %vm267_vm1, %v3429_v60, %v3430_v17  ;;  %v10847_v51 = vsel %vm267_vm1, %v10819_v47, %v10823_v48  ;;  %v10851_v14 = vrot.slane %v12618_v11, 7  ;;  %v10855_v58 = vrot.slane %v12619_v30, 7 }
 0x35f   : > { %12855 = vst [vmem:[#allocation4_spill] sm:$0xff] %v10830_v40  ;;  %v10859_v62 = vrot.slane %v12620_v18, 7  ;;  %v10864_v50 = vsel %vm267_vm1, %v10827_v28, %v10834_v41  ;;  %v10869_v55 = vsel %vm267_vm1, %v10838_v19, %v10842_v4  ;;  %v10873_v11 = vrot.slane %v12621_v53, 7 }
 0x360   : > { %v10877_v30 = vrot.slane %v12622_v16, 7  ;;  %v10882_v18 = vsel %vm267_vm1, %v10851_v14, %v10855_v58  ;;  %v10886_v29 = vrot.slane %v12623_v37, 7  ;;  %v10890_v63 = vrot.slane %v12624_v3, 7 }
 0x361   : > { %v10894_v53 = vrot.slane %v12625_v36, 7  ;;  %v10899_v16 = vsel %vm267_vm1, %v10859_v62, %v10873_v11  ;;  %v10903_v24 = vrot.slane %v12626_v7, 7  ;;  %v10907_v37 = vrot.slane %v12627_v33, 7 }
 0x362   : > { %v10911_v3 = vrot.slane %v12629_v59, 7  ;;  %v10916_v36 = vsel %vm267_vm1, %v10877_v30, %v10886_v29  ;;  %v10925_v7 = vrot.slane %v12634_v32, 7  ;;  %v12859_v33 = vmax.f32 %v10767_v42, 0.0 }
 0x363   : > { %12856 = vst [vmem:[#allocation5_spill] sm:$0xff] %v10894_v53  ;;  %12857 = vst [vmem:[#allocation6_spill] sm:$0xff] %v10907_v37  ;;  %v10921_v57 = vsel %vm267_vm1, %v10890_v63, %v10894_v53  ;;  %v10934_v59 = vsel %vm267_vm1, %v10903_v24, %v10907_v37  ;;  %v12860_v12 = vmax.f32 %v10769_v23, 0.0  ;;  %v12862_v53 = vmax.f32 %v10771_v56, 0.0 }
 0x364   : > { %12858 = vst [vmem:[#allocation7_spill] sm:$0xff] %v10921_v57  ;;  %v10929_v8 = vrot.slane %v12859_v33, 7  ;;  %v12864_v32 = vmax.f32 %v10773_v38, 0.0  ;;  %v10951_v33 = vsel %vm267_vm1, %v10911_v3, %v10925_v7  ;;  %v12866_v42 = vmax.f32 %v10775_v49, 0.0 }
 0x365   : > { %v10938_v9 = vrot.slane %v12860_v12, 7  ;;  %v10942_v57 = vrot.slane %v12862_v53, 7  ;;  %v12867_v12 = vmax.f32 %v10777_v25, 0.0  ;;  %v12869_v53 = vmax.f32 %v10779_v15, 0.0 }
 0x366   : > { %v10946_v54 = vrot.slane %v12864_v32, 7  ;;  %v10955_v37 = vrot.slane %v12866_v42, 7  ;;  %v3333_v32 = vmax.f32 %v10723_v52, 0.0  ;;  %v12871_v25 = vmax.f32 %v10781_v43, 0.0 }
 0x367   : > { %12861 = vst [vmem:[#allocation8_spill] sm:$0xff] %v10938_v9  ;;  %12863 = vst [vmem:[#allocation9_spill] sm:$0xff] %v10942_v57  ;;  %v10959_v23 = vrot.slane %v12867_v12, 7  ;;  %v10963_v56 = vrot.slane %v12869_v53, 7  ;;  %v10969_v38 = vsel %vm267_vm1, %v10929_v8, %v10938_v9  ;;  %v3334_v15 = vmax.f32 %v10725_v2, 0.0 }
 0x368   : > { %12865 = vst [vmem:[#allocation10_spill] sm:$0xff] %v10946_v54  ;;  %v10974_v42 = vsel %vm267_vm1, %v10942_v57, %v10946_v54  ;;  %v10978_v12 = vrot.slane %v12871_v25, 7  ;;  %v12873_v53 = vmax.f32 %v10727_v0, 0.0  ;;  %v3382_v54 = vrot.slane %v3333_v32, 1 }
 0x369   : > { %12868 = vst [vmem:[#allocation11_spill] sm:$0xff] %v10959_v23  ;;  %12870 = vst [vmem:[#allocation12_spill] sm:$0xff] %v10974_v42  ;;  %v10986_v52 = vsel %vm267_vm1, %v10955_v37, %v10959_v23  ;;  %v3432_v42 = vrot.slane %v3333_v32, 7  ;;  %v3433_v43 = vrot.slane %v3334_v15, 7  ;;  %v12875_v25 = vmax.f32 %v10729_v10, 0.0 }
 0x36a   : > { %12872 = vst [vmem:[#allocation13_spill] sm:$0xff] %v10978_v12  ;;  %v3381_v49 = vrot.slane %v12873_v53, 1  ;;  %12874 = vst [vmem:[#allocation14_spill] sm:$0xff] %v10986_v52  ;;  %v10991_v9 = vsel %vm267_vm1, %v10963_v56, %v10978_v12  ;;  %v3510_v0 = vrot.slane %v3334_v15, 5  ;;  %v3605_v23 = vrot.slane %v10830_v40, 1 }
 0x36b   : > { %v3509_v57 = vrot.slane %v12875_v25, 5  ;;  %v11004_v12 = vsel %vm267_vm1, %v3432_v42, %v3433_v43  ;;  %v11007_v32 = vsel %vm267_vm1, %v3382_v54, %v3432_v42  ;;  %v12876_v10 = vmax.f32 %v10731_v45, 0.0 }
 0x36c   : > { %v10996_v2 = vsel %vm267_vm1, %v3381_v49, %v3429_v60  ;;  %v3609_v15 = vrot.slane %v11007_v32, 1  ;;  %v3610_v60 = vrot.slane %v11004_v12, 1  ;;  %v12879_v42 = vmax.f32 %v10733_v26, 0.0 }
 0x36d   : > { %v3604_v53 = vrot.slane %v10996_v2, 1  ;;  %v11001_v52 = vsel %vm267_vm1, %v3430_v17, %v3509_v57  ;;  %v3383_v25 = vrot.slane %v12876_v10, 1  ;;  %v11018_v57 = vsel %vm267_vm1, %v3433_v43, %v3510_v0  ;;  %v11029_v17 = vld [vmem:[%s12534_s2 + $0x8] sm:$0xf] }
 0x36e   : > { %v3607_v49 = vrot.slane %v11001_v52, 1  ;;  %v3612_v45 = vrot.slane %v11018_v57, 1  ;;  %v11036_v43 = vsel %vm443_vm2, %v3609_v15, %v3610_v60  ;;  %v12880_v0 = vmax.f32 %v10735_v27, 0.0 }
 0x36f   : > { %v11015_v40 = vsel %vm443_vm2, %v3604_v53, %v3605_v23  ;;  %v3511_v53 = vrot.slane %v12879_v42, 5  ;;  %v11042_v10 = vsel %vm267_vm1, %v3383_v25, %v10819_v47  ;;  %v3615_v25 = vrot.slane %v10847_v51, 1 }
 0x370   : > { %12877 = vst [vmem:[#allocation17_spill] sm:$0xff] %v11015_v40  ;;  %8278 = vmatprep.mubr.msk.f32.mxu1 %vm521_vm3, %v11015_v40  ;;  %v11023_v54 = vsel %vm443_vm2, %v3605_v23, %v3607_v49  ;;  %v3384_v23 = vrot.slane %v12880_v0, 1  ;;  %v11051_v26 = vsel %vm443_vm2, %v3610_v60, %v3612_v45  ;;  %v12882_v49 = vmax.f32 %v10737_v22, 0.0 }
 0x371   : > { %12878 = vst [vmem:[#allocation19_spill] sm:$0xff] %v11023_v54  ;;  %8279 = vmatmul.mubr.msk.f32.vlgmr.msra.gmra.mrb[0].mxu1 %vm521_vm3, %v11023_v54  ;;  %12881 = vst [vmem:[#allocation20_spill] sm:$0xff] %v11051_v26  ;;  %v3614_v47 = vrot.slane %v11042_v10, 1  ;;  %v12883_v15 = vmax.f32 %v10739_v35, 0.0  ;;  %v12884_v22 = vmax.f32 %v10741_v21, 0.0 }
 0x372   : > { %8327 = vmatpush3.msk.msra.mxu1 %vm582_vm0, %v10468_v5  ;;  %8281 = vmatprep.mubr.msk.f32.mxu1 %vm521_vm3, %v11036_v43  ;;  %v3512_v27 = vrot.slane %v12882_v49, 5  ;;  %v11061_v5 = vsel %vm267_vm1, %v10823_v48, %v3511_v53  ;;  %v11067_v60 = vsel %vm267_vm1, %v3384_v23, %v10827_v28  ;;  %v3620_v53 = vrot.slane %v10864_v50, 1 }
 0x373   : > { %8376 = vmatprep.subr.msk.mxu1 %vm582_vm0, %v11029_v17  ;;  %v3385_v42 = vrot.slane %v12883_v15, 1  ;;  %v3513_v45 = vrot.slane %v12884_v22, 5  ;;  %v3617_v0 = vrot.slane %v11061_v5, 1  ;;  %v11077_v48 = vsel %vm443_vm2, %v3614_v47, %v3615_v25 }
 0x374   : > { %12885 = vst [vmem:[#allocation21_spill] sm:$0xff] %v11077_v48  ;;  %v3619_v35 = vrot.slane %v11067_v60, 1  ;;  %v11083_v28 = vsel %vm267_vm1, %v10834_v41, %v3512_v27  ;;  %v12886_v23 = vmax.f32 %v10743_v13, 0.0  ;;  %v12887_v47 = vmax.f32 %v10745_v1, 0.0 }
 0x375   : > { %8282 = vmatmul.mubr.msk.f32.gmra.mrb[2].mxu1 %vm521_vm3, %v11051_v26  ;;  %v11089_v49 = vsel %vm267_vm1, %v3385_v42, %v10838_v19  ;;  %v11096_v22 = vsel %vm443_vm2, %v3615_v25, %v3617_v0  ;;  %v3625_v41 = vrot.slane %v10869_v55, 1  ;;  %v11108_v27 = vsel %vm267_vm1, %v10842_v4, %v3513_v45 }
 0x376   : > { %8284 = vmatprep.mubr.msk.f32.mxu1 %vm521_vm3, %v11015_v40  ;;  %v3386_v21 = vrot.slane %v12886_v23, 1  ;;  %v3514_v15 = vrot.slane %v12887_v47, 5  ;;  %12888 = vst [vmem:[#allocation23_spill] sm:$0xff] %v11096_v22  ;;  %v11102_v13 = vsel %vm443_vm2, %v3619_v35, %v3620_v53  ;;  %v3624_v19 = vrot.slane %v11089_v49, 1 }
 0x377   : > { %12889 = vst [vmem:[#allocation24_spill] sm:$0xff] %v11102_v13  ;;  %v12890_v1 = vmax.f32 %v10747_v31, 0.0  ;;  %v12891_v0 = vmax.f32 %v10749_v39, 0.0  ;;  %v3627_v47 = vrot.slane %v11108_v27, 1  ;;  %v12894_v39 = vmax.f32 %v10751_v20, 0.0 }
 0x378   : > { %v11114_v42 = vsel %vm267_vm1, %v3386_v21, %v10851_v14  ;;  %v11127_v31 = vsel %vm443_vm2, %v3624_v19, %v3625_v41  ;;  %v3630_v14 = vrot.slane %v10882_v18, 1  ;;  %v11133_v45 = vsel %vm267_vm1, %v10855_v58, %v3514_v15 }
 0x379   : > { %8285 = vmatmul.mubr.msk.f32.gmra.mrb[4].mxu1 %vm521_vm3, %v11023_v54  ;;  %v3622_v54 = vrot.slane %v11083_v28, 1  ;;  %v3387_v25 = vrot.slane %v12890_v1, 1  ;;  %v3515_v35 = vrot.slane %v12891_v0, 5  ;;  %12893 = vst [vmem:[#allocation30_spill] sm:$0xff] %v11127_v31  ;;  %v3629_v4 = vrot.slane %v11114_v42, 1 }
 0x37a   : > { %8287 = vmatprep.mubr.msk.f32.mxu1 %vm521_vm3, %v11077_v48  ;;  %v12895_v21 = vmax.f32 %v10753_v44, 0.0  ;;  %v11146_v1 = vsel %vm443_vm2, %v3625_v41, %v3627_v47  ;;  %v3632_v0 = vrot.slane %v11133_v45, 1  ;;  %v12898_v44 = vmax.f32 %v10755_v34, 0.0 }
 0x37b   : > { %v11121_v23 = vsel %vm443_vm2, %v3620_v53, %v3622_v54  ;;  %v3388_v54 = vrot.slane %v12894_v39, 1  ;;  %v11139_v53 = vsel %vm267_vm1, %v3387_v25, %v10859_v62  ;;  %12896 = vst [vmem:[#allocation31_spill] sm:$0xff] %v11146_v1  ;;  %v11152_v20 = vsel %vm443_vm2, %v3629_v4, %v3630_v14 }
 0x37c   : > { %12892 = vst [vmem:[#allocation25_spill] sm:$0xff] %v11121_v23  ;;  %v3516_v19 = vrot.slane %v12895_v21, 5  ;;  %12897 = vst [vmem:[#allocation32_spill] sm:$0xff] %v11152_v20  ;;  %v3634_v58 = vrot.slane %v11139_v53, 1  ;;  %v3635_v62 = vrot.slane %v10899_v16, 1  ;;  %v11158_v15 = vsel %vm267_vm1, %v10873_v11, %v3515_v35 }
 0x37d   : > { %8288 = vmatmul.mubr.msk.f32.gmra.mrb[6].mxu1 %vm521_vm3, %v11096_v22  ;;  %v3389_v41 = vrot.slane %v12898_v44, 1  ;;  %v11164_v25 = vsel %vm267_vm1, %v3388_v54, %v10877_v30  ;;  %v12899_v47 = vmax.f32 %v10757_v6, 0.0  ;;  %v11171_v39 = vsel %vm443_vm2, %v3630_v14, %v3632_v0 }
 0x37e   : > { %8290 = vmatprep.mubr.msk.f32.mxu1 %vm521_vm3, %v11102_v13  ;;  %12900 = vst [vmem:[#allocation33_spill] sm:$0xff] %v11171_v39  ;;  %v3637_v21 = vrot.slane %v11158_v15, 1  ;;  %v11177_v34 = vsel %vm443_vm2, %v3634_v58, %v3635_v62  ;;  %v3639_v11 = vrot.slane %v11164_v25, 1  ;;  %v3640_v30 = vrot.slane %v10916_v36, 1 }
 0x37f   : > { %v3517_v4 = vrot.slane %v12899_v47, 5  ;;  %12901 = vst [vmem:[#allocation34_spill] sm:$0xff] %v11177_v34  ;;  %v11183_v35 = vsel %vm267_vm1, %v10886_v29, %v3516_v19  ;;  %v12902_v6 = vmax.f32 %v10759_v46, 0.0  ;;  %v11189_v54 = vsel %vm267_vm1, %v3389_v41, %v10890_v63  ;;  %v12906_v29 = vld [vmem:[#allocation7_spill] sm:$0xff]  ;;  %v12907_v41 = vld [vmem:[#allocation5_spill] sm:$0xff] }
 0x380   : > { %v12903_v0 = vmax.f32 %v10761_v61, 0.0  ;;  %v11196_v44 = vsel %vm443_vm2, %v3635_v62, %v3637_v21  ;;  %v3642_v47 = vrot.slane %v11183_v35, 1  ;;  %v11202_v46 = vsel %vm443_vm2, %v3639_v11, %v3640_v30  ;;  %v12908_v61 = vld [vmem:[#allocation16_spill] sm:$0xff]  ;;  %v12910_v11 = vld [vmem:[#allocation15_spill] sm:$0xff] }
 0x381   : > { %8291 = vmatmul.mubr.msk.f32.gmra.mrb[8].mxu1 %vm521_vm3, %v11121_v23  ;;  %v3390_v14 = vrot.slane %v12902_v6, 1  ;;  %12904 = vst [vmem:[#allocation35_spill] sm:$0xff] %v11196_v44  ;;  %12905 = vst [vmem:[#allocation37_spill] sm:$0xff] %v11202_v46  ;;  %v3644_v63 = vrot.slane %v11189_v54, 1  ;;  %v3645_v19 = vrot.slane %v12906_v29, 1  ;;  %v11208_v6 = vsel %vm267_vm1, %v12907_v41, %v3517_v4 }
 0x382   : > { %8293 = vmatprep.mubr.msk.f32.mxu1 %vm521_vm3, %v11127_v31  ;;  %v3518_v58 = vrot.slane %v12903_v0, 5  ;;  %v12909_v0 = vmax.f32 %v12908_v61, 0.0  ;;  %v3647_v4 = vrot.slane %v11208_v6, 1  ;;  %v12915_v61 = vld [vmem:[#allocation6_spill] sm:$0xff]  ;;  %v12920_v31 = vld [vmem:[#allocation27_spill] sm:$0xff] }
 0x383   : > { %v11214_v21 = vsel %vm267_vm1, %v3390_v14, %v10903_v24  ;;  %v11228_v41 = vsel %vm443_vm2, %v3644_v63, %v3645_v19  ;;  %v3650_v14 = vrot.slane %v10934_v59, 1  ;;  %v12919_v63 = vmax.f32 %v12910_v11, 0.0 }
 0x384   : > { %v3391_v62 = vrot.slane %v12909_v0, 1  ;;  %12914 = vst [vmem:[#allocation39_spill] sm:$0xff] %v11228_v41  ;;  %v3649_v24 = vrot.slane %v11214_v21, 1  ;;  %v11234_v0 = vsel %vm267_vm1, %v12915_v61, %v3518_v58  ;;  %v12921_v23 = vmax.f32 %v12920_v31, 0.0 }
 0x385   : > { %8294 = vmatmul.mubr.msk.f32.gmra.mrb[10].mxu1 %vm521_vm3, %v11146_v1  ;;  %v11222_v1 = vsel %vm443_vm2, %v3640_v30, %v3642_v47  ;;  %v12917_v30 = vld [vmem:[#allocation22_spill] sm:$0xff]  ;;  %v11252_v61 = vsel %vm443_vm2, %v3645_v19, %v3647_v4 }
 0x386   : > { %8296 = vmatprep.mubr.msk.f32.mxu1 %vm521_vm3, %v11152_v20  ;;  %12913 = vst [vmem:[#allocation38_spill] sm:$0xff] %v11222_v1  ;;  %v12918_v47 = vmax.f32 %v12917_v30, 0.0  ;;  %v3520_v58 = vrot.slane %v12921_v23, 5  ;;  %12922 = vst [vmem:[#allocation40_spill] sm:$0xff] %v11252_v61  ;;  %v3652_v30 = vrot.slane %v11234_v0, 1  ;;  %v12924_v23 = vld [vmem:[#allocation28_spill] sm:$0xff] }
 0x387   : > { %v12925_v31 = vmax.f32 %v12924_v23, 0.0 }
 0x389   : > { %8297 = vmatmul.mubr.msk.f32.gmra.mrb[12].mxu1 %vm521_vm3, %v11171_v39  ;;  %v3393_v19 = vrot.slane %v12925_v31, 1 }
 0x38a   : > { %8299 = vmatprep.mubr.msk.f32.mxu1 %vm521_vm3, %v11177_v34  ;;  %v12911_v34 = vld [vmem:[#allocation18_spill] sm:$0xff] }
 0x38b   : > { %v12912_v39 = vmax.f32 %v12911_v34, 0.0 }
 0x38d   : > { %8300 = vmatmul.mubr.msk.f32.gmra.mrb[14].mxu1 %vm521_vm3, %v11196_v44  ;;  %v3519_v20 = vrot.slane %v12912_v39, 5  ;;  %v12916_v39 = vld [vmem:[#allocation3_spill] sm:$0xff]  ;;  %v3392_v44 = vrot.slane %v12918_v47, 1  ;;  %v3655_v47 = vrot.slane %v10951_v33, 1 }
 0x38e   : > { %8302 = vmatprep.mubr.msk.f32.mxu1 %vm521_vm3, %v11202_v46  ;;  %v12680_v34 = vmax.f32 %v12916_v39, 0.0  ;;  %v11241_v46 = vsel %vm267_vm1, %v3391_v62, %v10911_v3  ;;  %v11258_v3 = vsel %vm443_vm2, %v3649_v24, %v3650_v14  ;;  %v12934_v39 = vld [vmem:[#allocation9_spill] sm:$0xff] }
 0x38f   : > { %12923 = vst [vmem:[#allocation42_spill] sm:$0xff] %v11258_v3  ;;  %v3654_v62 = vrot.slane %v11241_v46, 1  ;;  %v11270_v4 = vsel %vm267_vm1, %v3392_v44, %v10929_v8 }
 0x390   : > { %v11276_v24 = vrot.slane %v12680_v34, 7  ;;  %v3659_v23 = vrot.slane %v11270_v4, 1 }
 0x391   : > { %8303 = vmatmul.mubr.msk.f32.gmra.mrb[16].mxu1 %vm521_vm3, %v11222_v1  ;;  %v11247_v1 = vrot.slane %v12919_v63, 7  ;;  %v11264_v63 = vsel %vm267_vm1, %v10925_v7, %v3519_v20  ;;  %v11281_v7 = vsel %vm443_vm2, %v3650_v14, %v3652_v30  ;;  %v11292_v44 = vsel %vm443_vm2, %v3654_v62, %v3655_v47  ;;  %v12932_v30 = vld [vmem:[#allocation29_spill] sm:$0xff]  ;;  %v12935_v62 = vld [vmem:[#allocation36_spill] sm:$0xff] }
 0x392   : > { %8305 = vmatprep.mubr.msk.f32.mxu1 %vm521_vm3, %v11228_v41  ;;  %12926 = vst [vmem:[#allocation7_spill] sm:$0xff] %v11276_v24  ;;  %12929 = vst [vmem:[#allocation5_spill] sm:$0xff] %v11281_v7  ;;  %v3657_v20 = vrot.slane %v11264_v63, 1  ;;  %v12933_v31 = vmax.f32 %v12932_v30, 0.0  ;;  %v12940_v30 = vld [vmem:[#allocation10_spill] sm:$0xff] }
 0x393   : > { %v11287_v8 = vsel %vm267_vm1, %v11247_v1, %v11276_v24  ;;  %12930 = vst [vmem:[#allocation16_spill] sm:$0xff] %v11292_v44  ;;  %v11304_v24 = vsel %vm267_vm1, %v3393_v19, %v12934_v39  ;;  %v12939_v19 = vld [vmem:[#allocation12_spill] sm:$0xff] }
 0x394   : > { %v3394_v34 = vrot.slane %v12933_v31, 1  ;;  %v11311_v22 = vsel %vm443_vm2, %v3655_v47, %v3657_v20  ;;  %v3664_v39 = vrot.slane %v11304_v24, 1 }
 0x395   : > { %8306 = vmatmul.mubr.msk.f32.gmra.mrb[18].mxu1 %vm521_vm3, %v11252_v61  ;;  %v12927_v61 = vld [vmem:[#allocation26_spill] sm:$0xff]  ;;  %12937 = vst [vmem:[#allocation15_spill] sm:$0xff] %v11311_v22 }
 0x396   : > { %8308 = vmatprep.mubr.msk.f32.mxu1 %vm521_vm3, %v11258_v3  ;;  %v12928_v41 = vmax.f32 %v12927_v61, 0.0  ;;  %v12931_v61 = vld [vmem:[#allocation8_spill] sm:$0xff]  ;;  %v11329_v20 = vsel %vm267_vm1, %v3394_v34, %v10955_v37  ;;  %v12947_v34 = vld [vmem:[#allocation14_spill] sm:$0xff] }
 0x397   : > { %v11298_v14 = vsel %vm267_vm1, %v12931_v61, %v3520_v58  ;;  %v3665_v61 = vrot.slane %v12939_v19, 1  ;;  %v3669_v37 = vrot.slane %v11329_v20, 1 }
 0x398   : > { %v3521_v13 = vrot.slane %v12928_v41, 5  ;;  %v3660_v41 = vrot.slane %v10969_v38, 1  ;;  %v3662_v48 = vrot.slane %v11298_v14, 1 }
 0x399   : > { %8309 = vmatmul.mubr.msk.f32.gmra.mrb[20].mxu1 %vm521_vm3, %v11281_v7  ;;  %v12936_v7 = vmax.f32 %v12935_v62, 0.0 }
 0x39a   : > { %8311 = vmatprep.mubr.msk.f32.mxu1 %vm521_vm3, %v11292_v44  ;;  %v11317_v58 = vsel %vm443_vm2, %v3659_v23, %v3660_v41  ;;  %v11323_v31 = vsel %vm267_vm1, %v12940_v30, %v3521_v13  ;;  %v12943_v23 = vld [vmem:[#allocation2_spill] sm:$0xff]  ;;  %v11336_v40 = vsel %vm443_vm2, %v3660_v41, %v3662_v48  ;;  %v11342_v13 = vsel %vm443_vm2, %v3664_v39, %v3665_v61 }
 0x39b   : > { %v3522_v3 = vrot.slane %v12936_v7, 5  ;;  %12938 = vst [vmem:[#allocation18_spill] sm:$0xff] %v11317_v58  ;;  %v12941_v7 = vld [vmem:[#allocation41_spill] sm:$0xff]  ;;  %12945 = vst [vmem:[#allocation6_spill] sm:$0xff] %v11336_v40  ;;  %v3667_v26 = vrot.slane %v11323_v31, 1  ;;  %v3670_v30 = vrot.slane %v12947_v34, 1 }
 0x39c   : > { %v12942_v62 = vmax.f32 %v12941_v7, 0.0  ;;  %12946 = vst [vmem:[#allocation22_spill] sm:$0xff] %v11342_v13  ;;  %v12948_v7 = vld [vmem:[#allocation11_spill] sm:$0xff] }
 0x39d   : > { %8312 = vmatmul.mubr.msk.f32.gmra.mrb[22].mxu1 %vm521_vm3, %v11311_v22  ;;  %v12944_v22 = vmax.f32 %v12943_v23, 0.0  ;;  %v11363_v39 = vsel %vm443_vm2, %v3669_v37, %v3670_v30  ;;  %v3675_v23 = vrot.slane %v10991_v9, 1 }
 0x39e   : > { %v3395_v47 = vrot.slane %v12942_v62, 1  ;;  %8314 = vmatprep.mubr.msk.f32.mxu1 %vm521_vm3, %v11317_v58  ;;  %v11348_v62 = vsel %vm267_vm1, %v12948_v7, %v3522_v3  ;;  %12950 = vst [vmem:[#allocation28_spill] sm:$0xff] %v11363_v39  ;;  %v12954_v7 = vld [vmem:[#allocation4_spill] sm:$0xff] }
 0x39f   : > { %v3523_v44 = vrot.slane %v12944_v22, 5  ;;  %v11357_v22 = vsel %vm443_vm2, %v3665_v61, %v3667_v26  ;;  %v3672_v41 = vrot.slane %v11348_v62, 1 }
 0x3a0   : > { %v11352_v48 = vsel %vm267_vm1, %v3395_v47, %v10963_v56  ;;  %12949 = vst [vmem:[#allocation27_spill] sm:$0xff] %v11357_v22  ;;  %v12951_v56 = vld [vmem:[#allocation13_spill] sm:$0xff] }
 0x3a1   : > { %8315 = vmatmul.mubr.msk.f32.gmra.mrb[24].mxu1 %vm521_vm3, %v11336_v40  ;;  %v3674_v3 = vrot.slane %v11352_v48, 1  ;;  %v11369_v47 = vsel %vm267_vm1, %v12951_v56, %v3523_v44  ;;  %v11374_v26 = vsel %vm443_vm2, %v3670_v30, %v3672_v41  ;;  %v7024_v30 = vld [vmem:[%s12534_s2 + $0xc] sm:$0xf]  ;;  %v4258_v41 = vrot.slane %v12954_v7, 2 }
 0x3a2   : > { %8317 = vmatprep.mubr.msk.f32.mxu1 %vm521_vm3, %v11342_v13  ;;  %v3677_v61 = vrot.slane %v11369_v47, 1  ;;  %v4262_v56 = vrot.slane %v11007_v32, 2 }
 0x3a3   : > { %v11380_v37 = vsel %vm443_vm2, %v3674_v3, %v3675_v23  ;;  %v4260_v3 = vrot.slane %v11001_v52, 2  ;;  %v11476_v52 = vld [vmem:[%s12534_s2 + $0x10] sm:$0xf] }
 0x3a4   : > { %12952 = vst [vmem:[#allocation26_spill] sm:$0xff] %v11380_v37  ;;  %v11385_v44 = vsel %vm443_vm2, %v3675_v23, %v3677_v61  ;;  %v4263_v61 = vrot.slane %v11004_v12, 2 }
 0x3a5   : > { %8318 = vmatmul.mubr.msk.f32.gmra.mrb[26].mxu1 %vm521_vm3, %v11357_v22  ;;  %12953 = vst [vmem:[#allocation8_spill] sm:$0xff] %v11385_v44 }
 0x3a6   : > { %8320 = vmatprep.mubr.msk.f32.mxu1 %vm521_vm3, %v11363_v39 }
 0x3a9   : > { %8321 = vmatmul.mubr.msk.f32.gmra.mrb[28].mxu1 %vm521_vm3, %v11374_v26 }
 0x3aa   : > { %8323 = vmatprep.mubr.msk.f32.mxu1 %vm521_vm3, %v11380_v37  ;;  %v4265_v37 = vrot.slane %v11018_v57, 2 }
 0x3ac   : > { %v11489_v57 = vsel %vm1099_vm4, %v4263_v61, %v4265_v37  ;;  %v4272_v37 = vrot.slane %v11067_v60, 2 }
 0x3ad   : > { %8324 = vmatmul.mubr.msk.f32.gmra.mrb[30].mxu1 %vm521_vm3, %v11385_v44  ;;  %v11470_v44 = vsel %vm1099_vm4, %v4258_v41, %v4260_v3  ;;  %12957 = vst [vmem:[#allocation36_spill] sm:$0xff] %v11489_v57  ;;  %v4268_v3 = vrot.slane %v10847_v51, 2 }
 0x3ae   : > { %8328 = vmatprep.mubr.msk.f32.mxu1 %vm521_vm3, %v10996_v2  ;;  %12956 = vst [vmem:[#allocation9_spill] sm:$0xff] %v11470_v44 }
 0x3b1   : > { %8329 = vmatmul.mubr.msk.f32.vlgmr.msra.gmra.mrb[0].mxu1 %vm521_vm3, %v12954_v7 }
 0x3b2   : > { %8377 = vmatpush3.msk.msra.mxu1 %vm582_vm0, %v11029_v17  ;;  %8331 = vmatprep.mubr.msk.f32.mxu1 %vm521_vm3, %v11007_v32  ;;  %v4257_v17 = vrot.slane %v10996_v2, 2 }
 0x3b3   : > { %8426 = vmatprep.subr.msk.mxu1 %vm582_vm0, %v7024_v30 }
 0x3b4   : > { %v11463_v23 = vsel %vm1099_vm4, %v4257_v17, %v4258_v41  ;;  %v11481_v17 = vsel %vm1099_vm4, %v4262_v56, %v4263_v61  ;;  %v4267_v41 = vrot.slane %v11042_v10, 2  ;;  %v4273_v61 = vrot.slane %v10864_v50, 2 }
 0x3b5   : > { %8332 = vmatmul.mubr.msk.f32.gmra.mrb[2].mxu1 %vm521_vm3, %v11004_v12  ;;  %12955 = vst [vmem:[#allocation29_spill] sm:$0xff] %v11463_v23 }
 0x3b6   : > { %8334 = vmatprep.mubr.msk.f32.mxu1 %vm521_vm3, %v10996_v2  ;;  %v11501_v56 = vsel %vm1099_vm4, %v4267_v41, %v4268_v3  ;;  %v4277_v41 = vrot.slane %v11089_v49, 2 }
 0x3b7   : > { %12958 = vst [vmem:[#allocation12_spill] sm:$0xff] %v11501_v56 }
 0x3b9   : > { %8335 = vmatmul.mubr.msk.f32.gmra.mrb[4].mxu1 %vm521_vm3, %v12954_v7 }
 0x3ba   : > { %8337 = vmatprep.mubr.msk.f32.mxu1 %vm521_vm3, %v11042_v10 }
 0x3bd   : > { %8338 = vmatmul.mubr.msk.f32.gmra.mrb[6].mxu1 %vm521_vm3, %v10847_v51 }
 0x3be   : > { %8340 = vmatprep.mubr.msk.f32.mxu1 %vm521_vm3, %v11067_v60 }
 0x3c1   : > { %8341 = vmatmul.mubr.msk.f32.gmra.mrb[8].mxu1 %vm521_vm3, %v10864_v50 }
 0x3c2   : > { %8343 = vmatprep.mubr.msk.f32.mxu1 %vm521_vm3, %v11089_v49 }
 0x3c5   : > { %8344 = vmatmul.mubr.msk.f32.gmra.mrb[10].mxu1 %vm521_vm3, %v10869_v55 }
 0x3c6   : > { %8346 = vmatprep.mubr.msk.f32.mxu1 %vm521_vm3, %v11114_v42 }
 0x3c9   : > { %8347 = vmatmul.mubr.msk.f32.gmra.mrb[12].mxu1 %vm521_vm3, %v10882_v18 }
 0x3ca   : > { %8349 = vmatprep.mubr.msk.f32.mxu1 %vm521_vm3, %v11139_v53 }
 0x3cd   : > { %8350 = vmatmul.mubr.msk.f32.gmra.mrb[14].mxu1 %vm521_vm3, %v10899_v16 }
 0x3ce   : > { %8352 = vmatprep.mubr.msk.f32.mxu1 %vm521_vm3, %v11164_v25 }
 0x3d1   : > { %8353 = vmatmul.mubr.msk.f32.gmra.mrb[16].mxu1 %vm521_vm3, %v10916_v36 }
 0x3d2   : > { %8355 = vmatprep.mubr.msk.f32.mxu1 %vm521_vm3, %v11189_v54 }
 0x3d5   : > { %8356 = vmatmul.mubr.msk.f32.gmra.mrb[18].mxu1 %vm521_vm3, %v12906_v29 }
 0x3d6   : > { %8358 = vmatprep.mubr.msk.f32.mxu1 %vm521_vm3, %v11214_v21 }
 0x3d9   : > { %8359 = vmatmul.mubr.msk.f32.gmra.mrb[20].mxu1 %vm521_vm3, %v10934_v59 }
 0x3da   : > { %8361 = vmatprep.mubr.msk.f32.mxu1 %vm521_vm3, %v11241_v46 }
 0x3dd   : > { %8362 = vmatmul.mubr.msk.f32.gmra.mrb[22].mxu1 %vm521_vm3, %v10951_v33 }
 0x3de   : > { %8364 = vmatprep.mubr.msk.f32.mxu1 %vm521_vm3, %v11270_v4 }
 0x3e1   : > { %8365 = vmatmul.mubr.msk.f32.gmra.mrb[24].mxu1 %vm521_vm3, %v10969_v38 }
 0x3e2   : > { %8367 = vmatprep.mubr.msk.f32.mxu1 %vm521_vm3, %v11304_v24 }
 0x3e5   : > { %8368 = vmatmul.mubr.msk.f32.gmra.mrb[26].mxu1 %vm521_vm3, %v12939_v19 }
 0x3e6   : > { %8370 = vmatprep.mubr.msk.f32.mxu1 %vm521_vm3, %v11329_v20 }
 0x3e9   : > { %8371 = vmatmul.mubr.msk.f32.gmra.mrb[28].mxu1 %vm521_vm3, %v12947_v34 }
 0x3ea   : > { %8373 = vmatprep.mubr.msk.f32.mxu1 %vm521_vm3, %v11352_v48 }
 0x3ed   : > { %8374 = vmatmul.mubr.msk.f32.gmra.mrb[30].mxu1 %vm521_vm3, %v10991_v9 }
 0x3ee   : > { %8378 = vmatprep.mubr.msk.f32.mxu1 %vm521_vm3, %v11463_v23 }
 0x3f1   : > { %8379 = vmatmul.mubr.msk.f32.vlgmr.msra.gmra.mrb[0].mxu1 %vm521_vm3, %v11470_v44 }
 0x3f2   : > { %8427 = vmatpush3.msk.msra.mxu1 %vm582_vm0, %v7024_v30  ;;  %8381 = vmatprep.mubr.msk.f32.mxu1 %vm521_vm3, %v11481_v17  ;;  %v4270_v30 = vrot.slane %v11061_v5, 2  ;;  %v11514_v5 = vsel %vm1099_vm4, %v4272_v37, %v4273_v61  ;;  %v4283_v37 = vrot.slane %v10882_v18, 2 }
 0x3f3   : > { %8476 = vmatprep.subr.msk.mxu1 %vm582_vm0, %v11476_v52  ;;  %12959 = vst [vmem:[#allocation10_spill] sm:$0xff] %v11514_v5 }
 0x3f5   : > { %8382 = vmatmul.mubr.msk.f32.gmra.mrb[2].mxu1 %vm521_vm3, %v11489_v57  ;;  %v11508_v57 = vsel %vm1099_vm4, %v4268_v3, %v4270_v30  ;;  %v4280_v3 = vrot.slane %v11108_v27, 2  ;;  %v4282_v30 = vrot.slane %v11114_v42, 2 }
 0x3f6   : > { %8384 = vmatprep.mubr.msk.f32.mxu1 %vm521_vm3, %v11463_v23  ;;  %v4275_v23 = vrot.slane %v11083_v28, 2 }
 0x3f7   : > { %v11540_v27 = vsel %vm1099_vm4, %v4282_v30, %v4283_v37  ;;  %v4293_v30 = vrot.slane %v10916_v36, 2 }
 0x3f8   : > { %12961 = vst [vmem:[#allocation2_spill] sm:$0xff] %v11540_v27 }
 0x3f9   : > { %8385 = vmatmul.mubr.msk.f32.gmra.mrb[4].mxu1 %vm521_vm3, %v11470_v44  ;;  %v4278_v44 = vrot.slane %v10869_v55, 2 }
 0x3fa   : > { %8387 = vmatprep.mubr.msk.f32.mxu1 %vm521_vm3, %v11501_v56  ;;  %v11521_v56 = vsel %vm1099_vm4, %v4273_v61, %v4275_v23  ;;  %v4285_v23 = vrot.slane %v11133_v45, 2  ;;  %v4287_v61 = vrot.slane %v11139_v53, 2 }
 0x3fb   : > { %v11527_v28 = vsel %vm1099_vm4, %v4277_v41, %v4278_v44  ;;  %v4288_v41 = vrot.slane %v10899_v16, 2 }
 0x3fc   : > { %12960 = vst [vmem:[#allocation41_spill] sm:$0xff] %v11527_v28 }
 0x3fd   : > { %8388 = vmatmul.mubr.msk.f32.gmra.mrb[6].mxu1 %vm521_vm3, %v11508_v57  ;;  %v11553_v45 = vsel %vm1099_vm4, %v4287_v61, %v4288_v41  ;;  %v4298_v61 = vrot.slane %v12906_v29, 2 }
 0x3fe   : > { %8390 = vmatprep.mubr.msk.f32.mxu1 %vm521_vm3, %v11514_v5  ;;  %v11534_v5 = vsel %vm1099_vm4, %v4278_v44, %v4280_v3  ;;  %v4290_v44 = vrot.slane %v11158_v15, 2  ;;  %12962 = vst [vmem:[#allocation14_spill] sm:$0xff] %v11553_v45  ;;  %v4292_v3 = vrot.slane %v11164_v25, 2 }
 0x400   : > { %v11566_v15 = vsel %vm1099_vm4, %v4292_v3, %v4293_v30  ;;  %v4303_v3 = vrot.slane %v10934_v59, 2 }
 0x401   : > { %8391 = vmatmul.mubr.msk.f32.gmra.mrb[8].mxu1 %vm521_vm3, %v11521_v56  ;;  %12963 = vst [vmem:[#allocation11_spill] sm:$0xff] %v11566_v15 }
 0x402   : > { %8393 = vmatprep.mubr.msk.f32.mxu1 %vm521_vm3, %v11527_v28  ;;  %v11547_v28 = vsel %vm1099_vm4, %v4283_v37, %v4285_v23  ;;  %v4295_v37 = vrot.slane %v11183_v35, 2  ;;  %v4297_v23 = vrot.slane %v11189_v54, 2 }
 0x404   : > { %v11579_v35 = vsel %vm1099_vm4, %v4297_v23, %v4298_v61  ;;  %v4308_v23 = vrot.slane %v10951_v33, 2 }
 0x405   : > { %8394 = vmatmul.mubr.msk.f32.gmra.mrb[10].mxu1 %vm521_vm3, %v11534_v5  ;;  %12964 = vst [vmem:[#allocation13_spill] sm:$0xff] %v11579_v35 }
 0x406   : > { %8396 = vmatprep.mubr.msk.f32.mxu1 %vm521_vm3, %v11540_v27  ;;  %v11560_v27 = vsel %vm1099_vm4, %v4288_v41, %v4290_v44  ;;  %v4300_v41 = vrot.slane %v11208_v6, 2  ;;  %v4302_v44 = vrot.slane %v11214_v21, 2 }
 0x408   : > { %v11592_v6 = vsel %vm1099_vm4, %v4302_v44, %v4303_v3  ;;  %v4313_v44 = vrot.slane %v10969_v38, 2 }
 0x409   : > { %8397 = vmatmul.mubr.msk.f32.gmra.mrb[12].mxu1 %vm521_vm3, %v11547_v28  ;;  %12965 = vst [vmem:[#allocation4_spill] sm:$0xff] %v11592_v6 }
 0x40a   : > { %8399 = vmatprep.mubr.msk.f32.mxu1 %vm521_vm3, %v11553_v45  ;;  %v11573_v45 = vsel %vm1099_vm4, %v4293_v30, %v4295_v37  ;;  %v4305_v30 = vrot.slane %v11234_v0, 2  ;;  %v4307_v37 = vrot.slane %v11241_v46, 2 }
 0x40c   : > { %v11605_v0 = vsel %vm1099_vm4, %v4307_v37, %v4308_v23  ;;  %v4318_v37 = vrot.slane %v12939_v19, 2 }
 0x40d   : > { %8400 = vmatmul.mubr.msk.f32.gmra.mrb[14].mxu1 %vm521_vm3, %v11560_v27  ;;  %12967 = vst [vmem:[#allocation44_spill] sm:$0xff] %v11605_v0 }
 0x40e   : > { %8402 = vmatprep.mubr.msk.f32.mxu1 %vm521_vm3, %v11566_v15  ;;  %v11586_v15 = vsel %vm1099_vm4, %v4298_v61, %v4300_v41  ;;  %v4310_v61 = vrot.slane %v11264_v63, 2  ;;  %v4312_v41 = vrot.slane %v11270_v4, 2 }
 0x410   : > { %v11618_v63 = vsel %vm1099_vm4, %v4312_v41, %v4313_v44  ;;  %v4323_v41 = vrot.slane %v12947_v34, 2 }
 0x411   : > { %8403 = vmatmul.mubr.msk.f32.gmra.mrb[16].mxu1 %vm521_vm3, %v11573_v45  ;;  %12968 = vst [vmem:[#allocation45_spill] sm:$0xff] %v11618_v63 }
 0x412   : > { %8405 = vmatprep.mubr.msk.f32.mxu1 %vm521_vm3, %v11579_v35  ;;  %v11599_v35 = vsel %vm1099_vm4, %v4303_v3, %v4305_v30  ;;  %v4315_v3 = vrot.slane %v11298_v14, 2  ;;  %v4317_v30 = vrot.slane %v11304_v24, 2 }
 0x413   : > { %12966 = vst [vmem:[#allocation43_spill] sm:$0xff] %v11599_v35 }
 0x414   : > { %v11631_v14 = vsel %vm1099_vm4, %v4317_v30, %v4318_v37  ;;  %v4328_v30 = vrot.slane %v10991_v9, 2 }
 0x415   : > { %8406 = vmatmul.mubr.msk.f32.gmra.mrb[18].mxu1 %vm521_vm3, %v11586_v15  ;;  %12970 = vst [vmem:[#allocation47_spill] sm:$0xff] %v11631_v14 }
 0x416   : > { %8408 = vmatprep.mubr.msk.f32.mxu1 %vm521_vm3, %v11592_v6  ;;  %v11612_v6 = vsel %vm1099_vm4, %v4308_v23, %v4310_v61  ;;  %v4320_v23 = vrot.slane %v11323_v31, 2  ;;  %v4322_v61 = vrot.slane %v11329_v20, 2 }
 0x418   : > { %v11644_v31 = vsel %vm1099_vm4, %v4322_v61, %v4323_v41  ;;  %v12973_v61 = vld [vmem:[#allocation20_spill] sm:$0xff] }
 0x419   : > { %8409 = vmatmul.mubr.msk.f32.gmra.mrb[20].mxu1 %vm521_vm3, %v11599_v35  ;;  %12971 = vst [vmem:[#allocation48_spill] sm:$0xff] %v11644_v31 }
 0x41a   : > { %8411 = vmatprep.mubr.msk.f32.mxu1 %vm521_vm3, %v11605_v0  ;;  %v11625_v0 = vsel %vm1099_vm4, %v4313_v44, %v4315_v3  ;;  %v4325_v44 = vrot.slane %v11348_v62, 2  ;;  %v4327_v3 = vrot.slane %v11352_v48, 2 }
 0x41b   : > { %12969 = vst [vmem:[#allocation46_spill] sm:$0xff] %v11625_v0 }
 0x41c   : > { %v11657_v62 = vsel %vm1099_vm4, %v4327_v3, %v4328_v30  ;;  %v12978_v3 = vld [vmem:[#allocation24_spill] sm:$0xff] }
 0x41d   : > { %8412 = vmatmul.mubr.msk.f32.gmra.mrb[22].mxu1 %vm521_vm3, %v11612_v6 }
 0x41e   : > { %8414 = vmatprep.mubr.msk.f32.mxu1 %vm521_vm3, %v11618_v63  ;;  %v11638_v63 = vsel %vm1099_vm4, %v4318_v37, %v4320_v23  ;;  %v4330_v37 = vrot.slane %v11369_v47, 2  ;;  %v7092_v47 = vld [vmem:[%s12534_s2 + $0x14] sm:$0xf] }
 0x420   : > { %v11662_v23 = vsel %vm1099_vm4, %v4328_v30, %v4330_v37  ;;  %v12979_v30 = vld [vmem:[#allocation25_spill] sm:$0xff]  ;;  %v12980_v37 = vld [vmem:[#allocation30_spill] sm:$0xff] }
 0x421   : > { %8415 = vmatmul.mubr.msk.f32.gmra.mrb[24].mxu1 %vm521_vm3, %v11625_v0 }
 0x422   : > { %8417 = vmatprep.mubr.msk.f32.mxu1 %vm521_vm3, %v11631_v14  ;;  %v11651_v14 = vsel %vm1099_vm4, %v4323_v41, %v4325_v44  ;;  %v12975_v41 = vld [vmem:[#allocation19_spill] sm:$0xff]  ;;  %v12976_v44 = vld [vmem:[#allocation21_spill] sm:$0xff] }
 0x425   : > { %8418 = vmatmul.mubr.msk.f32.gmra.mrb[26].mxu1 %vm521_vm3, %v11638_v63 }
 0x426   : > { %8420 = vmatprep.mubr.msk.f32.mxu1 %vm521_vm3, %v11644_v31 }
 0x429   : > { %8421 = vmatmul.mubr.msk.f32.gmra.mrb[28].mxu1 %vm521_vm3, %v11651_v14 }
 0x42a   : > { %8423 = vmatprep.mubr.msk.f32.mxu1 %vm521_vm3, %v11657_v62 }
 0x42d   : > { %8424 = vmatmul.mubr.msk.f32.gmra.mrb[30].mxu1 %vm521_vm3, %v11662_v23 }
 0x42e   : > { %8428 = vmatprep.mubr.msk.f32.mxu1 %vm521_vm3, %v11007_v32 }
 0x431   : > { %8429 = vmatmul.mubr.msk.f32.vlgmr.msra.gmra.mrb[0].mxu1 %vm521_vm3, %v11004_v12  ;;  %v12972_v12 = vmax.f32 %v12910_v11, 0.0  ;;  %v7126_v11 = vld [vmem:[%s12534_s2 + $0x18] sm:$0xf] }
 0x432   : > { %8477 = vmatpush3.msk.msra.mxu1 %vm582_vm0, %v11476_v52  ;;  %8431 = vmatprep.mubr.msk.f32.mxu1 %vm521_vm3, %v10996_v2 }
 0x433   : > { %8526 = vmatprep.subr.msk.mxu1 %vm582_vm0, %v7092_v47  ;;  %v3396_v32 = vrot.slane %v12972_v12, 1  ;;  %v12982_v12 = vld [vmem:[#allocation32_spill] sm:$0xff] }
 0x435   : > { %8432 = vmatmul.mubr.msk.f32.gmra.mrb[2].mxu1 %vm521_vm3, %v12954_v7  ;;  %v11736_v52 = vsel %vm267_vm1, %v3396_v32, %v11247_v1  ;;  %v12974_v1 = vld [vmem:[#allocation17_spill] sm:$0xff] }
 0x436   : > { %8434 = vmatprep.mubr.msk.f32.mxu1 %vm521_vm3, %v11042_v10  ;;  %v12983_v32 = vld [vmem:[#allocation33_spill] sm:$0xff] }
 0x439   : > { %8435 = vmatmul.mubr.msk.f32.gmra.mrb[4].mxu1 %vm521_vm3, %v10847_v51 }
 0x43a   : > { %8437 = vmatprep.mubr.msk.f32.mxu1 %vm521_vm3, %v11067_v60 }
 0x43d   : > { %8438 = vmatmul.mubr.msk.f32.gmra.mrb[6].mxu1 %vm521_vm3, %v10864_v50 }
 0x43e   : > { %8440 = vmatprep.mubr.msk.f32.mxu1 %vm521_vm3, %v11089_v49 }
 0x441   : > { %8441 = vmatmul.mubr.msk.f32.gmra.mrb[8].mxu1 %vm521_vm3, %v10869_v55 }
 0x442   : > { %8443 = vmatprep.mubr.msk.f32.mxu1 %vm521_vm3, %v11114_v42 }
 0x445   : > { %8444 = vmatmul.mubr.msk.f32.gmra.mrb[10].mxu1 %vm521_vm3, %v10882_v18 }
 0x446   : > { %8446 = vmatprep.mubr.msk.f32.mxu1 %vm521_vm3, %v11139_v53 }
 0x449   : > { %8447 = vmatmul.mubr.msk.f32.gmra.mrb[12].mxu1 %vm521_vm3, %v10899_v16 }
 0x44a   : > { %8449 = vmatprep.mubr.msk.f32.mxu1 %vm521_vm3, %v11164_v25 }
 0x44d   : > { %8450 = vmatmul.mubr.msk.f32.gmra.mrb[14].mxu1 %vm521_vm3, %v10916_v36 }
 0x44e   : > { %8452 = vmatprep.mubr.msk.f32.mxu1 %vm521_vm3, %v11189_v54 }
 0x451   : > { %8453 = vmatmul.mubr.msk.f32.gmra.mrb[16].mxu1 %vm521_vm3, %v12906_v29 }
 0x452   : > { %8455 = vmatprep.mubr.msk.f32.mxu1 %vm521_vm3, %v11214_v21 }
 0x455   : > { %8456 = vmatmul.mubr.msk.f32.gmra.mrb[18].mxu1 %vm521_vm3, %v10934_v59 }
 0x456   : > { %8458 = vmatprep.mubr.msk.f32.mxu1 %vm521_vm3, %v11241_v46 }
 0x459   : > { %8459 = vmatmul.mubr.msk.f32.gmra.mrb[20].mxu1 %vm521_vm3, %v10951_v33 }
 0x45a   : > { %8461 = vmatprep.mubr.msk.f32.mxu1 %vm521_vm3, %v11270_v4 }
 0x45d   : > { %8462 = vmatmul.mubr.msk.f32.gmra.mrb[22].mxu1 %vm521_vm3, %v10969_v38 }
 0x45e   : > { %8464 = vmatprep.mubr.msk.f32.mxu1 %vm521_vm3, %v11304_v24 }
 0x461   : > { %8465 = vmatmul.mubr.msk.f32.gmra.mrb[24].mxu1 %vm521_vm3, %v12939_v19 }
 0x462   : > { %8467 = vmatprep.mubr.msk.f32.mxu1 %vm521_vm3, %v11329_v20 }
 0x465   : > { %8468 = vmatmul.mubr.msk.f32.gmra.mrb[26].mxu1 %vm521_vm3, %v12947_v34 }
 0x466   : > { %8470 = vmatprep.mubr.msk.f32.mxu1 %vm521_vm3, %v11352_v48 }
 0x469   : > { %8471 = vmatmul.mubr.msk.f32.gmra.mrb[28].mxu1 %vm521_vm3, %v10991_v9 }
 0x46a   : > { %8473 = vmatprep.mubr.msk.f32.mxu1 %vm521_vm3, %v11736_v52 }
 0x46d   : > { %8474 = vmatmul.mubr.msk.f32.gmra.mrb[30].mxu1 %vm521_vm3, %v11287_v8 }
 0x46e   : > { %8478 = vmatprep.mubr.msk.f32.mxu1 %vm521_vm3, %v11036_v43  ;;  %v12977_v43 = vld [vmem:[#allocation23_spill] sm:$0xff] }
 0x471   : > { %8479 = vmatmul.mubr.msk.f32.vlgmr.msra.gmra.mrb[0].mxu1 %vm521_vm3, %v12973_v61  ;;  %v12984_v61 = vld [vmem:[#allocation34_spill] sm:$0xff] }
 0x472   : > { %8527 = vmatpush3.msk.msra.mxu1 %vm582_vm0, %v7092_v47  ;;  %8481 = vmatprep.mubr.msk.f32.mxu1 %vm521_vm3, %v12974_v1  ;;  %v12981_v47 = vld [vmem:[#allocation31_spill] sm:$0xff] }
 0x473   : > { %8576 = vmatprep.subr.msk.mxu1 %vm582_vm0, %v7126_v11 }
 0x475   : > { %8482 = vmatmul.mubr.msk.f32.gmra.mrb[2].mxu1 %vm521_vm3, %v12975_v41 }
 0x476   : > { %8484 = vmatprep.mubr.msk.f32.mxu1 %vm521_vm3, %v12976_v44 }
 0x479   : > { %8485 = vmatmul.mubr.msk.f32.gmra.mrb[4].mxu1 %vm521_vm3, %v12977_v43  ;;  %v12985_v43 = vld [vmem:[#allocation35_spill] sm:$0xff] }
 0x47a   : > { %8487 = vmatprep.mubr.msk.f32.mxu1 %vm521_vm3, %v12978_v3  ;;  %v12986_v3 = vld [vmem:[#allocation37_spill] sm:$0xff] }
 0x47d   : > { %8488 = vmatmul.mubr.msk.f32.gmra.mrb[6].mxu1 %vm521_vm3, %v12979_v30  ;;  %v12987_v30 = vld [vmem:[#allocation38_spill] sm:$0xff] }
 0x47e   : > { %8490 = vmatprep.mubr.msk.f32.mxu1 %vm521_vm3, %v12980_v37  ;;  %v12988_v37 = vld [vmem:[#allocation39_spill] sm:$0xff] }
 0x481   : > { %8491 = vmatmul.mubr.msk.f32.gmra.mrb[8].mxu1 %vm521_vm3, %v12981_v47  ;;  %v12989_v47 = vld [vmem:[#allocation40_spill] sm:$0xff] }
 0x482   : > { %8493 = vmatprep.mubr.msk.f32.mxu1 %vm521_vm3, %v12982_v12  ;;  %v12990_v12 = vld [vmem:[#allocation42_spill] sm:$0xff] }
 0x485   : > { %8494 = vmatmul.mubr.msk.f32.gmra.mrb[10].mxu1 %vm521_vm3, %v12983_v32  ;;  %v12991_v32 = vld [vmem:[#allocation5_spill] sm:$0xff] }
 0x486   : > { %8496 = vmatprep.mubr.msk.f32.mxu1 %vm521_vm3, %v12984_v61  ;;  %v12992_v61 = vld [vmem:[#allocation16_spill] sm:$0xff] }
 0x489   : > { %8497 = vmatmul.mubr.msk.f32.gmra.mrb[12].mxu1 %vm521_vm3, %v12985_v43  ;;  %v12993_v43 = vld [vmem:[#allocation15_spill] sm:$0xff] }
 0x48a   : > { %8499 = vmatprep.mubr.msk.f32.mxu1 %vm521_vm3, %v12986_v3 }
 0x48d   : > { %8500 = vmatmul.mubr.msk.f32.gmra.mrb[14].mxu1 %vm521_vm3, %v12987_v30 }
 0x48e   : > { %8502 = vmatprep.mubr.msk.f32.mxu1 %vm521_vm3, %v12988_v37 }
 0x491   : > { %8503 = vmatmul.mubr.msk.f32.gmra.mrb[16].mxu1 %vm521_vm3, %v12989_v47  ;;  %v12994_v47 = vld [vmem:[#allocation3_spill] sm:$0xff] }
 0x492   : > { %8505 = vmatprep.mubr.msk.f32.mxu1 %vm521_vm3, %v12990_v12  ;;  %v12995_v12 = vmax.f32 %v12994_v47, 0.0 }
 0x494   : > { %v3524_v37 = vrot.slane %v12995_v12, 5  ;;  %v12998_v12 = vld [vmem:[#allocation8_spill] sm:$0xff] }
 0x495   : > { %8506 = vmatmul.mubr.msk.f32.gmra.mrb[18].mxu1 %vm521_vm3, %v12991_v32 }
 0x496   : > { %8508 = vmatprep.mubr.msk.f32.mxu1 %vm521_vm3, %v12992_v61  ;;  %v4923_v61 = vrot.slane %v11287_v8, 1 }
 0x499   : > { %8509 = vmatmul.mubr.msk.f32.gmra.mrb[20].mxu1 %vm521_vm3, %v12993_v43  ;;  %v4922_v43 = vrot.slane %v11736_v52, 1 }
 0x49a   : > { %8511 = vmatprep.mubr.msk.f32.mxu1 %vm521_vm3, %v11317_v58 }
 0x49d   : > { %8512 = vmatmul.mubr.msk.f32.gmra.mrb[22].mxu1 %vm521_vm3, %v11336_v40  ;;  %v12996_v40 = vld [vmem:[#allocation7_spill] sm:$0xff] }
 0x49e   : > { %8514 = vmatprep.mubr.msk.f32.mxu1 %vm521_vm3, %v11342_v13  ;;  %v3572_v58 = vsel %vm267_vm1, %v12996_v40, %v3524_v37  ;;  %v12997_v13 = vld [vmem:[#allocation26_spill] sm:$0xff]  ;;  %v7160_v40 = vld [vmem:[%s12534_s2 + $0x1c] sm:$0xf]  ;;  %v12999_v37 = vld [vmem:[#allocation36_spill] sm:$0xff] }
 0x49f   : > { %v4925_v47 = vrot.slane %v3572_v58, 1 }
 0x4a1   : > { %8515 = vmatmul.mubr.msk.f32.gmra.mrb[24].mxu1 %vm521_vm3, %v11357_v22  ;;  %v11814_v22 = vsel %vm443_vm2, %v4922_v43, %v4923_v61  ;;  %v13000_v43 = vld [vmem:[#allocation29_spill] sm:$0xff] }
 0x4a2   : > { %8517 = vmatprep.mubr.msk.f32.mxu1 %vm521_vm3, %v11363_v39  ;;  %v11819_v39 = vsel %vm443_vm2, %v4923_v61, %v4925_v47  ;;  %v13001_v61 = vld [vmem:[#allocation9_spill] sm:$0xff]  ;;  %v13002_v47 = vld [vmem:[#allocation12_spill] sm:$0xff] }
 0x4a5   : > { %8518 = vmatmul.mubr.msk.f32.gmra.mrb[26].mxu1 %vm521_vm3, %v11374_v26 }
 0x4a6   : > { %8520 = vmatprep.mubr.msk.f32.mxu1 %vm521_vm3, %v12997_v13 }
 0x4a9   : > { %8521 = vmatmul.mubr.msk.f32.gmra.mrb[28].mxu1 %vm521_vm3, %v12998_v12 }
 0x4aa   : > { %8523 = vmatprep.mubr.msk.f32.mxu1 %vm521_vm3, %v11814_v22 }
 0x4ad   : > { %8524 = vmatmul.mubr.msk.f32.gmra.mrb[30].mxu1 %vm521_vm3, %v11819_v39 }
 0x4ae   : > { %8528 = vmatprep.mubr.msk.f32.mxu1 %vm521_vm3, %v11481_v17  ;;  %v13003_v17 = vld [vmem:[#allocation10_spill] sm:$0xff] }
 0x4b1   : > { %8529 = vmatmul.mubr.msk.f32.vlgmr.msra.gmra.mrb[0].mxu1 %vm521_vm3, %v12999_v37  ;;  %v13005_v37 = vld [vmem:[#allocation2_spill] sm:$0xff] }
 0x4b2   : > { %8577 = vmatpush3.msk.msra.mxu1 %vm582_vm0, %v7126_v11  ;;  %8531 = vmatprep.mubr.msk.f32.mxu1 %vm521_vm3, %v13000_v43  ;;  %v13004_v11 = vld [vmem:[#allocation41_spill] sm:$0xff] }
 0x4b3   : > { %8626 = vmatprep.subr.msk.mxu1 %vm582_vm0, %v7160_v40 }
 0x4b5   : > { %8532 = vmatmul.mubr.msk.f32.gmra.mrb[2].mxu1 %vm521_vm3, %v13001_v61 }
 0x4b6   : > { %8534 = vmatprep.mubr.msk.f32.mxu1 %vm521_vm3, %v13002_v47  ;;  %v13006_v47 = vld [vmem:[#allocation14_spill] sm:$0xff] }
 0x4b9   : > { %8535 = vmatmul.mubr.msk.f32.gmra.mrb[4].mxu1 %vm521_vm3, %v11508_v57 }
 0x4ba   : > { %8537 = vmatprep.mubr.msk.f32.mxu1 %vm521_vm3, %v13003_v17  ;;  %v13007_v17 = vld [vmem:[#allocation11_spill] sm:$0xff] }
 0x4bd   : > { %8538 = vmatmul.mubr.msk.f32.gmra.mrb[6].mxu1 %vm521_vm3, %v11521_v56 }
 0x4be   : > { %8540 = vmatprep.mubr.msk.f32.mxu1 %vm521_vm3, %v13004_v11  ;;  %v13008_v11 = vld [vmem:[#allocation13_spill] sm:$0xff] }
 0x4c1   : > { %8541 = vmatmul.mubr.msk.f32.gmra.mrb[8].mxu1 %vm521_vm3, %v11534_v5 }
 0x4c2   : > { %8543 = vmatprep.mubr.msk.f32.mxu1 %vm521_vm3, %v13005_v37  ;;  %v13009_v37 = vld [vmem:[#allocation4_spill] sm:$0xff] }
 0x4c5   : > { %8544 = vmatmul.mubr.msk.f32.gmra.mrb[10].mxu1 %vm521_vm3, %v11547_v28 }
 0x4c6   : > { %8546 = vmatprep.mubr.msk.f32.mxu1 %vm521_vm3, %v13006_v47  ;;  %v13010_v47 = vld [vmem:[#allocation44_spill] sm:$0xff] }
 0x4c9   : > { %8547 = vmatmul.mubr.msk.f32.gmra.mrb[12].mxu1 %vm521_vm3, %v11560_v27 }
 0x4ca   : > { %8549 = vmatprep.mubr.msk.f32.mxu1 %vm521_vm3, %v13007_v17  ;;  %v13011_v17 = vld [vmem:[#allocation45_spill] sm:$0xff] }
 0x4cd   : > { %8550 = vmatmul.mubr.msk.f32.gmra.mrb[14].mxu1 %vm521_vm3, %v11573_v45 }
 0x4ce   : > { %8552 = vmatprep.mubr.msk.f32.mxu1 %vm521_vm3, %v13008_v11  ;;  %v13012_v11 = vld [vmem:[#allocation47_spill] sm:$0xff] }
 0x4d1   : > { %8553 = vmatmul.mubr.msk.f32.gmra.mrb[16].mxu1 %vm521_vm3, %v11586_v15 }
 0x4d2   : > { %8555 = vmatprep.mubr.msk.f32.mxu1 %vm521_vm3, %v13009_v37 }
 0x4d5   : > { %8556 = vmatmul.mubr.msk.f32.gmra.mrb[18].mxu1 %vm521_vm3, %v11599_v35  ;;  %v5194_v35 = vrot.slane %v11287_v8, 2 }
 0x4d6   : > { %8558 = vmatprep.mubr.msk.f32.mxu1 %vm521_vm3, %v13010_v47  ;;  %v5193_v47 = vrot.slane %v11736_v52, 2 }
 0x4d9   : > { %8559 = vmatmul.mubr.msk.f32.gmra.mrb[20].mxu1 %vm521_vm3, %v11612_v6 }
 0x4da   : > { %8561 = vmatprep.mubr.msk.f32.mxu1 %vm521_vm3, %v13011_v17 }
 0x4dd   : > { %8562 = vmatmul.mubr.msk.f32.gmra.mrb[22].mxu1 %vm521_vm3, %v11625_v0  ;;  %v5196_v0 = vrot.slane %v3572_v58, 2  ;;  %v7194_v58 = vld [vmem:[%s12534_s2 + $0x20] sm:$0xf] }
 0x4de   : > { %8564 = vmatprep.mubr.msk.f32.mxu1 %vm521_vm3, %v13012_v11  ;;  %v11891_v11 = vsel %vm1099_vm4, %v5193_v47, %v5194_v35 }
 0x4e1   : > { %8565 = vmatmul.mubr.msk.f32.gmra.mrb[24].mxu1 %vm521_vm3, %v11638_v63 }
 0x4e2   : > { %8567 = vmatprep.mubr.msk.f32.mxu1 %vm521_vm3, %v11644_v31  ;;  %v11896_v31 = vsel %vm1099_vm4, %v5194_v35, %v5196_v0 }
 0x4e5   : > { %8568 = vmatmul.mubr.msk.f32.gmra.mrb[26].mxu1 %vm521_vm3, %v11651_v14 }
 0x4e6   : > { %8570 = vmatprep.mubr.msk.f32.mxu1 %vm521_vm3, %v11657_v62 }
 0x4e9   : > { %8571 = vmatmul.mubr.msk.f32.gmra.mrb[28].mxu1 %vm521_vm3, %v11662_v23 }
 0x4ea   : > { %8573 = vmatprep.mubr.msk.f32.mxu1 %vm521_vm3, %v11891_v11 }
 0x4ed   : > { %8574 = vmatmul.mubr.msk.f32.gmra.mrb[30].mxu1 %vm521_vm3, %v11896_v31 }
 0x4ee   : > { %8578 = vmatprep.mubr.msk.f32.mxu1 %vm521_vm3, %v10996_v2  ;;  %v13023_v2 = vld [vmem:[#allocation40_spill] sm:$0xff] }
 0x4f1   : > { %8579 = vmatmul.mubr.msk.f32.vlgmr.msra.gmra.mrb[0].mxu1 %vm521_vm3, %v12954_v7 }
 0x4f2   : > { %8627 = vmatpush3.msk.msra.mxu1 %vm582_vm0, %v7160_v40  ;;  %8581 = vmatprep.mubr.msk.f32.mxu1 %vm521_vm3, %v11042_v10  ;;  %v13024_v10 = vld [vmem:[#allocation42_spill] sm:$0xff] }
 0x4f3   : > { %8676 = vmatprep.subr.msk.mxu1 %vm582_vm0, %v7194_v58 }
 0x4f5   : > { %8582 = vmatmul.mubr.msk.f32.gmra.mrb[2].mxu1 %vm521_vm3, %v10847_v51  ;;  %v13014_v51 = vld [vmem:[#allocation24_spill] sm:$0xff] }
 0x4f6   : > { %8584 = vmatprep.mubr.msk.f32.mxu1 %vm521_vm3, %v11067_v60  ;;  %v13025_v60 = vld [vmem:[#allocation16_spill] sm:$0xff] }
 0x4f9   : > { %8585 = vmatmul.mubr.msk.f32.gmra.mrb[4].mxu1 %vm521_vm3, %v10864_v50  ;;  %v13015_v50 = vld [vmem:[#allocation25_spill] sm:$0xff] }
 0x4fa   : > { %8587 = vmatprep.mubr.msk.f32.mxu1 %vm521_vm3, %v11089_v49  ;;  %v13026_v49 = vld [vmem:[#allocation15_spill] sm:$0xff] }
 0x4fd   : > { %8588 = vmatmul.mubr.msk.f32.gmra.mrb[6].mxu1 %vm521_vm3, %v10869_v55  ;;  %v13021_v55 = vld [vmem:[#allocation35_spill] sm:$0xff] }
 0x4fe   : > { %8590 = vmatprep.mubr.msk.f32.mxu1 %vm521_vm3, %v11114_v42  ;;  %v13027_v42 = vld [vmem:[#allocation18_spill] sm:$0xff] }
 0x501   : > { %8591 = vmatmul.mubr.msk.f32.gmra.mrb[8].mxu1 %vm521_vm3, %v10882_v18  ;;  %v13017_v18 = vld [vmem:[#allocation31_spill] sm:$0xff] }
 0x502   : > { %8593 = vmatprep.mubr.msk.f32.mxu1 %vm521_vm3, %v11139_v53  ;;  %v13028_v53 = vld [vmem:[#allocation6_spill] sm:$0xff] }
 0x505   : > { %8594 = vmatmul.mubr.msk.f32.gmra.mrb[10].mxu1 %vm521_vm3, %v10899_v16  ;;  %v13018_v16 = vld [vmem:[#allocation32_spill] sm:$0xff] }
 0x506   : > { %8596 = vmatprep.mubr.msk.f32.mxu1 %vm521_vm3, %v11164_v25  ;;  %v13029_v25 = vld [vmem:[#allocation22_spill] sm:$0xff] }
 0x509   : > { %8597 = vmatmul.mubr.msk.f32.gmra.mrb[12].mxu1 %vm521_vm3, %v10916_v36  ;;  %v13019_v36 = vld [vmem:[#allocation33_spill] sm:$0xff] }
 0x50a   : > { %8599 = vmatprep.mubr.msk.f32.mxu1 %vm521_vm3, %v11189_v54  ;;  %v13030_v54 = vld [vmem:[#allocation27_spill] sm:$0xff] }
 0x50d   : > { %8600 = vmatmul.mubr.msk.f32.gmra.mrb[14].mxu1 %vm521_vm3, %v12906_v29  ;;  %v13032_v29 = vld [vmem:[#allocation12_spill] sm:$0xff] }
 0x50e   : > { %8602 = vmatprep.mubr.msk.f32.mxu1 %vm521_vm3, %v11214_v21  ;;  %v13033_v21 = vld [vmem:[#allocation10_spill] sm:$0xff] }
 0x511   : > { %8603 = vmatmul.mubr.msk.f32.gmra.mrb[16].mxu1 %vm521_vm3, %v10934_v59  ;;  %v13020_v59 = vld [vmem:[#allocation34_spill] sm:$0xff] }
 0x512   : > { %8605 = vmatprep.mubr.msk.f32.mxu1 %vm521_vm3, %v11241_v46  ;;  %v13031_v46 = vld [vmem:[#allocation28_spill] sm:$0xff] }
 0x515   : > { %8606 = vmatmul.mubr.msk.f32.gmra.mrb[18].mxu1 %vm521_vm3, %v10951_v33  ;;  %v13022_v33 = vld [vmem:[#allocation39_spill] sm:$0xff] }
 0x516   : > { %8608 = vmatprep.mubr.msk.f32.mxu1 %vm521_vm3, %v11270_v4  ;;  %v13034_v4 = vld [vmem:[#allocation41_spill] sm:$0xff] }
 0x519   : > { %8609 = vmatmul.mubr.msk.f32.gmra.mrb[20].mxu1 %vm521_vm3, %v10969_v38  ;;  %v13013_v38 = vld [vmem:[#allocation23_spill] sm:$0xff] }
 0x51a   : > { %8611 = vmatprep.mubr.msk.f32.mxu1 %vm521_vm3, %v11304_v24  ;;  %v13035_v24 = vld [vmem:[#allocation2_spill] sm:$0xff] }
 0x51d   : > { %8612 = vmatmul.mubr.msk.f32.gmra.mrb[22].mxu1 %vm521_vm3, %v12939_v19  ;;  %v13037_v19 = vld [vmem:[#allocation11_spill] sm:$0xff] }
 0x51e   : > { %8614 = vmatprep.mubr.msk.f32.mxu1 %vm521_vm3, %v11329_v20  ;;  %v13038_v20 = vld [vmem:[#allocation13_spill] sm:$0xff] }
 0x521   : > { %8615 = vmatmul.mubr.msk.f32.gmra.mrb[24].mxu1 %vm521_vm3, %v12947_v34  ;;  %v13040_v34 = vld [vmem:[#allocation44_spill] sm:$0xff] }
 0x522   : > { %8617 = vmatprep.mubr.msk.f32.mxu1 %vm521_vm3, %v11352_v48 }
 0x525   : > { %8618 = vmatmul.mubr.msk.f32.gmra.mrb[26].mxu1 %vm521_vm3, %v10991_v9 }
 0x526   : > { %8620 = vmatprep.mubr.msk.f32.mxu1 %vm521_vm3, %v11736_v52 }
 0x529   : > { %8621 = vmatmul.mubr.msk.f32.gmra.mrb[28].mxu1 %vm521_vm3, %v11287_v8  ;;  %v13036_v8 = vld [vmem:[#allocation14_spill] sm:$0xff] }
 0x52a   : > { %8623 = vmatprep.mubr.msk.f32.mxu1 %vm521_vm3, %v11352_v48  ;;  %v13041_v48 = vld [vmem:[#allocation46_spill] sm:$0xff] }
 0x52d   : > { %8624 = vmatmul.mubr.msk.f32.gmra.mrb[30].mxu1 %vm521_vm3, %v10991_v9  ;;  %v13016_v9 = vld [vmem:[#allocation30_spill] sm:$0xff] }
 0x52e   : > { %8628 = vmatprep.mubr.msk.f32.mxu1 %vm521_vm3, %v12974_v1 }
 0x531   : > { %8629 = vmatmul.mubr.msk.f32.vlgmr.msra.gmra.mrb[0].mxu1 %vm521_vm3, %v12975_v41 }
 0x532   : > { %8677 = vmatpush3.msk.msra.mxu1 %vm582_vm0, %v7194_v58  ;;  %8631 = vmatprep.mubr.msk.f32.mxu1 %vm521_vm3, %v12976_v44 }
 0x535   : > { %8632 = vmatmul.mubr.msk.f32.gmra.mrb[2].mxu1 %vm521_vm3, %v13013_v38 }
 0x536   : > { %8634 = vmatprep.mubr.msk.f32.mxu1 %vm521_vm3, %v13014_v51 }
 0x539   : > { %8635 = vmatmul.mubr.msk.f32.gmra.mrb[4].mxu1 %vm521_vm3, %v13015_v50 }
 0x53a   : > { %8637 = vmatprep.mubr.msk.f32.mxu1 %vm521_vm3, %v13016_v9 }
 0x53d   : > { %8638 = vmatmul.mubr.msk.f32.gmra.mrb[6].mxu1 %vm521_vm3, %v13017_v18 }
 0x53e   : > { %8640 = vmatprep.mubr.msk.f32.mxu1 %vm521_vm3, %v13018_v16 }
 0x541   : > { %8641 = vmatmul.mubr.msk.f32.gmra.mrb[8].mxu1 %vm521_vm3, %v13019_v36 }
 0x542   : > { %8643 = vmatprep.mubr.msk.f32.mxu1 %vm521_vm3, %v13020_v59 }
 0x545   : > { %8644 = vmatmul.mubr.msk.f32.gmra.mrb[10].mxu1 %vm521_vm3, %v13021_v55 }
 0x546   : > { %8646 = vmatprep.mubr.msk.f32.mxu1 %vm521_vm3, %v12986_v3 }
 0x549   : > { %8647 = vmatmul.mubr.msk.f32.gmra.mrb[12].mxu1 %vm521_vm3, %v12987_v30 }
 0x54a   : > { %8649 = vmatprep.mubr.msk.f32.mxu1 %vm521_vm3, %v13022_v33 }
 0x54d   : > { %8650 = vmatmul.mubr.msk.f32.gmra.mrb[14].mxu1 %vm521_vm3, %v13023_v2 }
 0x54e   : > { %8652 = vmatprep.mubr.msk.f32.mxu1 %vm521_vm3, %v13024_v10 }
 0x551   : > { %8653 = vmatmul.mubr.msk.f32.gmra.mrb[16].mxu1 %vm521_vm3, %v12991_v32 }
 0x552   : > { %8655 = vmatprep.mubr.msk.f32.mxu1 %vm521_vm3, %v13025_v60 }
 0x555   : > { %8656 = vmatmul.mubr.msk.f32.gmra.mrb[18].mxu1 %vm521_vm3, %v13026_v49 }
 0x556   : > { %8658 = vmatprep.mubr.msk.f32.mxu1 %vm521_vm3, %v13027_v42 }
 0x559   : > { %8659 = vmatmul.mubr.msk.f32.gmra.mrb[20].mxu1 %vm521_vm3, %v13028_v53 }
 0x55a   : > { %8661 = vmatprep.mubr.msk.f32.mxu1 %vm521_vm3, %v13029_v25 }
 0x55d   : > { %8662 = vmatmul.mubr.msk.f32.gmra.mrb[22].mxu1 %vm521_vm3, %v13030_v54 }
 0x55e   : > { %8664 = vmatprep.mubr.msk.f32.mxu1 %vm521_vm3, %v13031_v46 }
 0x561   : > { %8665 = vmatmul.mubr.msk.f32.gmra.mrb[24].mxu1 %vm521_vm3, %v11374_v26 }
 0x562   : > { %8667 = vmatprep.mubr.msk.f32.mxu1 %vm521_vm3, %v12997_v13 }
 0x565   : > { %8668 = vmatmul.mubr.msk.f32.gmra.mrb[26].mxu1 %vm521_vm3, %v12998_v12 }
 0x566   : > { %8670 = vmatprep.mubr.msk.f32.mxu1 %vm521_vm3, %v11814_v22  ;;  %v13042_v22 = vld [vmem:[#allocation47_spill] sm:$0xff] }
 0x569   : > { %8671 = vmatmul.mubr.msk.f32.gmra.mrb[28].mxu1 %vm521_vm3, %v11819_v39  ;;  %v13043_v39 = vld [vmem:[#allocation48_spill] sm:$0xff] }
 0x56a   : > { %8673 = vmatprep.mubr.msk.f32.mxu1 %vm521_vm3, %v12997_v13  ;;  %v13039_v13 = vld [vmem:[#allocation43_spill] sm:$0xff] }
 0x56d   : > { %8674 = vmatmul.mubr.msk.f32.gmra.mrb[30].mxu1 %vm521_vm3, %v12998_v12 }
 0x56e   : > { %8678 = vmatprep.mubr.msk.f32.mxu1 %vm521_vm3, %v13000_v43 }
 0x571   : > { %8679 = vmatmul.mubr.msk.f32.vlgmr.msra.gmra.mrb[0].mxu1 %vm521_vm3, %v13001_v61 }
 0x572   : > { %8681 = vmatprep.mubr.msk.f32.mxu1 %vm521_vm3, %v13032_v29 }
 0x575   : > { %8682 = vmatmul.mubr.msk.f32.gmra.mrb[2].mxu1 %vm521_vm3, %v11508_v57 }
 0x576   : > { %8684 = vmatprep.mubr.msk.f32.mxu1 %vm521_vm3, %v13033_v21 }
 0x579   : > { %8685 = vmatmul.mubr.msk.f32.gmra.mrb[4].mxu1 %vm521_vm3, %v11521_v56 }
 0x57a   : > { %8687 = vmatprep.mubr.msk.f32.mxu1 %vm521_vm3, %v13034_v4 }
 0x57d   : > { %8688 = vmatmul.mubr.msk.f32.gmra.mrb[6].mxu1 %vm521_vm3, %v11534_v5 }
 0x57e   : > { %8690 = vmatprep.mubr.msk.f32.mxu1 %vm521_vm3, %v13035_v24 }
 0x581   : > { %8691 = vmatmul.mubr.msk.f32.gmra.mrb[8].mxu1 %vm521_vm3, %v11547_v28 }
 0x582   : > { %8693 = vmatprep.mubr.msk.f32.mxu1 %vm521_vm3, %v13036_v8 }
 0x585   : > { %8694 = vmatmul.mubr.msk.f32.gmra.mrb[10].mxu1 %vm521_vm3, %v11560_v27 }
 0x586   : > { %8696 = vmatprep.mubr.msk.f32.mxu1 %vm521_vm3, %v13037_v19 }
 0x589   : > { %8697 = vmatmul.mubr.msk.f32.gmra.mrb[12].mxu1 %vm521_vm3, %v11573_v45 }
 0x58a   : > { %8699 = vmatprep.mubr.msk.f32.mxu1 %vm521_vm3, %v13038_v20 }
 0x58d   : > { %8700 = vmatmul.mubr.msk.f32.gmra.mrb[14].mxu1 %vm521_vm3, %v11586_v15 }
 0x58e   : > { %8702 = vmatprep.mubr.msk.f32.mxu1 %vm521_vm3, %v13009_v37 }
 0x591   : > { %8703 = vmatmul.mubr.msk.f32.gmra.mrb[16].mxu1 %vm521_vm3, %v13039_v13 }
 0x592   : > { %8705 = vmatprep.mubr.msk.f32.mxu1 %vm521_vm3, %v13040_v34 }
 0x595   : > { %8706 = vmatmul.mubr.msk.f32.gmra.mrb[18].mxu1 %vm521_vm3, %v11612_v6 }
 0x596   : > { %8708 = vmatprep.mubr.msk.f32.mxu1 %vm521_vm3, %v13011_v17 }
 0x599   : > { %8709 = vmatmul.mubr.msk.f32.gmra.mrb[20].mxu1 %vm521_vm3, %v13041_v48 }
 0x59a   : > { %8711 = vmatprep.mubr.msk.f32.mxu1 %vm521_vm3, %v13042_v22 }
 0x59d   : > { %8712 = vmatmul.mubr.msk.f32.gmra.mrb[22].mxu1 %vm521_vm3, %v11638_v63 }
 0x59e   : > { %8714 = vmatprep.mubr.msk.f32.mxu1 %vm521_vm3, %v13043_v39 }
 0x5a1   : > { %8715 = vmatmul.mubr.msk.f32.gmra.mrb[24].mxu1 %vm521_vm3, %v11651_v14 }
 0x5a2   : > { %8717 = vmatprep.mubr.msk.f32.mxu1 %vm521_vm3, %v11657_v62 }
 0x5a5   : > { %8718 = vmatmul.mubr.msk.f32.gmra.mrb[26].mxu1 %vm521_vm3, %v11662_v23 }
 0x5a6   : > { %8720 = vmatprep.mubr.msk.f32.mxu1 %vm521_vm3, %v11891_v11 }
 0x5a9   : > { %8721 = vmatmul.mubr.msk.f32.gmra.mrb[28].mxu1 %vm521_vm3, %v11896_v31 }
 0x5aa   : > { %8723 = vmatprep.mubr.msk.f32.mxu1 %vm521_vm3, %v11657_v62 }
 0x5ad   : > { %8724 = vmatmul.mubr.msk.f32.gmra.mrb[30].mxu1 %vm521_vm3, %v11662_v23 }
 0x644   : > { %v12098_v26 = vpop.f32.mrb[0].mxu1 }
 0x645   : > { %v6251_v7 = vsel %vm521_vm3, %v12098_v26, 0.0  ;;  %v6320_v57 = vmul.f32 %v12098_v26, %v12098_v26  ;;  %v12104_v56 = vpop.f32.mrb[1].mxu1 }
 0x646   : > { %v6250_v5 = vsel %vm521_vm3, %v12104_v56, 0.0  ;;  %v6319_v28 = vmul.f32 %v12104_v56, %v12104_v56 }
 0x647   : > { %v6352_v27 = vsel %vm521_vm3, %v6320_v57, 0.0  ;;  %v6252_v45 = vadd.f32 %v6251_v7, %v6250_v5 }
 0x648   : > { %v6351_v15 = vsel %vm521_vm3, %v6319_v28, 0.0  ;;  %v12112_v35 = vpop.f32.mrb[2].mxu1 }
 0x649   : > { %v6353_v6 = vadd.f32 %v6352_v27, %v6351_v15  ;;  %v12114_v0 = vpop.f32.mrb[3].mxu1  ;;  %v6322_v63 = vmul.f32 %v12112_v35, %v12112_v35  ;;  %v6255_v23 = vsel %vm521_vm3, %v12112_v35, 0.0 }
 0x64a   : > { %v6253_v14 = vsel %vm521_vm3, %v12114_v0, 0.0  ;;  %v6321_v31 = vmul.f32 %v12114_v0, %v12114_v0 }
 0x64b   : > { %v6254_v62 = vadd.f32 %v6253_v14, %v6252_v45  ;;  %v6356_v30 = vsel %vm521_vm3, %v6322_v63, 0.0 }
 0x64c   : > { %v6354_v52 = vsel %vm521_vm3, %v6321_v31, 0.0  ;;  %v12125_v1 = vpop.f32.mrb[4].mxu1 }
 0x64d   : > { %v6355_v41 = vadd.f32 %v6354_v52, %v6353_v6  ;;  %v12127_v44 = vpop.f32.mrb[5].mxu1  ;;  %v6256_v3 = vadd.f32 %v6255_v23, %v6254_v62  ;;  %v6324_v32 = vmul.f32 %v12125_v1, %v12125_v1  ;;  %v6259_v47 = vsel %vm521_vm3, %v12125_v1, 0.0 }
 0x64e   : > { %v6257_v12 = vsel %vm521_vm3, %v12127_v44, 0.0  ;;  %v6323_v40 = vmul.f32 %v12127_v44, %v12127_v44 }
 0x64f   : > { %v6258_v43 = vadd.f32 %v6257_v12, %v6256_v3  ;;  %v6357_v61 = vadd.f32 %v6356_v30, %v6355_v41  ;;  %v6360_v51 = vsel %vm521_vm3, %v6324_v32, 0.0 }
 0x650   : > { %v6358_v17 = vsel %vm521_vm3, %v6323_v40, 0.0  ;;  %v12139_v11 = vpop.f32.mrb[6].mxu1 }
 0x651   : > { %v6359_v37 = vadd.f32 %v6358_v17, %v6357_v61  ;;  %v12141_v58 = vpop.f32.mrb[7].mxu1  ;;  %v6260_v38 = vadd.f32 %v6259_v47, %v6258_v43  ;;  %v6326_v50 = vmul.f32 %v12139_v11, %v12139_v11  ;;  %v6263_v59 = vsel %vm521_vm3, %v12139_v11, 0.0 }
 0x652   : > { %v6261_v9 = vsel %vm521_vm3, %v12141_v58, 0.0  ;;  %v6325_v18 = vmul.f32 %v12141_v58, %v12141_v58 }
 0x653   : > { %v6262_v16 = vadd.f32 %v6261_v9, %v6260_v38  ;;  %v6361_v36 = vadd.f32 %v6360_v51, %v6359_v37  ;;  %v6364_v49 = vsel %vm521_vm3, %v6326_v50, 0.0 }
 0x654   : > { %v6362_v55 = vsel %vm521_vm3, %v6325_v18, 0.0  ;;  %v12153_v33 = vpop.f32.mrb[8].mxu1 }
 0x655   : > { %v6363_v2 = vadd.f32 %v6362_v55, %v6361_v36  ;;  %v12155_v10 = vpop.f32.mrb[9].mxu1  ;;  %v6264_v60 = vadd.f32 %v6263_v59, %v6262_v16  ;;  %v6328_v42 = vmul.f32 %v12153_v33, %v12153_v33  ;;  %v6267_v29 = vsel %vm521_vm3, %v12153_v33, 0.0 }
 0x656   : > { %v6265_v53 = vsel %vm521_vm3, %v12155_v10, 0.0  ;;  %v6327_v25 = vmul.f32 %v12155_v10, %v12155_v10 }
 0x657   : > { %v6266_v54 = vadd.f32 %v6265_v53, %v6264_v60  ;;  %v6365_v46 = vadd.f32 %v6364_v49, %v6363_v2  ;;  %v6368_v20 = vsel %vm521_vm3, %v6328_v42, 0.0 }
 0x658   : > { %v6366_v21 = vsel %vm521_vm3, %v6327_v25, 0.0  ;;  %v12167_v4 = vpop.f32.mrb[10].mxu1 }
 0x659   : > { %v6367_v24 = vadd.f32 %v6366_v21, %v6365_v46  ;;  %v12169_v8 = vpop.f32.mrb[11].mxu1  ;;  %v6268_v19 = vadd.f32 %v6267_v29, %v6266_v54  ;;  %v6330_v13 = vmul.f32 %v12167_v4, %v12167_v4  ;;  %v6271_v7 = vsel %vm521_vm3, %v12167_v4, 0.0 }
 0x65a   : > { %v6269_v34 = vsel %vm521_vm3, %v12169_v8, 0.0  ;;  %v6329_v48 = vmul.f32 %v12169_v8, %v12169_v8 }
 0x65b   : > { %v6270_v22 = vadd.f32 %v6269_v34, %v6268_v19  ;;  %v6369_v39 = vadd.f32 %v6368_v20, %v6367_v24  ;;  %v6372_v15 = vsel %vm521_vm3, %v6330_v13, 0.0 }
 0x65c   : > { %v6370_v57 = vsel %vm521_vm3, %v6329_v48, 0.0  ;;  %v12181_v5 = vpop.f32.mrb[12].mxu1 }
 0x65d   : > { %v6371_v28 = vadd.f32 %v6370_v57, %v6369_v39  ;;  %v12183_v27 = vpop.f32.mrb[13].mxu1  ;;  %v6272_v45 = vadd.f32 %v6271_v7, %v6270_v22  ;;  %v6332_v6 = vmul.f32 %v12181_v5, %v12181_v5  ;;  %v6275_v23 = vsel %vm521_vm3, %v12181_v5, 0.0 }
 0x65e   : > { %v6273_v63 = vsel %vm521_vm3, %v12183_v27, 0.0  ;;  %v6331_v14 = vmul.f32 %v12183_v27, %v12183_v27 }
 0x65f   : > { %v6274_v31 = vadd.f32 %v6273_v63, %v6272_v45  ;;  %v6373_v62 = vadd.f32 %v6372_v15, %v6371_v28  ;;  %v6376_v12 = vsel %vm521_vm3, %v6332_v6, 0.0 }
 0x660   : > { %v6374_v52 = vsel %vm521_vm3, %v6331_v14, 0.0  ;;  %v12195_v41 = vpop.f32.mrb[14].mxu1 }
 0x661   : > { %v6375_v3 = vadd.f32 %v6374_v52, %v6373_v62  ;;  %v12197_v30 = vpop.f32.mrb[15].mxu1  ;;  %v6276_v32 = vadd.f32 %v6275_v23, %v6274_v31  ;;  %v6334_v40 = vmul.f32 %v12195_v41, %v12195_v41  ;;  %v6279_v37 = vsel %vm521_vm3, %v12195_v41, 0.0 }
 0x662   : > { %v6277_v43 = vsel %vm521_vm3, %v12197_v30, 0.0  ;;  %v6333_v61 = vmul.f32 %v12197_v30, %v12197_v30 }
 0x663   : > { %v6278_v47 = vadd.f32 %v6277_v43, %v6276_v32  ;;  %v6377_v17 = vadd.f32 %v6376_v12, %v6375_v3  ;;  %v6380_v16 = vsel %vm521_vm3, %v6334_v40, 0.0 }
 0x664   : > { %v6378_v38 = vsel %vm521_vm3, %v6333_v61, 0.0  ;;  %v12209_v51 = vpop.f32.mrb[16].mxu1 }
 0x665   : > { %v6379_v50 = vadd.f32 %v6378_v38, %v6377_v17  ;;  %v12211_v9 = vpop.f32.mrb[17].mxu1  ;;  %v6280_v18 = vadd.f32 %v6279_v37, %v6278_v47  ;;  %v6336_v36 = vmul.f32 %v12209_v51, %v12209_v51  ;;  %v6283_v49 = vsel %vm521_vm3, %v12209_v51, 0.0 }
 0x666   : > { %v6281_v59 = vsel %vm521_vm3, %v12211_v9, 0.0  ;;  %v6335_v55 = vmul.f32 %v12211_v9, %v12211_v9 }
 0x667   : > { %v6282_v2 = vadd.f32 %v6281_v59, %v6280_v18  ;;  %v6381_v60 = vadd.f32 %v6380_v16, %v6379_v50  ;;  %v6384_v29 = vsel %vm521_vm3, %v6336_v36, 0.0 }
 0x668   : > { %v6382_v42 = vsel %vm521_vm3, %v6335_v55, 0.0  ;;  %v12223_v53 = vpop.f32.mrb[18].mxu1 }
 0x669   : > { %v6383_v25 = vadd.f32 %v6382_v42, %v6381_v60  ;;  %v12225_v54 = vpop.f32.mrb[19].mxu1  ;;  %v6284_v46 = vadd.f32 %v6283_v49, %v6282_v2  ;;  %v6338_v21 = vmul.f32 %v12223_v53, %v12223_v53  ;;  %v6287_v34 = vsel %vm521_vm3, %v12223_v53, 0.0 }
 0x66a   : > { %v6285_v24 = vsel %vm521_vm3, %v12225_v54, 0.0  ;;  %v6337_v19 = vmul.f32 %v12225_v54, %v12225_v54 }
 0x66b   : > { %v6286_v20 = vadd.f32 %v6285_v24, %v6284_v46  ;;  %v6385_v13 = vadd.f32 %v6384_v29, %v6383_v25  ;;  %v6388_v28 = vsel %vm521_vm3, %v6338_v21, 0.0 }
 0x66c   : > { %v6386_v48 = vsel %vm521_vm3, %v6337_v19, 0.0  ;;  %v12237_v22 = vpop.f32.mrb[20].mxu1 }
 0x66d   : > { %v6387_v39 = vadd.f32 %v6386_v48, %v6385_v13  ;;  %v12239_v7 = vpop.f32.mrb[21].mxu1  ;;  %v6288_v57 = vadd.f32 %v6287_v34, %v6286_v20  ;;  %v6340_v45 = vmul.f32 %v12237_v22, %v12237_v22  ;;  %v6291_v31 = vsel %vm521_vm3, %v12237_v22, 0.0 }
 0x66e   : > { %v6289_v15 = vsel %vm521_vm3, %v12239_v7, 0.0  ;;  %v6339_v6 = vmul.f32 %v12239_v7, %v12239_v7 }
 0x66f   : > { %v6290_v63 = vadd.f32 %v6289_v15, %v6288_v57  ;;  %v6389_v14 = vadd.f32 %v6388_v28, %v6387_v39  ;;  %v6392_v12 = vsel %vm521_vm3, %v6340_v45, 0.0 }
 0x670   : > { %v6390_v62 = vsel %vm521_vm3, %v6339_v6, 0.0  ;;  %v12251_v23 = vpop.f32.mrb[22].mxu1 }
 0x671   : > { %v6391_v52 = vadd.f32 %v6390_v62, %v6389_v14  ;;  %v12253_v3 = vpop.f32.mrb[23].mxu1  ;;  %v6292_v32 = vadd.f32 %v6291_v31, %v6290_v63  ;;  %v6342_v40 = vmul.f32 %v12251_v23, %v12251_v23  ;;  %v6295_v37 = vsel %vm521_vm3, %v12251_v23, 0.0 }
 0x672   : > { %v6293_v43 = vsel %vm521_vm3, %v12253_v3, 0.0  ;;  %v6341_v61 = vmul.f32 %v12253_v3, %v12253_v3 }
 0x673   : > { %v6294_v47 = vadd.f32 %v6293_v43, %v6292_v32  ;;  %v6393_v17 = vadd.f32 %v6392_v12, %v6391_v52  ;;  %v6396_v59 = vsel %vm521_vm3, %v6342_v40, 0.0 }
 0x674   : > { %v6394_v38 = vsel %vm521_vm3, %v6341_v61, 0.0  ;;  %v12265_v50 = vpop.f32.mrb[24].mxu1 }
 0x675   : > { %v6395_v18 = vadd.f32 %v6394_v38, %v6393_v17  ;;  %v12267_v16 = vpop.f32.mrb[25].mxu1  ;;  %v6296_v36 = vadd.f32 %v6295_v37, %v6294_v47  ;;  %v6344_v55 = vmul.f32 %v12265_v50, %v12265_v50  ;;  %v6299_v25 = vsel %vm521_vm3, %v12265_v50, 0.0 }
 0x676   : > { %v6297_v2 = vsel %vm521_vm3, %v12267_v16, 0.0  ;;  %v6343_v60 = vmul.f32 %v12267_v16, %v12267_v16 }
 0x677   : > { %v6298_v49 = vadd.f32 %v6297_v2, %v6296_v36  ;;  %v6397_v42 = vadd.f32 %v6396_v59, %v6395_v18  ;;  %v6400_v20 = vsel %vm521_vm3, %v6344_v55, 0.0 }
 0x678   : > { %v6398_v46 = vsel %vm521_vm3, %v6343_v60, 0.0  ;;  %v12279_v29 = vpop.f32.mrb[26].mxu1 }
 0x679   : > { %v6399_v21 = vadd.f32 %v6398_v46, %v6397_v42  ;;  %v12281_v24 = vpop.f32.mrb[27].mxu1  ;;  %v6300_v19 = vadd.f32 %v6299_v25, %v6298_v49  ;;  %v6346_v13 = vmul.f32 %v12279_v29, %v12279_v29  ;;  %v6303_v28 = vsel %vm521_vm3, %v12279_v29, 0.0 }
 0x67a   : > { %v6301_v34 = vsel %vm521_vm3, %v12281_v24, 0.0  ;;  %v6345_v48 = vmul.f32 %v12281_v24, %v12281_v24 }
 0x67b   : > { %v6302_v39 = vadd.f32 %v6301_v34, %v6300_v19  ;;  %v6401_v57 = vadd.f32 %v6400_v20, %v6399_v21  ;;  %v6404_v31 = vsel %vm521_vm3, %v6346_v13, 0.0 }
 0x67c   : > { %v6402_v45 = vsel %vm521_vm3, %v6345_v48, 0.0  ;;  %v12293_v15 = vpop.f32.mrb[28].mxu1 }
 0x67d   : > { %v6403_v6 = vadd.f32 %v6402_v45, %v6401_v57  ;;  %v12295_v63 = vpop.f32.mrb[29].mxu1  ;;  %v6304_v14 = vadd.f32 %v6303_v28, %v6302_v39  ;;  %v6348_v62 = vmul.f32 %v12293_v15, %v12293_v15  ;;  %v6307_v43 = vsel %vm521_vm3, %v12293_v15, 0.0 }
 0x67e   : > { %v6305_v52 = vsel %vm521_vm3, %v12295_v63, 0.0  ;;  %v6347_v32 = vmul.f32 %v12295_v63, %v12295_v63 }
 0x67f   : > { %v6306_v12 = vadd.f32 %v6305_v52, %v6304_v14  ;;  %v6405_v40 = vadd.f32 %v6404_v31, %v6403_v6  ;;  %v6408_v18 = vsel %vm521_vm3, %v6348_v62, 0.0 }
 0x680   : > { %v6406_v61 = vsel %vm521_vm3, %v6347_v32, 0.0  ;;  %v12307_v47 = vpop.f32.mrb[30].mxu1 }
 0x681   : > { %v6407_v17 = vadd.f32 %v6406_v61, %v6405_v40  ;;  %v12309_v37 = vpop.f32.mrb[31].mxu1  ;;  %v6308_v38 = vadd.f32 %v6307_v43, %v6306_v12  ;;  %v6350_v36 = vmul.f32 %v12307_v47, %v12307_v47  ;;  %v6311_v49 = vsel %vm521_vm3, %v12307_v47, 0.0 }
 0x682   : > { %v6309_v59 = vsel %vm521_vm3, %v12309_v37, 0.0  ;;  %v6349_v55 = vmul.f32 %v12309_v37, %v12309_v37 }
 0x683   : > { %v6310_v2 = vadd.f32 %v6309_v59, %v6308_v38  ;;  %v6409_v60 = vadd.f32 %v6408_v18, %v6407_v17  ;;  %v6412_v21 = vsel %vm521_vm3, %v6350_v36, 0.0 }
 0x684   : > { %v6410_v42 = vsel %vm521_vm3, %v6349_v55, 0.0 }
 0x685   : > { %v6312_v25 = vadd.f32 %v6311_v49, %v6310_v2  ;;  %v6411_v46 = vadd.f32 %v6410_v42, %v6409_v60 }
 0x687   : > { %v6313_v19 = vrot.slane %v6312_v25, 4  ;;  %v6413_v20 = vadd.f32 %v6412_v21, %v6411_v46 }
 0x689   : > { %v6314_v13 = vadd.f32 %v6313_v19, %v6312_v25  ;;  %v6414_v34 = vrot.slane %v6413_v20, 4 }
 0x68b   : > { %v6315_v48 = vrot.slane %v6314_v13, 2  ;;  %v6415_v39 = vadd.f32 %v6414_v34, %v6413_v20 }
 0x68d   : > { %v6316_v57 = vadd.f32 %v6315_v48, %v6314_v13  ;;  %v6416_v28 = vrot.slane %v6415_v39, 2 }
 0x68f   : > { %v6317_v45 = vrot.slane %v6316_v57, 1  ;;  %v6417_v6 = vadd.f32 %v6416_v28, %v6415_v39 }
 0x691   : > { %v6318_v14 = vadd.f32 %v6317_v45, %v6316_v57  ;;  %v6418_v31 = vrot.slane %v6417_v6, 1 }
 0x693   : > { %v6419_v62 = vadd.f32 %v6418_v31, %v6417_v6  ;;  %v12322_v52 = vmul.f32 0.00390625, %v6318_v14 }
 0x695   : > { %v6421_v32 = vmul.f32 0.00390625, %v6419_v62  ;;  %v6422_v12 = vmul.f32 %v12322_v52, %v12322_v52  ;;  %v6424_v40 = vsub.f32 %v12104_v56, %v12322_v52  ;;  %v6425_v43 = vsub.f32 %v12098_v26, %v12322_v52 }
 0x696   : > { %v6426_v61 = vsub.f32 %v12114_v0, %v12322_v52  ;;  %v6427_v17 = vsub.f32 %v12112_v35, %v12322_v52  ;;  %v6428_v38 = vsub.f32 %v12127_v44, %v12322_v52  ;;  %v6429_v18 = vsub.f32 %v12125_v1, %v12322_v52 }
 0x697   : > { %v6423_v36 = vsub.f32 %v6421_v32, %v6422_v12  ;;  %v6430_v59 = vsub.f32 %v12141_v58, %v12322_v52  ;;  %v6431_v56 = vsub.f32 %v12139_v11, %v12322_v52  ;;  %v6432_v26 = vsub.f32 %v12155_v10, %v12322_v52 }
 0x698   : > { %v6433_v0 = vsub.f32 %v12153_v33, %v12322_v52  ;;  %v6434_v35 = vsub.f32 %v12169_v8, %v12322_v52  ;;  %v6435_v44 = vsub.f32 %v12167_v4, %v12322_v52  ;;  %v6436_v1 = vsub.f32 %v12183_v27, %v12322_v52 }
 0x699   : > { %v6437_v58 = vsub.f32 %v12181_v5, %v12322_v52  ;;  %v6438_v11 = vsub.f32 %v12197_v30, %v12322_v52  ;;  %v6439_v10 = vsub.f32 %v12195_v41, %v12322_v52  ;;  %v6440_v33 = vsub.f32 %v12211_v9, %v12322_v52 }
 0x69a   : > { %v6441_v8 = vsub.f32 %v12209_v51, %v12322_v52  ;;  %v6442_v4 = vsub.f32 %v12225_v54, %v12322_v52  ;;  %v6443_v27 = vsub.f32 %v12223_v53, %v12322_v52  ;;  %v6444_v5 = vsub.f32 %v12239_v7, %v12322_v52 }
 0x69b   : > { %v6445_v30 = vsub.f32 %v12237_v22, %v12322_v52  ;;  %v6446_v41 = vsub.f32 %v12253_v3, %v12322_v52  ;;  %v6447_v9 = vsub.f32 %v12251_v23, %v12322_v52  ;;  %v6448_v51 = vsub.f32 %v12267_v16, %v12322_v52 }
 0x69c   : > { %v6449_v54 = vsub.f32 %v12265_v50, %v12322_v52  ;;  %v6450_v53 = vsub.f32 %v12281_v24, %v12322_v52  ;;  %v6451_v7 = vsub.f32 %v12279_v29, %v12322_v52  ;;  %v6452_v22 = vsub.f32 %v12295_v63, %v12322_v52 }
 0x69d   : > { %v6453_v3 = vsub.f32 %v12293_v15, %v12322_v52  ;;  %v6454_v23 = vsub.f32 %v12309_v37, %v12322_v52  ;;  %v6455_v16 = vsub.f32 %v12307_v47, %v12322_v52  ;;  %v6456_v55 = vadd.f32 1e-05, %v6423_v36 }
 0x69f   : > { %9248 = vrsqrt.f32 %v6456_v55  ;;  %v9265_v55 = vld [vmem:[%s9335_s21 + $0x78] sm:$0xff] }
 0x6a9   : > { %v9249_v50 = vpop.eup %9248 }
 0x6aa   : > { %v6458_v2 = vmul.f32 %v9249_v50, %v6424_v40  ;;  %v6459_v24 = vmul.f32 %v9249_v50, %v6425_v43  ;;  %v6460_v60 = vmul.f32 %v9249_v50, %v6426_v61  ;;  %v6461_v49 = vmul.f32 %v9249_v50, %v6427_v17  ;;  %v9250_v17 = vld [vmem:[%s9335_s21] sm:$0xff] }
 0x6ab   : > { %v6462_v29 = vmul.f32 %v9249_v50, %v6428_v38  ;;  %v6463_v42 = vmul.f32 %v9249_v50, %v6429_v18  ;;  %v6464_v25 = vmul.f32 %v9249_v50, %v6430_v59  ;;  %v6465_v63 = vmul.f32 %v9249_v50, %v6431_v56  ;;  %v9251_v18 = vld [vmem:[%s9335_s21 + $0x8] sm:$0xff]  ;;  %v9252_v59 = vld [vmem:[%s9335_s21 + $0x10] sm:$0xff] }
 0x6ac   : > { %v6466_v46 = vmul.f32 %v9249_v50, %v6432_v26  ;;  %v6467_v21 = vmul.f32 %v9249_v50, %v6433_v0  ;;  %v6468_v15 = vmul.f32 %v9249_v50, %v6434_v35  ;;  %v6469_v19 = vmul.f32 %v9249_v50, %v6435_v44  ;;  %v9253_v26 = vld [vmem:[%s9335_s21 + $0x18] sm:$0xff]  ;;  %v9254_v35 = vld [vmem:[%s9335_s21 + $0x20] sm:$0xff] }
 0x6ad   : > { %v6470_v20 = vmul.f32 %v9249_v50, %v6436_v1  ;;  %v6471_v37 = vmul.f32 %v9249_v50, %v6437_v58  ;;  %v6472_v13 = vmul.f32 %v9249_v50, %v6438_v11  ;;  %v6473_v47 = vmul.f32 %v9249_v50, %v6439_v10  ;;  %v9255_v1 = vld [vmem:[%s9335_s21 + $0x28] sm:$0xff]  ;;  %v9256_v11 = vld [vmem:[%s9335_s21 + $0x30] sm:$0xff] }
 0x6ae   : > { %v6474_v34 = vmul.f32 %v9249_v50, %v6440_v33  ;;  %v6475_v48 = vmul.f32 %v9249_v50, %v6441_v8  ;;  %v6476_v39 = vmul.f32 %v9249_v50, %v6442_v4  ;;  %v6477_v57 = vmul.f32 %v9249_v50, %v6443_v27  ;;  %v9257_v33 = vld [vmem:[%s9335_s21 + $0x38] sm:$0xff]  ;;  %v9258_v4 = vld [vmem:[%s9335_s21 + $0x40] sm:$0xff] }
 0x6af   : > { %v12390_v28 = vmul.f32 %v9249_v50, %v6444_v5  ;;  %v12392_v45 = vmul.f32 %v9249_v50, %v6445_v30  ;;  %v12394_v6 = vmul.f32 %v9249_v50, %v6446_v41  ;;  %v12396_v14 = vmul.f32 %v9249_v50, %v6447_v9  ;;  %v9259_v5 = vld [vmem:[%s9335_s21 + $0x48] sm:$0xff]  ;;  %v9260_v41 = vld [vmem:[%s9335_s21 + $0x50] sm:$0xff] }
 0x6b0   : > { %v12398_v31 = vmul.f32 %v9249_v50, %v6448_v51  ;;  %v12400_v62 = vmul.f32 %v9249_v50, %v6449_v54  ;;  %v12402_v52 = vmul.f32 %v9249_v50, %v6450_v53  ;;  %v12404_v32 = vmul.f32 %v9249_v50, %v6451_v7  ;;  %v9261_v51 = vld [vmem:[%s9335_s21 + $0x58] sm:$0xff]  ;;  %v9262_v53 = vld [vmem:[%s9335_s21 + $0x60] sm:$0xff] }
 0x6b1   : > { %v12413_v12 = vmul.f32 %v9249_v50, %v6452_v22  ;;  %v12415_v40 = vmul.f32 %v9249_v50, %v6453_v3  ;;  %v12417_v43 = vmul.f32 %v9249_v50, %v6454_v23  ;;  %v12419_v61 = vmul.f32 %v9249_v50, %v6455_v16  ;;  %v9263_v22 = vld [vmem:[%s9335_s21 + $0x68] sm:$0xff]  ;;  %v9264_v23 = vld [vmem:[%s9335_s21 + $0x70] sm:$0xff] }
 0x6b2   : > { %v6490_v38 = vadd.f32 %v9250_v17, %v6458_v2  ;;  %v6491_v36 = vadd.f32 %v9251_v18, %v6459_v24  ;;  %v6492_v56 = vadd.f32 %v9252_v59, %v6460_v60  ;;  %v6493_v0 = vadd.f32 %v9253_v26, %v6461_v49  ;;  %v9266_v2 = vld [vmem:[%s9335_s21 + $0x80] sm:$0xff]  ;;  %v9267_v60 = vld [vmem:[%s9335_s21 + $0x88] sm:$0xff]  ;;  %v9280_v17 = vld [vmem:[%s9335_s21 + $0xf0] sm:$0xff] }
 0x6b3   : > { %v6494_v44 = vadd.f32 %v9254_v35, %v6462_v29  ;;  %v6495_v58 = vadd.f32 %v9255_v1, %v6463_v42  ;;  %v6496_v10 = vadd.f32 %v9256_v11, %v6464_v25  ;;  %v6497_v8 = vadd.f32 %v9257_v33, %v6465_v63  ;;  %v9268_v29 = vld [vmem:[%s9335_s21 + $0x90] sm:$0xff]  ;;  %v9269_v25 = vld [vmem:[%s9335_s21 + $0x98] sm:$0xff] }
 0x6b4   : > { %v6498_v27 = vadd.f32 %v9258_v4, %v6466_v46  ;;  %v6499_v30 = vadd.f32 %v9259_v5, %v6467_v21  ;;  %v6500_v9 = vadd.f32 %v9260_v41, %v6468_v15  ;;  %v6501_v54 = vadd.f32 %v9261_v51, %v6469_v19  ;;  %6522 = vst.msk [vmem:[%s12411_s6] sm:$0xff] %vm521_vm3, %v6490_v38  ;;  %v9270_v46 = vld [vmem:[%s9335_s21 + $0xa0] sm:$0xff]  ;;  %v9271_v15 = vld [vmem:[%s9335_s21 + $0xa8] sm:$0xff]  ;;  %v9281_v18 = vld [vmem:[%s9335_s21 + $0xf8] sm:$0xff] }
 0x6b5   : > { %6523 = vst.msk [vmem:[%s12411_s6 + $0x8] sm:$0xff] %vm521_vm3, %v6491_v36  ;;  %6524 = vst.msk [vmem:[%s12411_s6 + $0x10] sm:$0xff] %vm521_vm3, %v6492_v56  ;;  %v6502_v7 = vadd.f32 %v9262_v53, %v6470_v20  ;;  %v6503_v3 = vadd.f32 %v9263_v22, %v6471_v37  ;;  %v6504_v16 = vadd.f32 %v9264_v23, %v6472_v13  ;;  %v9272_v20 = vld [vmem:[%s9335_s21 + $0xb0] sm:$0xff]  ;;  %v9273_v13 = vld [vmem:[%s9335_s21 + $0xb8] sm:$0xff] }
 0x6b6   : > { %6525 = vst.msk [vmem:[%s12411_s6 + $0x18] sm:$0xff] %vm521_vm3, %v6493_v0  ;;  %v6505_v50 = vadd.f32 %v9265_v55, %v6473_v47  ;;  %6526 = vst.msk [vmem:[%s12411_s6 + $0x20] sm:$0xff] %vm521_vm3, %v6494_v44  ;;  %v6506_v24 = vadd.f32 %v9266_v2, %v6474_v34  ;;  %v6507_v49 = vadd.f32 %v9267_v60, %v6475_v48  ;;  %v9274_v34 = vld [vmem:[%s9335_s21 + $0xc0] sm:$0xff] }
 0x6b7   : > { %6527 = vst.msk [vmem:[%s12411_s6 + $0x28] sm:$0xff] %vm521_vm3, %v6495_v58  ;;  %6528 = vst.msk [vmem:[%s12411_s6 + $0x30] sm:$0xff] %vm521_vm3, %v6496_v10  ;;  %v6508_v42 = vadd.f32 %v9268_v29, %v6476_v39  ;;  %v6509_v63 = vadd.f32 %v9269_v25, %v6477_v57  ;;  %v6510_v21 = vadd.f32 %v9270_v46, %v12390_v28  ;;  %v9275_v39 = vld [vmem:[%s9335_s21 + $0xc8] sm:$0xff]  ;;  %v9276_v28 = vld [vmem:[%s9335_s21 + $0xd0] sm:$0xff] }
 0x6b8   : > { %6529 = vst.msk [vmem:[%s12411_s6 + $0x38] sm:$0xff] %vm521_vm3, %v6497_v8  ;;  %6530 = vst.msk [vmem:[%s12411_s6 + $0x40] sm:$0xff] %vm521_vm3, %v6498_v27  ;;  %v6511_v19 = vadd.f32 %v9271_v15, %v12392_v45  ;;  %v6512_v37 = vadd.f32 %v9272_v20, %v12394_v6  ;;  %v6513_v47 = vadd.f32 %v9273_v13, %v12396_v14  ;;  %v9277_v6 = vld [vmem:[%s9335_s21 + $0xd8] sm:$0xff] }
 0x6b9   : > { %6531 = vst.msk [vmem:[%s12411_s6 + $0x48] sm:$0xff] %vm521_vm3, %v6499_v30  ;;  %6532 = vst.msk [vmem:[%s12411_s6 + $0x50] sm:$0xff] %vm521_vm3, %v6500_v9  ;;  %v6514_v48 = vadd.f32 %v9274_v34, %v12398_v31  ;;  %v6515_v57 = vadd.f32 %v9275_v39, %v12400_v62  ;;  %v6516_v45 = vadd.f32 %v9276_v28, %v12402_v52  ;;  %v9278_v31 = vld [vmem:[%s9335_s21 + $0xe0] sm:$0xff]  ;;  %v9279_v52 = vld [vmem:[%s9335_s21 + $0xe8] sm:$0xff] }
 0x6ba   : > { %6533 = vst.msk [vmem:[%s12411_s6 + $0x58] sm:$0xff] %vm521_vm3, %v6501_v54  ;;  %6534 = vst.msk [vmem:[%s12411_s6 + $0x60] sm:$0xff] %vm521_vm3, %v6502_v7  ;;  %v6517_v14 = vadd.f32 %v9277_v6, %v12404_v32  ;;  %v6518_v62 = vadd.f32 %v9278_v31, %v12413_v12  ;;  %v6519_v32 = vadd.f32 %v9279_v52, %v12415_v40 }
 0x6bb   : > { %6535 = vst.msk [vmem:[%s12411_s6 + $0x68] sm:$0xff] %vm521_vm3, %v6503_v3  ;;  %6536 = vst.msk [vmem:[%s12411_s6 + $0x70] sm:$0xff] %vm521_vm3, %v6504_v16  ;;  %v6520_v38 = vadd.f32 %v9280_v17, %v12417_v43  ;;  %v6521_v36 = vadd.f32 %v9281_v18, %v12419_v61 }
 0x6bc   : > { %6537 = vst.msk [vmem:[%s12411_s6 + $0x78] sm:$0xff] %vm521_vm3, %v6505_v50  ;;  %6538 = vst.msk [vmem:[%s12411_s6 + $0x80] sm:$0xff] %vm521_vm3, %v6506_v24 }
 0x6bd   : > { %6539 = vst.msk [vmem:[%s12411_s6 + $0x88] sm:$0xff] %vm521_vm3, %v6507_v49  ;;  %6540 = vst.msk [vmem:[%s12411_s6 + $0x90] sm:$0xff] %vm521_vm3, %v6508_v42 }
 0x6be   : > { %6541 = vst.msk [vmem:[%s12411_s6 + $0x98] sm:$0xff] %vm521_vm3, %v6509_v63  ;;  %6542 = vst.msk [vmem:[%s12411_s6 + $0xa0] sm:$0xff] %vm521_vm3, %v6510_v21 }
 0x6bf   : > { %6543 = vst.msk [vmem:[%s12411_s6 + $0xa8] sm:$0xff] %vm521_vm3, %v6511_v19  ;;  %6544 = vst.msk [vmem:[%s12411_s6 + $0xb0] sm:$0xff] %vm521_vm3, %v6512_v37 }
 0x6c0   : > { %6545 = vst.msk [vmem:[%s12411_s6 + $0xb8] sm:$0xff] %vm521_vm3, %v6513_v47  ;;  %6546 = vst.msk [vmem:[%s12411_s6 + $0xc0] sm:$0xff] %vm521_vm3, %v6514_v48 }
 0x6c1   : > { %6547 = vst.msk [vmem:[%s12411_s6 + $0xc8] sm:$0xff] %vm521_vm3, %v6515_v57  ;;  %6548 = vst.msk [vmem:[%s12411_s6 + $0xd0] sm:$0xff] %vm521_vm3, %v6516_v45 }
 0x6c2   : > { %6549 = vst.msk [vmem:[%s12411_s6 + $0xd8] sm:$0xff] %vm521_vm3, %v6517_v14  ;;  %6550 = vst.msk [vmem:[%s12411_s6 + $0xe0] sm:$0xff] %vm521_vm3, %v6518_v62 }
 0x6c3   : > { %6551 = vst.msk [vmem:[%s12411_s6 + $0xe8] sm:$0xff] %vm521_vm3, %v6519_v32  ;;  %6552 = vst.msk [vmem:[%s12411_s6 + $0xf0] sm:$0xff] %vm521_vm3, %v6520_v38 }
 0x6c4   : > { %6553 = vst.msk [vmem:[%s12411_s6 + $0xf8] sm:$0xff] %vm521_vm3, %v6521_v36 }
 0x6c5 PF: > { %s13_s12 = sadd.s32 1, %s9288_s12  }
 0x6c6   : > { %p10_p4 = scmp.ge.s32.totalorder %s13_s12, 4  }
 0x6c8   :  { %12 = sbr.rel (!%p10_p4) target bundleno = 1 (0x1), region = 78 }

</bundles_post_ra>
